<compile_context>
chip_gen: v7x
topology: tpu7x:2x2x1
jax: 0.10.0
libtpu: 0.0.40
codegen_flags: <defaults>
</compile_context>

<pallas_src>
import functools

import jax
import jax.numpy as jnp
from jax.experimental import pallas as pl
from jax.experimental.pallas import tpu as pltpu


# Lane-tile sizes (multiples of 128).  512 keeps per-block VMEM ~1-3 MB, which
# fits every generation's default scoped VMEM (incl. v7x's 64 MiB physical)
# while sitting in the measured ~85%-of-HBM-roofline regime.
TM_MAX = 512      # matmul output lane tile
TL_MAX = 2048     # pooling lane tile

_COMPILER_PARAMS = pltpu.CompilerParams(
    dimension_semantics=("parallel",),        # shards the M grid across TCs on v7x
    vmem_limit_bytes=32 * 1024 * 1024,        # explicit; blocks use only a few MB
)


# ----------------------------- Pallas kernels ------------------------------ #

def _wx_bias_act_kernel(w_ref, b_ref, x_ref, o_ref, *, relu):
    """out[Cout, TM] = W[Cout, K] @ X[K, TM] + b[Cout, 1]  (optional ReLU)."""
    acc = jnp.dot(w_ref[...], x_ref[...], preferred_element_type=jnp.float32)
    acc = acc + b_ref[...]                      # (Cout, 1) broadcasts over lanes
    if relu:
        acc = jnp.maximum(acc, 0.0)
    o_ref[...] = acc.astype(o_ref.dtype)


def matmul_bias_act(w, b, x, *, relu, out_dtype):
    """w: [Cout, K] bf16 (resident), b: [Cout, 1] f32, x: [K, M] bf16.

    Gridded over lane tiles of M; W and bias stay resident (constant index
    map -> no re-fetch between consecutive grid steps).
    """
    Cout, K = w.shape
    M = x.shape[1]
    if M <= TM_MAX:
        tm, steps = M, 1            # single full-extent block (any lane width OK)
    else:
        tm, steps = TM_MAX, pl.cdiv(M, TM_MAX)   # edge block is bounds-clamped
    return pl.pallas_call(
        functools.partial(_wx_bias_act_kernel, relu=relu),
        out_shape=jax.ShapeDtypeStruct((Cout, M), out_dtype),
        grid=(steps,),
        in_specs=[
            pl.BlockSpec((Cout, K), lambda j: (0, 0)),    # W  (resident)
            pl.BlockSpec((Cout, 1), lambda j: (0, 0)),    # b  (resident)
            pl.BlockSpec((K, tm),  lambda j: (0, j)),     # X  (lane tile)
        ],
        out_specs=pl.BlockSpec((Cout, tm), lambda j: (0, j)),
        compiler_params=_COMPILER_PARAMS,
    )(w, b, x)


def _max4_kernel(a_ref, b_ref, c_ref, d_ref, o_ref):
    o_ref[...] = jnp.maximum(jnp.maximum(a_ref[...], b_ref[...]),
                             jnp.maximum(c_ref[...], d_ref[...]))


def maxpool2_cm(x_cm):
    """2x2 max pool (stride 2) on a channel-major (C, N, H, W) activation."""
    C, N, H, W = x_cm.shape
    Ho, Wo = H // 2, W // 2
    M = N * Ho * Wo
    # Four corners of each 2x2 window, reshaped lane-dense: last dim = N*Ho*Wo.
    corners = [x_cm[:, :, di::2, dj::2].reshape(C, M)
               for di in (0, 1) for dj in (0, 1)]
    if M <= TL_MAX:
        tl, steps = M, 1
    else:
        tl, steps = TL_MAX, pl.cdiv(M, TL_MAX)
    out = pl.pallas_call(
        _max4_kernel,
        out_shape=jax.ShapeDtypeStruct((C, M), x_cm.dtype),
        grid=(steps,),
        in_specs=[pl.BlockSpec((C, tl), lambda j: (0, j))] * 4,
        out_specs=pl.BlockSpec((C, tl), lambda j: (0, j)),
        compiler_params=_COMPILER_PARAMS,
    )(*corners)
    return out.reshape(C, N, Ho, Wo)


# ------------------------------- conv glue --------------------------------- #

def im2col_T(x_cm, k, stride, pad):
    """Channel-major (Cin, N, H, W) -> transposed patch matrix
    colsT [Cin*k*k, N*Ho*Wo]; row order (cin, di, dj) matches
    torch weight.reshape(Cout, Cin*k*k)."""
    C, N, H, W = x_cm.shape
    xp = jnp.pad(x_cm, ((0, 0), (0, 0), (pad, pad), (pad, pad)))
    Ho = (H + 2 * pad - k) // stride + 1
    Wo = (W + 2 * pad - k) // stride + 1
    taps = [xp[:, :, di:di + stride * Ho:stride, dj:dj + stride * Wo:stride]
            for di in range(k) for dj in range(k)]
    cols = jnp.stack(taps, axis=1)                 # (Cin, k*k, N, Ho, Wo)
    return cols.reshape(C * k * k, N * Ho * Wo), Ho, Wo


def conv2d_relu_cm(x_cm, w_mat, b_col, *, k, stride, pad,
                   out_dtype=jnp.bfloat16):
    """x_cm: (Cin, N, H, W) bf16;  w_mat: (Cout, Cin*k*k) bf16;  b_col: (Cout,1) f32.

    Returns channel-major (Cout, N, Ho, Wo) in `out_dtype`."""
    N = x_cm.shape[1]
    cols_T, Ho, Wo = im2col_T(x_cm, k, stride, pad)
    Cout = w_mat.shape[0]
    out = matmul_bias_act(w_mat, b_col, cols_T, relu=True, out_dtype=out_dtype)
    return out.reshape(Cout, N, Ho, Wo)


# --------------------------- parameters / forward --------------------------- #

def init_params(key):
    """Deterministic init, same shapes (and torch-like uniform bounds) as
    CNN_deep.__init__ (weights kept in the PyTorch layout)."""
    ks = jax.random.split(key, 8)

    def unif(k, shape, fan_in):
        bound = 1.0 / jnp.sqrt(float(fan_in))
        return jax.random.uniform(k, shape, jnp.float32, -bound, bound)

    return {
        "w1": unif(ks[0], (32, 1, 5, 5), 1 * 25),
        "b1": unif(ks[1], (32,), 1 * 25),
        "w2": unif(ks[2], (48, 32, 5, 5), 32 * 25),
        "b2": unif(ks[3], (48,), 32 * 25),
        "w3": unif(ks[4], (72, 48, 5, 5), 48 * 25),
        "b3": unif(ks[5], (72,), 48 * 25),
        "wfc": unif(ks[6], (10, 72 * 3 * 3), 72 * 3 * 3),
        "bfc": unif(ks[7], (10,), 72 * 3 * 3),
    }


def prepare_params(p):
    """One-time hoist: reshape conv weights to matmul form and cast MXU
    operands to bf16 (biases stay f32)."""
    def wmat(w):
        return w.reshape(w.shape[0], -1).astype(jnp.bfloat16)

    def bcol(b):
        return b.reshape(-1, 1).astype(jnp.float32)

    return {
        "w1": wmat(p["w1"]), "b1": bcol(p["b1"]),
        "w2": wmat(p["w2"]), "b2": bcol(p["b2"]),
        "w3": wmat(p["w3"]), "b3": bcol(p["b3"]),
        "wfc": p["wfc"].astype(jnp.bfloat16), "bfc": bcol(p["bfc"]),
    }


def cnn_deep_forward(prepped, x):
    """x: [N, 1, 28, 28] float32 (NCHW, as in PyTorch).  Returns [N, 10] f32."""
    N = x.shape[0]
    # Model boundary: go channel-major, bf16 activations between layers.
    x = jnp.transpose(x, (1, 0, 2, 3)).astype(jnp.bfloat16)          # (1, N, 28, 28)

    x = conv2d_relu_cm(x, prepped["w1"], prepped["b1"],
                       k=5, stride=1, pad=2)                          # (32, N, 28, 28)
    x = maxpool2_cm(x)                                                # (32, N, 14, 14)
    x = conv2d_relu_cm(x, prepped["w2"], prepped["b2"],
                       k=5, stride=1, pad=2)                          # (48, N, 14, 14)
    x = maxpool2_cm(x)                                                # (48, N, 7, 7)
    x = conv2d_relu_cm(x, prepped["w3"], prepped["b3"],
                       k=5, stride=2, pad=1)                          # (72, N, 3, 3)

    # Flatten per sample in torch's (c, h, w) order -> fc input columns.
    xf = x.reshape(72, N, 9).transpose(0, 2, 1).reshape(72 * 9, N)    # (648, N)
    out = matmul_bias_act(prepped["wfc"], prepped["bfc"], xf,
                          relu=False, out_dtype=jnp.float32)          # (10, N)
    return out.T                                                      # (N, 10)


if __name__ == "__main__":
    key = jax.random.PRNGKey(0)
    pkey, xkey = jax.random.split(key)
    params = init_params(pkey)
    prepped = prepare_params(params)
    # 28x28 input is implied by fc1 = Linear(72*3*3, 10); batch = 2.
    x = jax.random.normal(xkey, (2, 1, 28, 28), jnp.float32)
    fwd = jax.jit(cnn_deep_forward)
    out = jax.block_until_ready(fwd(prepped, x))
    assert out.shape == (2, 10) and out.dtype == jnp.float32
    print("KERNEL_OK")
</pallas_src>

<mosaic_0001>
module attributes {stable_mosaic.version = 11 : i64} {
  func.func @_wx_bias_act_kernel(%arg0: i32, %arg1: memref<32x25xbf16, #tpu.memory_space<vmem>>, %arg2: memref<32x1xf32, #tpu.memory_space<vmem>>, %arg3: memref<25x512xbf16, #tpu.memory_space<vmem>>, %arg4: memref<32x512xbf16, #tpu.memory_space<vmem>>) attributes {dimension_semantics = [#tpu.dimension_semantics<parallel>], iteration_bounds = array<i64: 4>, scalar_prefetch = 0 : i64, scratch_operands = 0 : i64, tpu.core_type = #tpu.core_type<tc>, window_params = [{pipeline_mode = #tpu.pipeline_mode<synchronous>, transform_indices = @transform_0, window_bounds = array<i64: 32, 25>}, {pipeline_mode = #tpu.pipeline_mode<synchronous>, transform_indices = @transform_1, window_bounds = array<i64: 32, 1>}, {transform_indices = @transform_2, window_bounds = array<i64: 25, 512>}, {transform_indices = @transform_3, window_bounds = array<i64: 32, 512>}]} {
    %c0 = arith.constant 0 : index
    %c0_0 = arith.constant 0 : index
    %0 = vector.load %arg1[%c0, %c0_0] : memref<32x25xbf16, #tpu.memory_space<vmem>>, vector<32x25xbf16>
    %c0_1 = arith.constant 0 : index
    %c0_2 = arith.constant 0 : index
    %1 = vector.load %arg3[%c0_1, %c0_2] : memref<25x512xbf16, #tpu.memory_space<vmem>>, vector<25x512xbf16>
    %cst = arith.constant dense<0.000000e+00> : vector<32x512xf32>
    %2 = tpu.matmul %0, %1, %cst {dimension_numbers = #tpu.dot_dimension_numbers<[1], [0], [0], [1], [0, 0, 1, 1], [], []>} : vector<32x25xbf16>, vector<25x512xbf16>, vector<32x512xf32> -> vector<32x512xf32>
    %c0_3 = arith.constant 0 : index
    %c0_4 = arith.constant 0 : index
    %3 = vector.load %arg2[%c0_3, %c0_4] : memref<32x1xf32, #tpu.memory_space<vmem>>, vector<32x1xf32>
    %4 = vector.broadcast %3 : vector<32x1xf32> to vector<32x512xf32>
    %5 = arith.addf %2, %4 : vector<32x512xf32>
    %cst_5 = arith.constant 0.000000e+00 : f32
    %6 = vector.broadcast %cst_5 : f32 to vector<32x512xf32>
    %7 = arith.maximumf %5, %6 : vector<32x512xf32>
    %8 = arith.truncf %7 : vector<32x512xf32> to vector<32x512xbf16>
    %c0_6 = arith.constant 0 : index
    %c0_7 = arith.constant 0 : index
    %9 = vector.load %arg4[%c0_6, %c0_7] : memref<32x512xbf16, #tpu.memory_space<vmem>>, vector<32x512xbf16>
    tpu.vector_store %arg4[%c0_6, %c0_7], %8 {strides = array<i32>} : memref<32x512xbf16, #tpu.memory_space<vmem>>, vector<32x512xbf16>,
    return
  }
  func.func @transform_0(%arg0: i32) -> (i32, i32) {
    %c0_i32 = arith.constant 0 : i32
    %c0_i32_0 = arith.constant 0 : i32
    %c0_i32_1 = arith.constant 0 : i32
    return %c0_i32, %c0_i32_0 : i32, i32
  }
  func.func @transform_1(%arg0: i32) -> (i32, i32) {
    %c0_i32 = arith.constant 0 : i32
    %c0_i32_0 = arith.constant 0 : i32
    %c0_i32_1 = arith.constant 0 : i32
    return %c0_i32, %c0_i32_0 : i32, i32
  }
  func.func @transform_2(%arg0: i32) -> (i32, i32) {
    %c0_i32 = arith.constant 0 : i32
    %c0_i32_0 = arith.constant 0 : i32
    return %c0_i32, %arg0 : i32, i32
  }
  func.func @transform_3(%arg0: i32) -> (i32, i32) {
    %c0_i32 = arith.constant 0 : i32
    %c0_i32_0 = arith.constant 0 : i32
    return %c0_i32, %arg0 : i32, i32
  }
}

module attributes {stable_mosaic.version = 11 : i64} {
  func.func @_max4_kernel(%arg0: i32, %arg1: memref<32x392xbf16, #tpu.memory_space<vmem>>, %arg2: memref<32x392xbf16, #tpu.memory_space<vmem>>, %arg3: memref<32x392xbf16, #tpu.memory_space<vmem>>, %arg4: memref<32x392xbf16, #tpu.memory_space<vmem>>, %arg5: memref<32x392xbf16, #tpu.memory_space<vmem>>) attributes {dimension_semantics = [#tpu.dimension_semantics<parallel>], iteration_bounds = array<i64: 1>, scalar_prefetch = 0 : i64, scratch_operands = 0 : i64, tpu.core_type = #tpu.core_type<tc>, window_params = [{transform_indices = @transform_0, window_bounds = array<i64: 32, 392>}, {transform_indices = @transform_1, window_bounds = array<i64: 32, 392>}, {transform_indices = @transform_2, window_bounds = array<i64: 32, 392>}, {transform_indices = @transform_3, window_bounds = array<i64: 32, 392>}, {transform_indices = @transform_4, window_bounds = array<i64: 32, 392>}]} {
    %c0 = arith.constant 0 : index
    %c0_0 = arith.constant 0 : index
    %0 = vector.load %arg1[%c0, %c0_0] : memref<32x392xbf16, #tpu.memory_space<vmem>>, vector<32x392xbf16>
    %c0_1 = arith.constant 0 : index
    %c0_2 = arith.constant 0 : index
    %1 = vector.load %arg2[%c0_1, %c0_2] : memref<32x392xbf16, #tpu.memory_space<vmem>>, vector<32x392xbf16>
    %2 = arith.maximumf %0, %1 : vector<32x392xbf16>
    %c0_3 = arith.constant 0 : index
    %c0_4 = arith.constant 0 : index
    %3 = vector.load %arg3[%c0_3, %c0_4] : memref<32x392xbf16, #tpu.memory_space<vmem>>, vector<32x392xbf16>
    %c0_5 = arith.constant 0 : index
    %c0_6 = arith.constant 0 : index
    %4 = vector.load %arg4[%c0_5, %c0_6] : memref<32x392xbf16, #tpu.memory_space<vmem>>, vector<32x392xbf16>
    %5 = arith.maximumf %3, %4 : vector<32x392xbf16>
    %6 = arith.maximumf %2, %5 : vector<32x392xbf16>
    %c0_7 = arith.constant 0 : index
    %c0_8 = arith.constant 0 : index
    %7 = vector.load %arg5[%c0_7, %c0_8] : memref<32x392xbf16, #tpu.memory_space<vmem>>, vector<32x392xbf16>
    tpu.vector_store %arg5[%c0_7, %c0_8], %6 {strides = array<i32>} : memref<32x392xbf16, #tpu.memory_space<vmem>>, vector<32x392xbf16>,
    return
  }
  func.func @transform_0(%arg0: i32) -> (i32, i32) {
    %c0_i32 = arith.constant 0 : i32
    %c0_i32_0 = arith.constant 0 : i32
    return %c0_i32, %arg0 : i32, i32
  }
  func.func @transform_1(%arg0: i32) -> (i32, i32) {
    %c0_i32 = arith.constant 0 : i32
    %c0_i32_0 = arith.constant 0 : i32
    return %c0_i32, %arg0 : i32, i32
  }
  func.func @transform_2(%arg0: i32) -> (i32, i32) {
    %c0_i32 = arith.constant 0 : i32
    %c0_i32_0 = arith.constant 0 : i32
    return %c0_i32, %arg0 : i32, i32
  }
  func.func @transform_3(%arg0: i32) -> (i32, i32) {
    %c0_i32 = arith.constant 0 : i32
    %c0_i32_0 = arith.constant 0 : i32
    return %c0_i32, %arg0 : i32, i32
  }
  func.func @transform_4(%arg0: i32) -> (i32, i32) {
    %c0_i32 = arith.constant 0 : i32
    %c0_i32_0 = arith.constant 0 : i32
    return %c0_i32, %arg0 : i32, i32
  }
}

module attributes {stable_mosaic.version = 11 : i64} {
  func.func @_wx_bias_act_kernel(%arg0: i32, %arg1: memref<48x800xbf16, #tpu.memory_space<vmem>>, %arg2: memref<48x1xf32, #tpu.memory_space<vmem>>, %arg3: memref<800x392xbf16, #tpu.memory_space<vmem>>, %arg4: memref<48x392xbf16, #tpu.memory_space<vmem>>) attributes {dimension_semantics = [#tpu.dimension_semantics<parallel>], iteration_bounds = array<i64: 1>, scalar_prefetch = 0 : i64, scratch_operands = 0 : i64, tpu.core_type = #tpu.core_type<tc>, window_params = [{pipeline_mode = #tpu.pipeline_mode<synchronous>, transform_indices = @transform_0, window_bounds = array<i64: 48, 800>}, {pipeline_mode = #tpu.pipeline_mode<synchronous>, transform_indices = @transform_1, window_bounds = array<i64: 48, 1>}, {transform_indices = @transform_2, window_bounds = array<i64: 800, 392>}, {transform_indices = @transform_3, window_bounds = array<i64: 48, 392>}]} {
    %c0 = arith.constant 0 : index
    %c0_0 = arith.constant 0 : index
    %0 = vector.load %arg1[%c0, %c0_0] : memref<48x800xbf16, #tpu.memory_space<vmem>>, vector<48x800xbf16>
    %c0_1 = arith.constant 0 : index
    %c0_2 = arith.constant 0 : index
    %1 = vector.load %arg3[%c0_1, %c0_2] : memref<800x392xbf16, #tpu.memory_space<vmem>>, vector<800x392xbf16>
    %cst = arith.constant dense<0.000000e+00> : vector<48x392xf32>
    %2 = tpu.matmul %0, %1, %cst {dimension_numbers = #tpu.dot_dimension_numbers<[1], [0], [0], [1], [0, 0, 1, 1], [], []>} : vector<48x800xbf16>, vector<800x392xbf16>, vector<48x392xf32> -> vector<48x392xf32>
    %c0_3 = arith.constant 0 : index
    %c0_4 = arith.constant 0 : index
    %3 = vector.load %arg2[%c0_3, %c0_4] : memref<48x1xf32, #tpu.memory_space<vmem>>, vector<48x1xf32>
    %4 = vector.broadcast %3 : vector<48x1xf32> to vector<48x392xf32>
    %5 = arith.addf %2, %4 : vector<48x392xf32>
    %cst_5 = arith.constant 0.000000e+00 : f32
    %6 = vector.broadcast %cst_5 : f32 to vector<48x392xf32>
    %7 = arith.maximumf %5, %6 : vector<48x392xf32>
    %8 = arith.truncf %7 : vector<48x392xf32> to vector<48x392xbf16>
    %c0_6 = arith.constant 0 : index
    %c0_7 = arith.constant 0 : index
    %9 = vector.load %arg4[%c0_6, %c0_7] : memref<48x392xbf16, #tpu.memory_space<vmem>>, vector<48x392xbf16>
    tpu.vector_store %arg4[%c0_6, %c0_7], %8 {strides = array<i32>} : memref<48x392xbf16, #tpu.memory_space<vmem>>, vector<48x392xbf16>,
    return
  }
  func.func @transform_0(%arg0: i32) -> (i32, i32) {
    %c0_i32 = arith.constant 0 : i32
    %c0_i32_0 = arith.constant 0 : i32
    %c0_i32_1 = arith.constant 0 : i32
    return %c0_i32, %c0_i32_0 : i32, i32
  }
  func.func @transform_1(%arg0: i32) -> (i32, i32) {
    %c0_i32 = arith.constant 0 : i32
    %c0_i32_0 = arith.constant 0 : i32
    %c0_i32_1 = arith.constant 0 : i32
    return %c0_i32, %c0_i32_0 : i32, i32
  }
  func.func @transform_2(%arg0: i32) -> (i32, i32) {
    %c0_i32 = arith.constant 0 : i32
    %c0_i32_0 = arith.constant 0 : i32
    return %c0_i32, %arg0 : i32, i32
  }
  func.func @transform_3(%arg0: i32) -> (i32, i32) {
    %c0_i32 = arith.constant 0 : i32
    %c0_i32_0 = arith.constant 0 : i32
    return %c0_i32, %arg0 : i32, i32
  }
}

module attributes {stable_mosaic.version = 11 : i64} {
  func.func @_max4_kernel(%arg0: i32, %arg1: memref<48x98xbf16, #tpu.memory_space<vmem>>, %arg2: memref<48x98xbf16, #tpu.memory_space<vmem>>, %arg3: memref<48x98xbf16, #tpu.memory_space<vmem>>, %arg4: memref<48x98xbf16, #tpu.memory_space<vmem>>, %arg5: memref<48x98xbf16, #tpu.memory_space<vmem>>) attributes {dimension_semantics = [#tpu.dimension_semantics<parallel>], iteration_bounds = array<i64: 1>, scalar_prefetch = 0 : i64, scratch_operands = 0 : i64, tpu.core_type = #tpu.core_type<tc>, window_params = [{transform_indices = @transform_0, window_bounds = array<i64: 48, 98>}, {transform_indices = @transform_1, window_bounds = array<i64: 48, 98>}, {transform_indices = @transform_2, window_bounds = array<i64: 48, 98>}, {transform_indices = @transform_3, window_bounds = array<i64: 48, 98>}, {transform_indices = @transform_4, window_bounds = array<i64: 48, 98>}]} {
    %c0 = arith.constant 0 : index
    %c0_0 = arith.constant 0 : index
    %0 = vector.load %arg1[%c0, %c0_0] : memref<48x98xbf16, #tpu.memory_space<vmem>>, vector<48x98xbf16>
    %c0_1 = arith.constant 0 : index
    %c0_2 = arith.constant 0 : index
    %1 = vector.load %arg2[%c0_1, %c0_2] : memref<48x98xbf16, #tpu.memory_space<vmem>>, vector<48x98xbf16>
    %2 = arith.maximumf %0, %1 : vector<48x98xbf16>
    %c0_3 = arith.constant 0 : index
    %c0_4 = arith.constant 0 : index
    %3 = vector.load %arg3[%c0_3, %c0_4] : memref<48x98xbf16, #tpu.memory_space<vmem>>, vector<48x98xbf16>
    %c0_5 = arith.constant 0 : index
    %c0_6 = arith.constant 0 : index
    %4 = vector.load %arg4[%c0_5, %c0_6] : memref<48x98xbf16, #tpu.memory_space<vmem>>, vector<48x98xbf16>
    %5 = arith.maximumf %3, %4 : vector<48x98xbf16>
    %6 = arith.maximumf %2, %5 : vector<48x98xbf16>
    %c0_7 = arith.constant 0 : index
    %c0_8 = arith.constant 0 : index
    %7 = vector.load %arg5[%c0_7, %c0_8] : memref<48x98xbf16, #tpu.memory_space<vmem>>, vector<48x98xbf16>
    tpu.vector_store %arg5[%c0_7, %c0_8], %6 {strides = array<i32>} : memref<48x98xbf16, #tpu.memory_space<vmem>>, vector<48x98xbf16>,
    return
  }
  func.func @transform_0(%arg0: i32) -> (i32, i32) {
    %c0_i32 = arith.constant 0 : i32
    %c0_i32_0 = arith.constant 0 : i32
    return %c0_i32, %arg0 : i32, i32
  }
  func.func @transform_1(%arg0: i32) -> (i32, i32) {
    %c0_i32 = arith.constant 0 : i32
    %c0_i32_0 = arith.constant 0 : i32
    return %c0_i32, %arg0 : i32, i32
  }
  func.func @transform_2(%arg0: i32) -> (i32, i32) {
    %c0_i32 = arith.constant 0 : i32
    %c0_i32_0 = arith.constant 0 : i32
    return %c0_i32, %arg0 : i32, i32
  }
  func.func @transform_3(%arg0: i32) -> (i32, i32) {
    %c0_i32 = arith.constant 0 : i32
    %c0_i32_0 = arith.constant 0 : i32
    return %c0_i32, %arg0 : i32, i32
  }
  func.func @transform_4(%arg0: i32) -> (i32, i32) {
    %c0_i32 = arith.constant 0 : i32
    %c0_i32_0 = arith.constant 0 : i32
    return %c0_i32, %arg0 : i32, i32
  }
}

module attributes {stable_mosaic.version = 11 : i64} {
  func.func @_wx_bias_act_kernel(%arg0: i32, %arg1: memref<72x1200xbf16, #tpu.memory_space<vmem>>, %arg2: memref<72x1xf32, #tpu.memory_space<vmem>>, %arg3: memref<1200x18xbf16, #tpu.memory_space<vmem>>, %arg4: memref<72x18xbf16, #tpu.memory_space<vmem>>) attributes {dimension_semantics = [#tpu.dimension_semantics<parallel>], iteration_bounds = array<i64: 1>, scalar_prefetch = 0 : i64, scratch_operands = 0 : i64, tpu.core_type = #tpu.core_type<tc>, window_params = [{pipeline_mode = #tpu.pipeline_mode<synchronous>, transform_indices = @transform_0, window_bounds = array<i64: 72, 1200>}, {pipeline_mode = #tpu.pipeline_mode<synchronous>, transform_indices = @transform_1, window_bounds = array<i64: 72, 1>}, {transform_indices = @transform_2, window_bounds = array<i64: 1200, 18>}, {transform_indices = @transform_3, window_bounds = array<i64: 72, 18>}]} {
    %c0 = arith.constant 0 : index
    %c0_0 = arith.constant 0 : index
    %0 = vector.load %arg1[%c0, %c0_0] : memref<72x1200xbf16, #tpu.memory_space<vmem>>, vector<72x1200xbf16>
    %c0_1 = arith.constant 0 : index
    %c0_2 = arith.constant 0 : index
    %1 = vector.load %arg3[%c0_1, %c0_2] : memref<1200x18xbf16, #tpu.memory_space<vmem>>, vector<1200x18xbf16>
    %cst = arith.constant dense<0.000000e+00> : vector<72x18xf32>
    %2 = tpu.matmul %0, %1, %cst {dimension_numbers = #tpu.dot_dimension_numbers<[1], [0], [0], [1], [0, 0, 1, 1], [], []>} : vector<72x1200xbf16>, vector<1200x18xbf16>, vector<72x18xf32> -> vector<72x18xf32>
    %c0_3 = arith.constant 0 : index
    %c0_4 = arith.constant 0 : index
    %3 = vector.load %arg2[%c0_3, %c0_4] : memref<72x1xf32, #tpu.memory_space<vmem>>, vector<72x1xf32>
    %4 = vector.broadcast %3 : vector<72x1xf32> to vector<72x18xf32>
    %5 = arith.addf %2, %4 : vector<72x18xf32>
    %cst_5 = arith.constant 0.000000e+00 : f32
    %6 = vector.broadcast %cst_5 : f32 to vector<72x18xf32>
    %7 = arith.maximumf %5, %6 : vector<72x18xf32>
    %8 = arith.truncf %7 : vector<72x18xf32> to vector<72x18xbf16>
    %c0_6 = arith.constant 0 : index
    %c0_7 = arith.constant 0 : index
    %9 = vector.load %arg4[%c0_6, %c0_7] : memref<72x18xbf16, #tpu.memory_space<vmem>>, vector<72x18xbf16>
    tpu.vector_store %arg4[%c0_6, %c0_7], %8 {strides = array<i32>} : memref<72x18xbf16, #tpu.memory_space<vmem>>, vector<72x18xbf16>,
    return
  }
  func.func @transform_0(%arg0: i32) -> (i32, i32) {
    %c0_i32 = arith.constant 0 : i32
    %c0_i32_0 = arith.constant 0 : i32
    %c0_i32_1 = arith.constant 0 : i32
    return %c0_i32, %c0_i32_0 : i32, i32
  }
  func.func @transform_1(%arg0: i32) -> (i32, i32) {
    %c0_i32 = arith.constant 0 : i32
    %c0_i32_0 = arith.constant 0 : i32
    %c0_i32_1 = arith.constant 0 : i32
    return %c0_i32, %c0_i32_0 : i32, i32
  }
  func.func @transform_2(%arg0: i32) -> (i32, i32) {
    %c0_i32 = arith.constant 0 : i32
    %c0_i32_0 = arith.constant 0 : i32
    return %c0_i32, %arg0 : i32, i32
  }
  func.func @transform_3(%arg0: i32) -> (i32, i32) {
    %c0_i32 = arith.constant 0 : i32
    %c0_i32_0 = arith.constant 0 : i32
    return %c0_i32, %arg0 : i32, i32
  }
}

module attributes {stable_mosaic.version = 11 : i64} {
  func.func @_wx_bias_act_kernel(%arg0: i32, %arg1: memref<10x648xbf16, #tpu.memory_space<vmem>>, %arg2: memref<10x1xf32, #tpu.memory_space<vmem>>, %arg3: memref<648x2xbf16, #tpu.memory_space<vmem>>, %arg4: memref<10x2xf32, #tpu.memory_space<vmem>>) attributes {dimension_semantics = [#tpu.dimension_semantics<parallel>], iteration_bounds = array<i64: 1>, scalar_prefetch = 0 : i64, scratch_operands = 0 : i64, tpu.core_type = #tpu.core_type<tc>, window_params = [{pipeline_mode = #tpu.pipeline_mode<synchronous>, transform_indices = @transform_0, window_bounds = array<i64: 10, 648>}, {pipeline_mode = #tpu.pipeline_mode<synchronous>, transform_indices = @transform_1, window_bounds = array<i64: 10, 1>}, {transform_indices = @transform_2, window_bounds = array<i64: 648, 2>}, {transform_indices = @transform_3, window_bounds = array<i64: 10, 2>}]} {
    %c0 = arith.constant 0 : index
    %c0_0 = arith.constant 0 : index
    %0 = vector.load %arg1[%c0, %c0_0] : memref<10x648xbf16, #tpu.memory_space<vmem>>, vector<10x648xbf16>
    %c0_1 = arith.constant 0 : index
    %c0_2 = arith.constant 0 : index
    %1 = vector.load %arg3[%c0_1, %c0_2] : memref<648x2xbf16, #tpu.memory_space<vmem>>, vector<648x2xbf16>
    %cst = arith.constant dense<0.000000e+00> : vector<10x2xf32>
    %2 = tpu.matmul %0, %1, %cst {dimension_numbers = #tpu.dot_dimension_numbers<[1], [0], [0], [1], [0, 0, 1, 1], [], []>} : vector<10x648xbf16>, vector<648x2xbf16>, vector<10x2xf32> -> vector<10x2xf32>
    %c0_3 = arith.constant 0 : index
    %c0_4 = arith.constant 0 : index
    %3 = vector.load %arg2[%c0_3, %c0_4] : memref<10x1xf32, #tpu.memory_space<vmem>>, vector<10x1xf32>
    %4 = vector.broadcast %3 : vector<10x1xf32> to vector<10x2xf32>
    %5 = arith.addf %2, %4 : vector<10x2xf32>
    %c0_5 = arith.constant 0 : index
    %c0_6 = arith.constant 0 : index
    %6 = vector.load %arg4[%c0_5, %c0_6] : memref<10x2xf32, #tpu.memory_space<vmem>>, vector<10x2xf32>
    tpu.vector_store %arg4[%c0_5, %c0_6], %5 {strides = array<i32>} : memref<10x2xf32, #tpu.memory_space<vmem>>, vector<10x2xf32>,
    return
  }
  func.func @transform_0(%arg0: i32) -> (i32, i32) {
    %c0_i32 = arith.constant 0 : i32
    %c0_i32_0 = arith.constant 0 : i32
    %c0_i32_1 = arith.constant 0 : i32
    return %c0_i32, %c0_i32_0 : i32, i32
  }
  func.func @transform_1(%arg0: i32) -> (i32, i32) {
    %c0_i32 = arith.constant 0 : i32
    %c0_i32_0 = arith.constant 0 : i32
    %c0_i32_1 = arith.constant 0 : i32
    return %c0_i32, %c0_i32_0 : i32, i32
  }
  func.func @transform_2(%arg0: i32) -> (i32, i32) {
    %c0_i32 = arith.constant 0 : i32
    %c0_i32_0 = arith.constant 0 : i32
    return %c0_i32, %arg0 : i32, i32
  }
  func.func @transform_3(%arg0: i32) -> (i32, i32) {
    %c0_i32 = arith.constant 0 : i32
    %c0_i32_0 = arith.constant 0 : i32
    return %c0_i32, %arg0 : i32, i32
  }
}

</mosaic_0001>

<bundles_post_ra>
// kernel: cnn_deep_forward.6
= control target key start
LH: loop header
LB: loop body
LE: loop exit
PB: predicated region body
PF: predicated region fallthrough
CT: control target
= control target key end

     0   :  { %8 = vsyncpa [#allocation3], 0  ;;  %s2340_s12 = smov 0   ;;  %s2342_s13 = smov 0   ;;  %s3165_s0 = inlined_call_operand.hbm [shape: bf16[32,25], index: 0, kind: input, shape index: {}]   ;;  %s3166_s1 = inlined_call_operand.vmem [shape: f32[32,1], index: 1, kind: input, shape index: {}]   ;;  %s3167_s2 = inlined_call_operand.vmem [shape: bf16[25,1568], index: 2, kind: input, shape index: {}]   ;;  %s3168_s3 = inlined_call_operand.vmem [shape: bf16[32,1568], index: 3, kind: output, shape index: {}]  }
   0x1   :  { %s2344_s14 = smov 0  }
   0x2 LB: > { %s2356_s15 = sadd.s32 4294967295, %s2181_s14   ;;  %s2359_s16 = sadd.s32 1, %s2181_s14   ;;  %s2181_s14 = sphi %s2344_s14, %s3208_s14   ;;  %s2177_s13 = sphi %s2342_s13, %s3207_s13   ;;  %s2173_s12 = sphi %s2340_s12, %s3206_s12  }
   0x3   : > { %s60_s17 = ssub.s32 %s2181_s14, %s2359_s16  ;;  %s63_s18 = sadd.s32 1, %s2177_s13 }
   0x4   : > { %p61_p0 = scmp.eq.s32.totalorder %s60_s17, 0  ;;  %p70_p1 = scmp.ne.s32.totalorder %s2177_s13, %s2173_s12 }
   0x5   : > { %p71_p2 = scmp.eq.s32.totalorder %s2181_s14, 0  ;;  %p100_p3 = scmp.eq.s32.totalorder %s2356_s15, 3 }
   0x6   : > { %s2369_s19 = scalar_select %p61_p0, %s2177_s13, %s63_s18  }
   0x7   : > { %p2371_p4 = por %p71_p2, %p70_p1  ;;  %p2375_p5 = por %p100_p3, %p70_p1 }
   0x8   : > { %p1581_p6 = scmp.ge.s32.totalorder %s2181_s14, 1  ;;  %p113_p7 = scmp.lt.s32.totalorder %s2181_s14, 5 }
   0x9   : > { %s3171_s20 = scalar_select %p2371_p4, 1, 0 }
   0xa   : > { %s3172_s21 = scalar_select %p2375_p5, 1, 0 }
   0xb   : > { %p3169_p8 = scmp.eq.s32.totalorder %s2356_s15, 0  ;;  %p2382_p9 = pnand %p1581_p6, %p113_p7 }
   0xc   : > { %s2311_s23 = smov [#allocation2]   ;;  %s1999_s28 = scalar_lea.hbm %s3165_s0, 256 }
   0xd   : > { %s3173_s22 = scalar_select %p2382_p9, 1, 0 }
   0xe   : > { %s125_s24 = sshll.u32 %s2311_s23, 4  ;;  %p1688_p10 = pneg %p2382_p9  ;;  %s126_s24 = int_to_ptr.vmem [resolvable:$true] %s125_s24 }
   0xf   : > { %p2000_p12 = scmp.ne.s32.totalorder %s3165_s0, %s1999_s28  ;;  %p2006_p2 = scmp.lt.u32.totalorder %s1999_s28, %s3165_s0 }
  0x10   : > { %p2390_p11 = pnand %p3169_p8, %p1688_p10 }
  0x12   : > { %p2001_p13 = pneg %p2390_p11 }
  0x14   : > { %p2002_p0 = pnand %p2001_p13, %p2000_p12 }
  0x16   : > { %p2003_p1 = pneg %p2002_p0 }
  0x18   : > { %p2008_p3 = pnand %p2006_p2, %p2003_p1 }
  0x1a   : > { %2011 = shalt.err (!%p2008_p3)
}
  0x1b   : > { %s2012_s6 = scalar_lea.vmem %s126_s24, 256  ;;  %p2020_p8 = scmp.lt.s32.totalorder %s126_s24, %s126_s24 }
  0x1c   : > { %p2013_p6 = scmp.ne.s32.totalorder %s126_s24, %s2012_s6  ;;  %p2021_p5 = scmp.lt.s32.totalorder %s2012_s6, %s2012_s6 }
  0x1e   : > { %p2015_p7 = pnand %p2013_p6, %p2001_p13  ;;  %p2022_p9 = por %p2021_p5, %p2020_p8 }
  0x20   : > { %p2016_p10 = pneg %p2015_p7 }
  0x22   : > { %p2023_p4 = pnand %p2022_p9, %p2016_p10 }
  0x24   : > { %2026 = shalt.err (!%p2023_p4)
}
  0x25   : > { %s2312_s7 = smov 64   ;;  %s2313_s8 = smov 4  }
  0x26   : > { %1691 = dma.hbm_to_vmem [thread:$0]  (!%p2390_p11), %s3165_s0, 256, %s126_s24, [#allocation3], %s2312_s7, %s2312_s7, %s2313_s8  }
  0x27   : > { %p1583_p12 = scmp.ge.s32.totalorder %s2181_s14, 4 }
  0x28   : > { %p3175_p0 = scmp.ne.s32.totalorder (!%p1583_p12), %s3171_s20, 0 }
  0x29   : > { %138 = sbr.rel (%p1583_p12) target bundleno = 180 (0xb4), region = 24 }
  0x30   : > { %141 = sbr.rel (!%p3175_p0) target bundleno = 180 (0xb4), region = 28  ;;  %s143_s11 = sand.u32 (%p3175_p0), 1, %s2177_s13  }
  0x31   : > { %s1585_s17 = sshll.u32 (%p3175_p0), %s2181_s14, 2  ;;  %s1584_s18 = sshll.u32 (%p3175_p0), %s143_s11, 6 }
  0x32   : > { %s147_s23 = ssub.s32 (%p3175_p0), 13, %s1585_s17  ;;  %s1666_s26 = sshll.u32 (%p3175_p0), %s2181_s14, 4 }
  0x33   : > { %p148_p4 = scmp.lt.s32.totalorder (%p3175_p0), %s147_s23, 4  ;;  %s2419_s24 = scalar_lea.vmem (%p3175_p0), %s3167_s2, %s1666_s26  }
  0x34   : > { %s2423_s20 = scalar_lea.vmem (%p3175_p0), [#allocation4], %s1584_s18  }
  0x37   : > { %s3210_s23 = smov (!%p148_p4, %s147_s23), 4 }
  0x38   : > { %s1586_s28 = sshll.u32 %s3210_s23, 8  ;;  %s2421_s29 = sshll.u32 %s3210_s23, 2 }
  0x39   : > { %p1590_p5 = scmp.eq.s32.totalorder %s1586_s28, 0 }
  0x3a   : > { %p158_p8 = scmp.lt.u32.totalorder (!%p1590_p5), %s2421_s29, 8 }
  0x3b   : > { %157 = sbr.rel (%p1590_p5) target bundleno = 180 (0xb4), region = 32 }
  0x42   : > { %161 = sbr.rel (%p158_p8) target bundleno = 171 (0xab), region = 36  ;;  %s2427_s30 = sand.u32 (!%p158_p8), 7, %s2421_s29  }
  0x43   : > { %p183_p9 = scmp.eq.s32.totalorder (!%p158_p8), %s2427_s30, 0  ;;  %p1591_p11 = scmp.ne.s32.totalorder (!%p158_p8), %s2427_s30, 0 }
  0x49   : > { %186 = sbr.rel (%p1591_p11) target bundleno = 119 (0x77), region = 51  ;;  %s187_s14 = sshrl.u32 (!%p1591_p11), %s2421_s29, 3 }
  0x4a   : > { %s2434_s4 = sshrl.u32 (!%p1591_p11), %s187_s14, 4 }
  0x4b   : > { %p1592_p13 = scmp.le.s32.totalorder (!%p1591_p11), %s2434_s4, 0 }
  0x50   : > { %1443 = sbr.rel (%p1592_p13) target bundleno = 99 (0x63), region = 234  ;;  %s3176_s5 = smov (!%p1592_p13), %s2423_s20 }
  0x51   : > { %s3177_s6 = smov (!%p1592_p13), %s2419_s24  ;;  %s2443_s7 = smov (!%p1592_p13), 0  }
  0x52   : > { %s2445_s8 = smov (!%p1592_p13), 0  }
  0x57 LB: >> { %v200_v0 = vld [vmem:[%s2189_s6] sm:$0xff]  ;;  %v202_v1 = vld [vmem:[%s2189_s6 + $0x8] sm:$0xff]  ;;  %v232_v2 = vld [vmem:[%s2189_s6 + $0x34] sm:$0xff]  ;;  %s328_s9 = sadd.s32 1, %s2193_s7  ;;  %s194_s8 = sadd.s32 1, %s2197_s8   ;;  %s2197_s8 = sphi %s2445_s8, %s194_s8   ;;  %s2193_s7 = sphi %s2443_s7, %s3178_s7   ;;  %s2189_s6 = sphi %s3177_s6, %s333_s6   ;;  %s2185_s5 = sphi %s3176_s5, %s334_s5  }
  0x58   : >> { %201 = vst [vmem:[%s2185_s5] sm:$0xff] %v200_v0  ;;  %203 = vst [vmem:[%s2185_s5 + $0x8] sm:$0xff] %v202_v1  ;;  %v234_v3 = vld [vmem:[%s2189_s6 + $0x3c] sm:$0xff]  ;;  %v264_v4 = vld [vmem:[%s2189_s6 + $0x68] sm:$0xff]  ;;  %p329_p1 = scmp.ge.s32.totalorder %s328_s9, %s2434_s4  ;;  %p193_p2 = scmp.ge.s32.totalorder %s194_s8, %s2434_s4 }
  0x59   : >> { %233 = vst [vmem:[%s2185_s5 + $0x10] sm:$0xff] %v232_v2  ;;  %v266_v5 = vld [vmem:[%s2189_s6 + $0x70] sm:$0xff]  ;;  %235 = vst [vmem:[%s2185_s5 + $0x18] sm:$0xff] %v234_v3  ;;  %v296_v6 = vld [vmem:[%s2189_s6 + $0x9c] sm:$0xff] }
  0x5a   : >> { %265 = vst [vmem:[%s2185_s5 + $0x20] sm:$0xff] %v264_v4  ;;  %267 = vst [vmem:[%s2185_s5 + $0x28] sm:$0xff] %v266_v5  ;;  %v298_v7 = vld [vmem:[%s2189_s6 + $0xa4] sm:$0xff]  ;;  %v300_v8 = vld [vmem:[%s2189_s6 + $0xac] sm:$0xff]  ;;  %s3212_s9 = smov (%p329_p1, %s328_s9), 0 }
  0x5b   : >> { %297 = vst [vmem:[%s2185_s5 + $0x30] sm:$0xff] %v296_v6  ;;  %299 = vst [vmem:[%s2185_s5 + $0x38] sm:$0xff] %v298_v7  ;;  %v302_v9 = vld [vmem:[%s2189_s6 + $0xb4] sm:$0xff]  ;;  %v304_v10 = vld [vmem:[%s2189_s6 + $0xbc] sm:$0xff]  ;;  %s1593_s10 = sshll.u32 %s3212_s9, 7  ;;  %s3178_s7 = smov %s3212_s9 }
  0x5c   : >> { %301 = vst [vmem:[%s2185_s5 + $0x40] sm:$0xff] %v300_v8  ;;  %v306_v11 = vld [vmem:[%s2189_s6 + $0xc4] sm:$0xff]  ;;  %303 = vst [vmem:[%s2185_s5 + $0x48] sm:$0xff] %v302_v9  ;;  %v308_v12 = vld [vmem:[%s2189_s6 + $0xcc] sm:$0xff]  ;;  %196 = sbr.rel (!%p193_p2) target bundleno = 87 (0x57), region = 240 }
  0x5d   : >> { %305 = vst [vmem:[%s2185_s5 + $0x50] sm:$0xff] %v304_v10  ;;  %307 = vst [vmem:[%s2185_s5 + $0x58] sm:$0xff] %v306_v11  ;;  %v310_v13 = vld [vmem:[%s2189_s6 + $0xd4] sm:$0xff]  ;;  %v312_v14 = vld [vmem:[%s2189_s6 + $0xdc] sm:$0xff] }
  0x5e   : >> { %309 = vst [vmem:[%s2185_s5 + $0x60] sm:$0xff] %v308_v12  ;;  %311 = vst [vmem:[%s2185_s5 + $0x68] sm:$0xff] %v310_v13  ;;  %v314_v15 = vld [vmem:[%s2189_s6 + $0xe4] sm:$0xff]  ;;  %v316_v16 = vld [vmem:[%s2189_s6 + $0xec] sm:$0xff] }
  0x5f   : >> { %313 = vst [vmem:[%s2185_s5 + $0x70] sm:$0xff] %v312_v14  ;;  %v318_v17 = vld [vmem:[%s2189_s6 + $0xf4] sm:$0xff]  ;;  %315 = vst [vmem:[%s2185_s5 + $0x78] sm:$0xff] %v314_v15  ;;  %v320_v18 = vld [vmem:[%s2189_s6 + $0xfc] sm:$0xff] }
  0x60   : >> { %317 = vst [vmem:[%s2185_s5 + $0x80] sm:$0xff] %v316_v16  ;;  %319 = vst [vmem:[%s2185_s5 + $0x88] sm:$0xff] %v318_v17  ;;  %v322_v19 = vld [vmem:[%s2189_s6 + $0x104] sm:$0xff]  ;;  %v324_v20 = vld [vmem:[%s2189_s6 + $0x10c] sm:$0xff] }
  0x61   : >> { %321 = vst [vmem:[%s2185_s5 + $0x90] sm:$0xff] %v320_v18  ;;  %323 = vst [vmem:[%s2185_s5 + $0x98] sm:$0xff] %v322_v19  ;;  %v326_v21 = vld [vmem:[%s2189_s6 + $0x114] sm:$0xff]  ;;  %s333_s6 = scalar_lea.vmem %s2419_s24, %s1593_s10  }
  0x62   : >> { %325 = vst [vmem:[%s2185_s5 + $0xa0] sm:$0xff] %v324_v20  ;;  %327 = vst [vmem:[%s2185_s5 + $0xa8] sm:$0xff] %v326_v21  ;;  %s334_s5 = scalar_lea.vmem %s2423_s20, %s1593_s10 [#allocation4]  }
  0x63 PF: > { %s2519_s11 = sand.u32 15, %s187_s14   ;;  %s1667_s17 = sshll.u32 %s2434_s4, 11 }
  0x64   : > { %s339_s18 = sshra.s32 %s1667_s17, 4  ;;  %p1598_p3 = scmp.le.s32.totalorder %s2519_s11, 0 }
  0x65   : > { %s2523_s23 = scalar_lea.vmem %s2419_s24, %s339_s18   ;;  %s2526_s26 = scalar_lea.vmem %s2423_s20, %s339_s18 [#allocation4]  }
  0x66   : > { %1457 = sbr.rel (%p1598_p3) target bundleno = 119 (0x77), region = 245  ;;  %s3179_s25 = smov (!%p1598_p3), %s2526_s26 }
  0x67   : > { %s3180_s27 = smov (!%p1598_p3), %s2523_s23  ;;  %s2535_s28 = smov (!%p1598_p3), 0  }
  0x68   : > { %s2211_s5 = smov (!%p1598_p3), 0  }
  0x6d LB: >> { %v355_v22 = vld [vmem:[%s2205_s27] sm:$0xff]  ;;  %v357_v23 = vld [vmem:[%s2205_s27 + $0x34] sm:$0xff]  ;;  %v359_v24 = vld [vmem:[%s2205_s27 + $0x68] sm:$0xff]  ;;  %s363_s14 = sadd.s32 1, %s2209_s28  ;;  %s349_s5 = sadd.s32 1, %s2213_s5   ;;  %s2213_s5 = sphi %s2211_s5, %s349_s5   ;;  %s2209_s28 = sphi %s2535_s28, %s3181_s28   ;;  %s2205_s27 = sphi %s3180_s27, %s368_s27   ;;  %s2201_s25 = sphi %s3179_s25, %s369_s25  }
  0x6e   : >> { %356 = vst [vmem:[%s2201_s25] sm:$0xff] %v355_v22  ;;  %358 = vst [vmem:[%s2201_s25 + $0x10] sm:$0xff] %v357_v23  ;;  %v361_v25 = vld [vmem:[%s2205_s27 + $0x9c] sm:$0xff]  ;;  %p364_p6 = scmp.ge.s32.totalorder %s363_s14, %s2519_s11  ;;  %p348_p7 = scmp.ge.s32.totalorder %s349_s5, %s2519_s11 }
  0x6f   : >> { %360 = vst [vmem:[%s2201_s25 + $0x20] sm:$0xff] %v359_v24  ;;  %362 = vst [vmem:[%s2201_s25 + $0x30] sm:$0xff] %v361_v25 }
  0x70   : >> { %s3214_s14 = smov (%p364_p6, %s363_s14), 0  ;;  %351 = sbr.rel (!%p348_p7) target bundleno = 109 (0x6d), region = 251 }
  0x71   : >> { %s1599_s4 = sshll.u32 %s3214_s14, 3  ;;  %s3181_s28 = smov %s3214_s14 }
  0x72   : >> { %s368_s27 = scalar_lea.vmem %s2523_s23, %s1599_s4   ;;  %s369_s25 = scalar_lea.vmem %s2526_s26, %s1599_s4 [#allocation4]  }
  0x77 PF: > { %372 = sbr.rel (%p183_p9) target bundleno = 171 (0xab), region = 69  ;;  %s374_s6 = ssub.s32 (!%p183_p9), %s2421_s29, %s2427_s30 }
  0x78   : > { %s378_s7 = sshrl.u32 (!%p183_p9), %s2421_s29, 3  ;;  %s2556_s8 = scalar_lea.vmem (!%p183_p9), %s2419_s24, %s374_s6 }
  0x79   : > { %s2559_s9 = scalar_lea.vmem (!%p183_p9), %s2423_s20, %s374_s6 [#allocation4]  ;;  %s2563_s10 = sshrl.u32 (!%p183_p9), %s378_s7, 4 }
  0x7a   : > { %p1601_p10 = scmp.le.s32.totalorder (!%p183_p9), %s2563_s10, 0 }
  0x7e   : > { %1471 = sbr.rel (%p1601_p10) target bundleno = 145 (0x91), region = 256  ;;  %s3182_s11 = smov (!%p1601_p10), %s2423_s20 }
  0x7f   : > { %s3183_s17 = smov (!%p1601_p10), %s2419_s24  ;;  %s2572_s18 = smov (!%p1601_p10), 0  }
  0x80   : > { %s2574_s23 = smov (!%p1601_p10), 0  }
  0x85 LB: >> { %v391_v26 = vld [vmem:[%s2221_s17] sm:$0xff]  ;;  %v393_v27 = vld [vmem:[%s2221_s17 + $0x8] sm:$0xff]  ;;  %v423_v28 = vld [vmem:[%s2221_s17 + $0x34] sm:$0xff]  ;;  %s519_s26 = sadd.s32 1, %s2225_s18  ;;  %s385_s23 = sadd.s32 1, %s2229_s23   ;;  %s2229_s23 = sphi %s2574_s23, %s385_s23   ;;  %s2225_s18 = sphi %s2572_s18, %s3184_s18   ;;  %s2221_s17 = sphi %s3183_s17, %s524_s17   ;;  %s2217_s11 = sphi %s3182_s11, %s525_s11  }
  0x86   : >> { %392 = vst [vmem:[%s2217_s11] sm:$0xff] %v391_v26  ;;  %394 = vst [vmem:[%s2217_s11 + $0x8] sm:$0xff] %v393_v27  ;;  %v425_v29 = vld [vmem:[%s2221_s17 + $0x3c] sm:$0xff]  ;;  %v455_v30 = vld [vmem:[%s2221_s17 + $0x68] sm:$0xff]  ;;  %p520_p12 = scmp.ge.s32.totalorder %s519_s26, %s2563_s10  ;;  %p384_p0 = scmp.ge.s32.totalorder %s385_s23, %s2563_s10 }
  0x87   : >> { %424 = vst [vmem:[%s2217_s11 + $0x10] sm:$0xff] %v423_v28  ;;  %v457_v31 = vld [vmem:[%s2221_s17 + $0x70] sm:$0xff]  ;;  %426 = vst [vmem:[%s2217_s11 + $0x18] sm:$0xff] %v425_v29  ;;  %v487_v32 = vld [vmem:[%s2221_s17 + $0x9c] sm:$0xff] }
  0x88   : >> { %456 = vst [vmem:[%s2217_s11 + $0x20] sm:$0xff] %v455_v30  ;;  %458 = vst [vmem:[%s2217_s11 + $0x28] sm:$0xff] %v457_v31  ;;  %v489_v33 = vld [vmem:[%s2221_s17 + $0xa4] sm:$0xff]  ;;  %v491_v34 = vld [vmem:[%s2221_s17 + $0xac] sm:$0xff]  ;;  %s3216_s26 = smov (%p520_p12, %s519_s26), 0 }
  0x89   : >> { %488 = vst [vmem:[%s2217_s11 + $0x30] sm:$0xff] %v487_v32  ;;  %490 = vst [vmem:[%s2217_s11 + $0x38] sm:$0xff] %v489_v33  ;;  %v493_v35 = vld [vmem:[%s2221_s17 + $0xb4] sm:$0xff]  ;;  %v495_v36 = vld [vmem:[%s2221_s17 + $0xbc] sm:$0xff]  ;;  %s1602_s25 = sshll.u32 %s3216_s26, 7  ;;  %s3184_s18 = smov %s3216_s26 }
  0x8a   : >> { %492 = vst [vmem:[%s2217_s11 + $0x40] sm:$0xff] %v491_v34  ;;  %v497_v37 = vld [vmem:[%s2221_s17 + $0xc4] sm:$0xff]  ;;  %494 = vst [vmem:[%s2217_s11 + $0x48] sm:$0xff] %v493_v35  ;;  %v499_v38 = vld [vmem:[%s2221_s17 + $0xcc] sm:$0xff]  ;;  %387 = sbr.rel (!%p384_p0) target bundleno = 133 (0x85), region = 262 }
  0x8b   : >> { %496 = vst [vmem:[%s2217_s11 + $0x50] sm:$0xff] %v495_v36  ;;  %498 = vst [vmem:[%s2217_s11 + $0x58] sm:$0xff] %v497_v37  ;;  %v501_v39 = vld [vmem:[%s2221_s17 + $0xd4] sm:$0xff]  ;;  %v503_v40 = vld [vmem:[%s2221_s17 + $0xdc] sm:$0xff] }
  0x8c   : >> { %500 = vst [vmem:[%s2217_s11 + $0x60] sm:$0xff] %v499_v38  ;;  %502 = vst [vmem:[%s2217_s11 + $0x68] sm:$0xff] %v501_v39  ;;  %v505_v41 = vld [vmem:[%s2221_s17 + $0xe4] sm:$0xff]  ;;  %v507_v42 = vld [vmem:[%s2221_s17 + $0xec] sm:$0xff] }
  0x8d   : >> { %504 = vst [vmem:[%s2217_s11 + $0x70] sm:$0xff] %v503_v40  ;;  %v509_v43 = vld [vmem:[%s2221_s17 + $0xf4] sm:$0xff]  ;;  %506 = vst [vmem:[%s2217_s11 + $0x78] sm:$0xff] %v505_v41  ;;  %v511_v44 = vld [vmem:[%s2221_s17 + $0xfc] sm:$0xff] }
  0x8e   : >> { %508 = vst [vmem:[%s2217_s11 + $0x80] sm:$0xff] %v507_v42  ;;  %510 = vst [vmem:[%s2217_s11 + $0x88] sm:$0xff] %v509_v43  ;;  %v513_v45 = vld [vmem:[%s2221_s17 + $0x104] sm:$0xff]  ;;  %v515_v46 = vld [vmem:[%s2221_s17 + $0x10c] sm:$0xff] }
  0x8f   : >> { %512 = vst [vmem:[%s2217_s11 + $0x90] sm:$0xff] %v511_v44  ;;  %514 = vst [vmem:[%s2217_s11 + $0x98] sm:$0xff] %v513_v45  ;;  %v517_v47 = vld [vmem:[%s2221_s17 + $0x114] sm:$0xff]  ;;  %s524_s17 = scalar_lea.vmem %s2419_s24, %s1602_s25  }
  0x90   : >> { %516 = vst [vmem:[%s2217_s11 + $0xa0] sm:$0xff] %v515_v46  ;;  %518 = vst [vmem:[%s2217_s11 + $0xa8] sm:$0xff] %v517_v47  ;;  %s525_s11 = scalar_lea.vmem %s2423_s20, %s1602_s25 [#allocation4]  }
  0x91 PF: > { %s2648_s27 = sand.u32 15, %s378_s7   ;;  %s1669_s28 = sshll.u32 %s2563_s10, 11 }
  0x92   : > { %s530_s5 = sshra.s32 %s1669_s28, 4  ;;  %p1607_p4 = scmp.le.s32.totalorder %s2648_s27, 0 }
  0x93   : > { %s2652_s14 = scalar_lea.vmem %s2419_s24, %s530_s5   ;;  %s2655_s4 = scalar_lea.vmem %s2423_s20, %s530_s5 [#allocation4]  }
  0x94   : > { %1485 = sbr.rel (%p1607_p4) target bundleno = 165 (0xa5), region = 267  ;;  %s3185_s6 = smov (!%p1607_p4), %s2655_s4 }
  0x95   : > { %s3186_s11 = smov (!%p1607_p4), %s2652_s14  ;;  %s2664_s17 = smov (!%p1607_p4), 0  }
  0x96   : > { %s2243_s18 = smov (!%p1607_p4), 0  }
  0x9b LB: >> { %v546_v48 = vld [vmem:[%s2237_s11] sm:$0xff]  ;;  %v548_v49 = vld [vmem:[%s2237_s11 + $0x34] sm:$0xff]  ;;  %v550_v50 = vld [vmem:[%s2237_s11 + $0x68] sm:$0xff]  ;;  %s554_s7 = sadd.s32 1, %s2241_s17  ;;  %s540_s18 = sadd.s32 1, %s2245_s18   ;;  %s2245_s18 = sphi %s2243_s18, %s540_s18   ;;  %s2241_s17 = sphi %s2664_s17, %s3187_s17   ;;  %s2237_s11 = sphi %s3186_s11, %s559_s11   ;;  %s2233_s6 = sphi %s3185_s6, %s560_s6  }
  0x9c   : >> { %547 = vst [vmem:[%s2233_s6] sm:$0xff] %v546_v48  ;;  %549 = vst [vmem:[%s2233_s6 + $0x10] sm:$0xff] %v548_v49  ;;  %v552_v51 = vld [vmem:[%s2237_s11 + $0x9c] sm:$0xff]  ;;  %p555_p5 = scmp.ge.s32.totalorder %s554_s7, %s2648_s27  ;;  %p539_p8 = scmp.ge.s32.totalorder %s540_s18, %s2648_s27 }
  0x9d   : >> { %551 = vst [vmem:[%s2233_s6 + $0x20] sm:$0xff] %v550_v50  ;;  %553 = vst [vmem:[%s2233_s6 + $0x30] sm:$0xff] %v552_v51 }
  0x9e   : >> { %s3218_s7 = smov (%p555_p5, %s554_s7), 0  ;;  %542 = sbr.rel (!%p539_p8) target bundleno = 155 (0x9b), region = 273 }
  0x9f   : >> { %s1608_s10 = sshll.u32 %s3218_s7, 3  ;;  %s3187_s17 = smov %s3218_s7 }
  0xa0   : >> { %s559_s11 = scalar_lea.vmem %s2652_s14, %s1608_s10   ;;  %s560_s6 = scalar_lea.vmem %s2655_s4, %s1608_s10 [#allocation4]  }
  0xa5 PF: > { %s2314_s23 = smov 0  }
  0xa6   : > { %s561_s26 = sshllo.u32 %s2314_s23, %s2427_s30 }
  0xa7   : > { %v570_v52 = vld [vmem:[%s2556_s8] sm:%s561_s26]  ;;  %v572_v53 = vld [vmem:[%s2556_s8 + $0x34] sm:%s561_s26] }
  0xa8   : > { %571 = vst [vmem:[%s2559_s9] sm:%s561_s26] %v570_v52  ;;  %573 = vst [vmem:[%s2559_s9 + $0x10] sm:%s561_s26] %v572_v53 }
  0xa9   : > { %v574_v54 = vld [vmem:[%s2556_s8 + $0x68] sm:%s561_s26]  ;;  %v576_v55 = vld [vmem:[%s2556_s8 + $0x9c] sm:%s561_s26] }
  0xaa   : > { %575 = vst [vmem:[%s2559_s9 + $0x20] sm:%s561_s26] %v574_v54  ;;  %577 = vst [vmem:[%s2559_s9 + $0x30] sm:%s561_s26] %v576_v55 }
  0xab PF: > { %p1610_p9 = scmp.ge.u32.totalorder %s2421_s29, 8 }
  0xac   : > { %s2315_s25 = smov (!%p1610_p9), 0  }
  0xad   : > { %164 = sbr.rel (%p1610_p9) target bundleno = 180 (0xb4), region = 40  ;;  %s165_s30 = sshllo.u32 (!%p1610_p9), %s2315_s25, %s2421_s29 }
  0xae   : > { %v174_v56 = vld [vmem:[%s2419_s24] sm:%s165_s30] (!%p1610_p9)  ;;  %v176_v57 = vld [vmem:[%s2419_s24 + $0x34] sm:%s165_s30] (!%p1610_p9) }
  0xaf   : > { %175 = vst [vmem:[%s2423_s20] sm:%s165_s30] (!%p1610_p9), %v174_v56  ;;  %177 = vst [vmem:[%s2423_s20 + $0x10] sm:%s165_s30] (!%p1610_p9), %v176_v57 }
  0xb0   : > { %v178_v58 = vld [vmem:[%s2419_s24 + $0x68] sm:%s165_s30] (!%p1610_p9)  ;;  %v180_v59 = vld [vmem:[%s2419_s24 + $0x9c] sm:%s165_s30] (!%p1610_p9) }
  0xb1   : > { %179 = vst [vmem:[%s2423_s20 + $0x20] sm:%s165_s30] (!%p1610_p9), %v178_v58  ;;  %181 = vst [vmem:[%s2423_s20 + $0x30] sm:%s165_s30] (!%p1610_p9), %v180_v59 }
  0xb4 PF: > { %p3188_p11 = scmp.ne.s32.totalorder %s3173_s22, 0 }
  0xb5   : > { %p3189_p13 = scmp.eq.s32.totalorder (!%p3188_p11), %s2356_s15, 0 }
  0xb6   : > { %584 = sbr.rel (%p3188_p11) target bundleno = 599 (0x257), region = 94 }
  0xbd   : > { %2168 = dma.done.wait (%p3189_p13), [#allocation3], 256   ;;  %p3190_p1 = pmov %p3189_p13 }
  0xbe   : > { %s591_s29 = sand.u32 1, %s2173_s12   ;;  %v2316_v60 = vmov 0   ;;  %vm713_vm0 = vcmask 1043456   ;;  %vm714_vm1 = vcmask 1044480   ;;  %v2317_v61 = vmov 65535   ;;  %v636_v12 = vld [vmem:[%s3166_s1] sm:$0xff] }
  0xbf   : > { %2170 = vsyncadd (%p3190_p1), [#allocation3], 4294967040  ;;  %s2705_s8 = sshll.u32 %s591_s29, 6  ;;  %761 = vmatprep.mubr.bf16.mxu0 %v2316_v60  ;;  %814 = vmatprep.mubr.bf16.mxu1 %v2316_v60  ;;  %v715_v62 = vsel %vm713_vm0, 4294967295, %v2317_v61  ;;  %v1997_v13 = vld [vmem:[#allocation2] sm:$0xff]   ;;  %v638_v14 = vld [vmem:[%s3166_s1 + $0x10] sm:$0xff] }
  0xc0   : > { %1983 = vset.pattern.permute.xlu0 %v2316_v60  ;;  %1984 = vset.pattern.permute.xlu1 %v2316_v60  ;;  %s593_s22 = scalar_lea.vmem [#allocation4], %s2705_s8  ;;  %v716_v3 = vsel %vm714_vm1, %v715_v62, 0  ;;  %vm706_vm2 = vcmask 203776   ;;  %v637_v15 = vld [vmem:[%s3166_s1 + $0x8] sm:$0xff]  ;;  %v639_v16 = vld [vmem:[%s3166_s1 + $0x18] sm:$0xff]  ;;  %s2721_s4 = scalar_lea.vmem [#allocation5], %s2705_s8  }
  0xc1   : > { %v1985_v63 = vld [vmem:[%s593_s22 + $0x4] ss:$16 sps:$4 sm:$0xff]   ;;  %v1987_v0 = vld [vmem:[%s593_s22 + $0xc] ss:$16 sps:$4 sm:$0xff]   ;;  %v1989_v1 = vld [vmem:[%s593_s22] ss:$16 sps:$4 sm:$0xff]   ;;  %642 = vperm.xlu0 %1983, %v636_v12   ;;  %652 = vperm.xlu1 %1984, %v638_v14  }
  0xc2   : > { %729 = vmatprep.subr.bf16.mxu0 %v1985_v63  ;;  %v1990_v2 = vld [vmem:[%s593_s22 + $0x8] ss:$16 sps:$4 sm:$0xff]   ;;  %782 = vmatprep.subr.bf16.mxu1 %v1987_v0  ;;  %v1991_v4 = vld [vmem:[%s593_s22 + $0x24] ss:$16 sps:$4 sm:$0x1f]   ;;  %p3191_p2 = scmp.ne.s32.totalorder %s3172_s21, 0 }
  0xc3   : > { %730 = vmatpush1.bf16.msra.mxu0 %v1989_v1  ;;  %783 = vmatpush1.bf16.msra.mxu1 %v1990_v2  ;;  %v1993_v5 = vld [vmem:[%s593_s22 + $0x2c] ss:$16 sps:$4 sm:$0x1f]   ;;  %v721_v6 = vand.u32 %v1991_v4, %v716_v3  ;;  %v1995_v7 = vld [vmem:[%s593_s22 + $0x20] ss:$16 sps:$4 sm:$0x1f]  }
  0xc4   : > { %v1996_v8 = vld [vmem:[%s593_s22 + $0x28] ss:$16 sps:$4 sm:$0x1f]   ;;  %v727_v9 = vand.u32 %v1993_v5, %v716_v3  ;;  %v718_v10 = vand.u32 %v1995_v7, %v716_v3  ;;  %s1638_s6 = sshll.u32 (%p3191_p2), %s2356_s15, 2  ;;  %s1679_s11 = sshll.u32 (%p3191_p2), %s2356_s15, 4 }
  0xc5   : > { %731 = vmatprep.subr.bf16.mxu0 %v721_v6  ;;  %v724_v11 = vand.u32 %v1996_v8, %v716_v3  ;;  %647 = vperm.xlu0 %1983, %v637_v15   ;;  %v1998_v17 = vld [vmem:[#allocation2 + $0x8] sm:$0xff]   ;;  %s915_s17 = ssub.s32 (%p3191_p2), 13, %s1638_s6  ;;  %s2738_s10 = scalar_lea.vmem (%p3191_p2), %s3168_s3, %s1679_s11  }
  0xc6   : > { %784 = vmatprep.subr.bf16.mxu1 %v727_v9  ;;  %657 = vperm.xlu1 %1984, %v639_v16   ;;  %p916_p3 = scmp.lt.s32.totalorder (%p3191_p2), %s915_s17, 4 }
  0xc7   : > { %732 = vmatpush1.bf16.msra.mxu0 %v718_v10  ;;  %785 = vmatpush1.bf16.msra.mxu1 %v724_v11 }
  0xca   : > { %1625 = vmatmul.mubr.msk.bf16.vlgmr.msra.gmra.mrb[0].mxu0 %vm706_vm2, %v1997_v13  ;;  %1627 = vmatmul.mubr.msk.bf16.vlgmr.msra.gmra.mrb[0].mxu1 %vm706_vm2, %v1997_v13 }
  0xcb   : > { %771 = vmatprep.mubr.bf16.mxu0 %v2316_v60  ;;  %824 = vmatprep.mubr.bf16.mxu1 %v2316_v60 }
  0xd2   : > { %1626 = vmatmul.mubr.msk.bf16.gmra.mrb[4].mxu0 %vm706_vm2, %v1998_v17  ;;  %1628 = vmatmul.mubr.msk.bf16.gmra.mrb[4].mxu1 %vm706_vm2, %v1998_v17 }
 0x140   : > { %v643_v18 = vpop.permute.xlu0 %642  ;;  %v653_v20 = vpop.permute.xlu1 %652 }
 0x144   : > { %v648_v19 = vpop.permute.xlu0 %647 }
 0x145   : > { %v658_v47 = vpop.permute.xlu1 %657 }
 0x19d   : > { %v763_v21 = vpop.f32.mrb[0].mxu0  ;;  %v816_v22 = vpop.f32.mrb[0].mxu1 }
 0x19e   : > { %v764_v23 = vadd.f32 %v763_v21, %v643_v18  ;;  %v817_v24 = vadd.f32 %v816_v22, %v643_v18  ;;  %v765_v25 = vpop.f32.mrb[1].mxu0  ;;  %v818_v26 = vpop.f32.mrb[1].mxu1 }
 0x19f   : > { %v766_v27 = vadd.f32 %v765_v25, %v643_v18  ;;  %v819_v28 = vadd.f32 %v818_v26, %v643_v18  ;;  %v767_v29 = vpop.f32.mrb[2].mxu0  ;;  %v820_v30 = vpop.f32.mrb[2].mxu1 }
 0x1a0   : > { %v835_v31 = vmax.f32 %v764_v23, 0.0  ;;  %v837_v32 = vmax.f32 %v817_v24, 0.0  ;;  %v768_v33 = vadd.f32 %v767_v29, %v648_v19  ;;  %v821_v34 = vadd.f32 %v820_v30, %v648_v19  ;;  %v769_v35 = vpop.f32.mrb[3].mxu0  ;;  %v822_v36 = vpop.f32.mrb[3].mxu1 }
 0x1a1   : > { %v836_v37 = vmax.f32 %v766_v27, 0.0  ;;  %v838_v38 = vmax.f32 %v819_v28, 0.0  ;;  %v770_v39 = vadd.f32 %v769_v35, %v648_v19  ;;  %v823_v40 = vadd.f32 %v822_v36, %v648_v19 }
 0x1a2   : > { %v839_v41 = vmax.f32 %v768_v33, 0.0  ;;  %v841_v42 = vmax.f32 %v821_v34, 0.0 }
 0x1a3   : > { %v1671_v43 = vpack.c.bf16 %v836_v37, %v835_v31  ;;  %v1672_v44 = vpack.c.bf16 %v838_v38, %v837_v32  ;;  %v840_v45 = vmax.f32 %v770_v39, 0.0  ;;  %v842_v46 = vmax.f32 %v823_v40, 0.0 }
 0x1a5   : > { %899 = vst [vmem:[%s2721_s4] sm:$0xff] %v1671_v43  ;;  %900 = vst [vmem:[%s2721_s4 + $0x8] sm:$0xff] %v1672_v44  ;;  %v1673_v48 = vpack.c.bf16 %v840_v45, %v839_v41  ;;  %v1674_v49 = vpack.c.bf16 %v842_v46, %v841_v42  ;;  %v773_v50 = vpop.f32.mrb[4].mxu0  ;;  %v826_v51 = vpop.f32.mrb[4].mxu1 }
 0x1a6   : > { %v774_v52 = vadd.f32 %v773_v50, %v653_v20  ;;  %v827_v53 = vadd.f32 %v826_v51, %v653_v20  ;;  %v775_v54 = vpop.f32.mrb[5].mxu0  ;;  %v828_v55 = vpop.f32.mrb[5].mxu1 }
 0x1a7   : > { %901 = vst [vmem:[%s2721_s4 + $0x10] sm:$0xff] %v1673_v48  ;;  %902 = vst [vmem:[%s2721_s4 + $0x18] sm:$0xff] %v1674_v49  ;;  %v776_v56 = vadd.f32 %v775_v54, %v653_v20  ;;  %v829_v57 = vadd.f32 %v828_v55, %v653_v20  ;;  %v777_v58 = vpop.f32.mrb[6].mxu0  ;;  %v830_v59 = vpop.f32.mrb[6].mxu1 }
 0x1a8   : > { %v843_v60 = vmax.f32 %v774_v52, 0.0  ;;  %v845_v61 = vmax.f32 %v827_v53, 0.0  ;;  %v778_v62 = vadd.f32 %v777_v58, %v658_v47  ;;  %v831_v63 = vadd.f32 %v830_v59, %v658_v47  ;;  %v779_v0 = vpop.f32.mrb[7].mxu0  ;;  %v832_v1 = vpop.f32.mrb[7].mxu1 }
 0x1a9   : > { %v844_v2 = vmax.f32 %v776_v56, 0.0  ;;  %v846_v3 = vmax.f32 %v829_v57, 0.0  ;;  %v780_v4 = vadd.f32 %v779_v0, %v658_v47  ;;  %v833_v5 = vadd.f32 %v832_v1, %v658_v47  ;;  %913 = sbr.rel (!%p3191_p2) target bundleno = 599 (0x257), region = 106 }
 0x1aa   : > { %v847_v6 = vmax.f32 %v778_v62, 0.0  ;;  %v849_v7 = vmax.f32 %v831_v63, 0.0 }
 0x1ab   : > { %v1675_v8 = vpack.c.bf16 %v844_v2, %v843_v60  ;;  %v1676_v9 = vpack.c.bf16 %v846_v3, %v845_v61  ;;  %v848_v10 = vmax.f32 %v780_v4, 0.0  ;;  %v850_v11 = vmax.f32 %v833_v5, 0.0 }
 0x1ad   : > { %903 = vst [vmem:[%s2721_s4 + $0x20] sm:$0xff] %v1675_v8  ;;  %904 = vst [vmem:[%s2721_s4 + $0x28] sm:$0xff] %v1676_v9  ;;  %v1677_v12 = vpack.c.bf16 %v848_v10, %v847_v6  ;;  %v1678_v13 = vpack.c.bf16 %v850_v11, %v849_v7 }
 0x1af   : > { %905 = vst [vmem:[%s2721_s4 + $0x30] sm:$0xff] %v1677_v12  ;;  %906 = vst [vmem:[%s2721_s4 + $0x38] sm:$0xff] %v1678_v13 }
 0x1b0   : > { %s3220_s17 = smov (!%p916_p3, %s915_s17), 4 }
 0x1b1   : > { %s1639_s23 = sshll.u32 %s3220_s17, 8  ;;  %s2740_s26 = sshll.u32 %s3220_s17, 2 }
 0x1b2   : > { %p1643_p6 = scmp.eq.s32.totalorder %s1639_s23, 0 }
 0x1b3   : > { %p926_p7 = scmp.lt.u32.totalorder (!%p1643_p6), %s2740_s26, 8 }
 0x1b4   : > { %925 = sbr.rel (%p1643_p6) target bundleno = 599 (0x257), region = 110 }
 0x1bb   : > { %929 = sbr.rel (%p926_p7) target bundleno = 590 (0x24e), region = 114  ;;  %s2744_s21 = sand.u32 (!%p926_p7), 7, %s2740_s26  }
 0x1bc   : > { %p951_p10 = scmp.eq.s32.totalorder (!%p926_p7), %s2744_s21, 0  ;;  %p1644_p12 = scmp.ne.s32.totalorder (!%p926_p7), %s2744_s21, 0 }
 0x1c2   : > { %954 = sbr.rel (%p1644_p12) target bundleno = 517 (0x205), region = 129  ;;  %s955_s15 = sshrl.u32 (!%p1644_p12), %s2740_s26, 3 }
 0x1c3   : > { %s2751_s25 = sshrl.u32 (!%p1644_p12), %s955_s15, 4 }
 0x1c4   : > { %p1645_p0 = scmp.le.s32.totalorder (!%p1644_p12), %s2751_s25, 0 }
 0x1c9   : > { %1499 = sbr.rel (%p1645_p0) target bundleno = 497 (0x1f1), region = 278  ;;  %s3192_s30 = smov (!%p1645_p0), %s2738_s10 }
 0x1ca   : > { %s3193_s29 = smov (!%p1645_p0), %s2721_s4  ;;  %s2760_s8 = smov (!%p1645_p0), 0  }
 0x1cb   : > { %s2762_s22 = smov (!%p1645_p0), 0  }
 0x1d0 LB: >> { %v992_v14 = vld [vmem:[%s2253_s29 + $0x60] sm:$0xff]  ;;  %v2778_v15 = vld [vmem:[%s2253_s29 + $0x68] sm:$0xff]  ;;  %v2781_v16 = vld [vmem:[%s2253_s29 + $0x70] sm:$0xff]  ;;  %s1096_s12 = sadd.s32 1, %s2257_s8  ;;  %s962_s22 = sadd.s32 1, %s2261_s22   ;;  %s2261_s22 = sphi %s2762_s22, %s962_s22   ;;  %s2257_s8 = sphi %s2760_s8, %s3195_s8   ;;  %s2253_s29 = sphi %s3193_s29, %s1101_s29   ;;  %s2249_s30 = sphi %s3192_s30, %s1102_s30  }
 0x1d1   : >> { %993 = vst [vmem:[%s2249_s30 + $0x60] sm:$0xff] %v992_v14  ;;  %995 = vst [vmem:[%s2249_s30 + $0x68] sm:$0xff] %v2778_v15  ;;  %v2789_v17 = vld [vmem:[%s2253_s29 + $0x78] sm:$0xff]  ;;  %v1028_v18 = vld [vmem:[%s2253_s29 + $0x80] sm:$0xff]  ;;  %p2831_p4 = scmp.ge.s32.totalorder %s1096_s12, %s2751_s25  ;;  %p961_p5 = scmp.ge.s32.totalorder %s962_s22, %s2751_s25 }
 0x1d2   : >> { %997 = vst [vmem:[%s2249_s30 + $0x70] sm:$0xff] %v2781_v16  ;;  %1025 = vst [vmem:[%s2249_s30 + $0x94] sm:$0xff] %v2781_v16  ;;  %v1030_v19 = vld [vmem:[%s2253_s29 + $0x88] sm:$0xff]  ;;  %v980_v20 = vld [vmem:[%s2253_s29 + $0x30] sm:$0xff] }
 0x1d3   : >> { %1021 = vst [vmem:[%s2249_s30 + $0x84] sm:$0xff] %v992_v14  ;;  %1023 = vst [vmem:[%s2249_s30 + $0x8c] sm:$0xff] %v2778_v15  ;;  %v982_v21 = vld [vmem:[%s2253_s29 + $0x38] sm:$0xff]  ;;  %v984_v22 = vld [vmem:[%s2253_s29 + $0x40] sm:$0xff]  ;;  %s3222_s12 = smov (%p2831_p4, %s1096_s12), 0 }
 0x1d4   : >> { %1053 = vst [vmem:[%s2249_s30 + $0xb8] sm:$0xff] %v2781_v16  ;;  %999 = vst [vmem:[%s2249_s30 + $0x78] sm:$0xff] %v2789_v17  ;;  %v986_v23 = vld [vmem:[%s2253_s29 + $0x48] sm:$0xff]  ;;  %v988_v24 = vld [vmem:[%s2253_s29 + $0x50] sm:$0xff]  ;;  %s1646_s20 = sshll.u32 %s3222_s12, 7  ;;  %s3195_s8 = smov %s3222_s12 }
 0x1d5   : >> { %1027 = vst [vmem:[%s2249_s30 + $0x9c] sm:$0xff] %v2789_v17  ;;  %1029 = vst [vmem:[%s2249_s30 + $0xa4] sm:$0xff] %v1028_v18  ;;  %v990_v25 = vld [vmem:[%s2253_s29 + $0x58] sm:$0xff]  ;;  %v1060_v26 = vld [vmem:[%s2253_s29 + $0x90] sm:$0xff] }
 0x1d6   : >> { %1031 = vst [vmem:[%s2249_s30 + $0xac] sm:$0xff] %v1030_v19  ;;  %1055 = vst [vmem:[%s2249_s30 + $0xc0] sm:$0xff] %v2789_v17  ;;  %v1062_v27 = vld [vmem:[%s2253_s29 + $0x98] sm:$0xff]  ;;  %v968_v28 = vld [vmem:[%s2253_s29] sm:$0xff] }
 0x1d7   : >> { %1057 = vst [vmem:[%s2249_s30 + $0xc8] sm:$0xff] %v1028_v18  ;;  %1059 = vst [vmem:[%s2249_s30 + $0xd0] sm:$0xff] %v1030_v19  ;;  %v970_v29 = vld [vmem:[%s2253_s29 + $0x8] sm:$0xff]  ;;  %v972_v30 = vld [vmem:[%s2253_s29 + $0x10] sm:$0xff] }
 0x1d8   : >> { %1085 = vst [vmem:[%s2249_s30 + $0xec] sm:$0xff] %v1028_v18  ;;  %1087 = vst [vmem:[%s2249_s30 + $0xf4] sm:$0xff] %v1030_v19  ;;  %v974_v31 = vld [vmem:[%s2253_s29 + $0x18] sm:$0xff]  ;;  %v976_v32 = vld [vmem:[%s2253_s29 + $0x20] sm:$0xff] }
 0x1d9   : >> { %981 = vst [vmem:[%s2249_s30 + $0x30] sm:$0xff] %v980_v20  ;;  %983 = vst [vmem:[%s2249_s30 + $0x38] sm:$0xff] %v982_v21  ;;  %v978_v33 = vld [vmem:[%s2253_s29 + $0x28] sm:$0xff]  ;;  %v1092_v34 = vld [vmem:[%s2253_s29 + $0xa0] sm:$0xff] }
 0x1da   : >> { %985 = vst [vmem:[%s2249_s30 + $0x40] sm:$0xff] %v984_v22  ;;  %1013 = vst [vmem:[%s2249_s30 + $0x64] sm:$0xff] %v984_v22  ;;  %v1094_v35 = vld [vmem:[%s2253_s29 + $0xa8] sm:$0xff]  ;;  %s1101_s29 = scalar_lea.vmem %s2721_s4, %s1646_s20 [#allocation5]  }
 0x1db   : >> { %1049 = vst [vmem:[%s2249_s30 + $0xa8] sm:$0xff] %v992_v14  ;;  %1051 = vst [vmem:[%s2249_s30 + $0xb0] sm:$0xff] %v2778_v15 }
 0x1dc   : >> { %1041 = vst [vmem:[%s2249_s30 + $0x88] sm:$0xff] %v984_v22  ;;  %1077 = vst [vmem:[%s2249_s30 + $0xcc] sm:$0xff] %v992_v14 }
 0x1dd   : >> { %987 = vst [vmem:[%s2249_s30 + $0x48] sm:$0xff] %v986_v23  ;;  %989 = vst [vmem:[%s2249_s30 + $0x50] sm:$0xff] %v988_v24 }
 0x1de   : >> { %991 = vst [vmem:[%s2249_s30 + $0x58] sm:$0xff] %v990_v25  ;;  %1015 = vst [vmem:[%s2249_s30 + $0x6c] sm:$0xff] %v986_v23 }
 0x1df   : >> { %1017 = vst [vmem:[%s2249_s30 + $0x74] sm:$0xff] %v988_v24  ;;  %1019 = vst [vmem:[%s2249_s30 + $0x7c] sm:$0xff] %v990_v25 }
 0x1e0   : >> { %1045 = vst [vmem:[%s2249_s30 + $0x98] sm:$0xff] %v988_v24  ;;  %1047 = vst [vmem:[%s2249_s30 + $0xa0] sm:$0xff] %v990_v25 }
 0x1e1   : >> { %1043 = vst [vmem:[%s2249_s30 + $0x90] sm:$0xff] %v986_v23  ;;  %1069 = vst [vmem:[%s2249_s30 + $0xac] sm:$0xff] %v984_v22 }
 0x1e2   : >> { %1071 = vst [vmem:[%s2249_s30 + $0xb4] sm:$0xff] %v986_v23  ;;  %1073 = vst [vmem:[%s2249_s30 + $0xbc] sm:$0xff] %v988_v24 }
 0x1e3   : >> { %1075 = vst [vmem:[%s2249_s30 + $0xc4] sm:$0xff] %v990_v25  ;;  %1061 = vst [vmem:[%s2249_s30 + $0xd8] sm:$0xff] %v1060_v26 }
 0x1e4   : >> { %1063 = vst [vmem:[%s2249_s30 + $0xe0] sm:$0xff] %v1062_v27  ;;  %969 = vst [vmem:[%s2249_s30] sm:$0xff] %v968_v28 }
 0x1e5   : >> { %1009 = vst [vmem:[%s2249_s30 + $0x54] sm:$0xff] %v980_v20  ;;  %1011 = vst [vmem:[%s2249_s30 + $0x5c] sm:$0xff] %v982_v21 }
 0x1e6   : >> { %1037 = vst [vmem:[%s2249_s30 + $0x78] sm:$0xff] %v980_v20  ;;  %1039 = vst [vmem:[%s2249_s30 + $0x80] sm:$0xff] %v982_v21 }
 0x1e7   : >> { %1065 = vst [vmem:[%s2249_s30 + $0x9c] sm:$0xff] %v980_v20  ;;  %1067 = vst [vmem:[%s2249_s30 + $0xa4] sm:$0xff] %v982_v21 }
 0x1e8   : >> { %1089 = vst [vmem:[%s2249_s30 + $0xfc] sm:$0xff] %v1060_v26  ;;  %1091 = vst [vmem:[%s2249_s30 + $0x104] sm:$0xff] %v1062_v27 }
 0x1e9   : >> { %971 = vst [vmem:[%s2249_s30 + $0x8] sm:$0xff] %v970_v29  ;;  %973 = vst [vmem:[%s2249_s30 + $0x10] sm:$0xff] %v972_v30 }
 0x1ea   : >> { %975 = vst [vmem:[%s2249_s30 + $0x18] sm:$0xff] %v974_v31  ;;  %1001 = vst [vmem:[%s2249_s30 + $0x34] sm:$0xff] %v972_v30  ;;  %964 = sbr.rel (!%p961_p5) target bundleno = 464 (0x1d0), region = 284 }
 0x1eb   : >> { %1003 = vst [vmem:[%s2249_s30 + $0x3c] sm:$0xff] %v974_v31  ;;  %1079 = vst [vmem:[%s2249_s30 + $0xd4] sm:$0xff] %v2778_v15 }
 0x1ec   : >> { %1081 = vst [vmem:[%s2249_s30 + $0xdc] sm:$0xff] %v2781_v16  ;;  %1083 = vst [vmem:[%s2249_s30 + $0xe4] sm:$0xff] %v2789_v17 }
 0x1ed   : >> { %977 = vst [vmem:[%s2249_s30 + $0x20] sm:$0xff] %v976_v32  ;;  %979 = vst [vmem:[%s2249_s30 + $0x28] sm:$0xff] %v978_v33 }
 0x1ee   : >> { %1005 = vst [vmem:[%s2249_s30 + $0x44] sm:$0xff] %v976_v32  ;;  %1007 = vst [vmem:[%s2249_s30 + $0x4c] sm:$0xff] %v978_v33 }
 0x1ef   : >> { %1033 = vst [vmem:[%s2249_s30 + $0x68] sm:$0xff] %v976_v32  ;;  %1035 = vst [vmem:[%s2249_s30 + $0x70] sm:$0xff] %v978_v33 }
 0x1f0   : >> { %1093 = vst [vmem:[%s2249_s30 + $0x10c] sm:$0xff] %v1092_v34  ;;  %1095 = vst [vmem:[%s2249_s30 + $0x114] sm:$0xff] %v1094_v35  ;;  %s1102_s30 = scalar_lea.vmem %s2738_s10, %s1646_s20  }
 0x1f1 PF: > { %s2906_s9 = sand.u32 15, %s955_s15   ;;  %s1680_s27 = sshll.u32 %s2751_s25, 11 }
 0x1f2   : > { %s1107_s28 = sshra.s32 %s1680_s27, 4  ;;  %p1651_p8 = scmp.le.s32.totalorder %s2906_s9, 0 }
 0x1f3   : > { %s2910_s5 = scalar_lea.vmem %s2721_s4, %s1107_s28 [#allocation5]   ;;  %s2913_s14 = scalar_lea.vmem %s2738_s10, %s1107_s28  }
 0x1f4   : > { %1513 = sbr.rel (%p1651_p8) target bundleno = 517 (0x205), region = 289  ;;  %s3196_s6 = smov (!%p1651_p8), %s2913_s14 }
 0x1f5   : > { %s3197_s11 = smov (!%p1651_p8), %s2910_s5  ;;  %s2922_s17 = smov (!%p1651_p8), 0  }
 0x1f6   : > { %s2275_s18 = smov (!%p1651_p8), 0  }
 0x1fb LB: >> { %v1123_v36 = vld [vmem:[%s2269_s11] sm:$0xff]  ;;  %v1125_v37 = vld [vmem:[%s2269_s11 + $0x10] sm:$0xff]  ;;  %s1131_s7 = sadd.s32 1, %s2273_s17  ;;  %s1117_s18 = sadd.s32 1, %s2277_s18   ;;  %s2277_s18 = sphi %s2275_s18, %s1117_s18   ;;  %s2273_s17 = sphi %s2922_s17, %s3198_s17   ;;  %s2269_s11 = sphi %s3197_s11, %s1136_s11   ;;  %s2265_s6 = sphi %s3196_s6, %s1137_s6  }
 0x1fc   : >> { %v1127_v38 = vld [vmem:[%s2269_s11 + $0x20] sm:$0xff]  ;;  %1124 = vst [vmem:[%s2265_s6] sm:$0xff] %v1123_v36  ;;  %1126 = vst [vmem:[%s2265_s6 + $0x34] sm:$0xff] %v1125_v37  ;;  %v1129_v39 = vld [vmem:[%s2269_s11 + $0x30] sm:$0xff]  ;;  %p1132_p9 = scmp.ge.s32.totalorder %s1131_s7, %s2906_s9  ;;  %p1116_p11 = scmp.ge.s32.totalorder %s1117_s18, %s2906_s9 }
 0x1fd   : >> { %1128 = vst [vmem:[%s2265_s6 + $0x68] sm:$0xff] %v1127_v38  ;;  %1130 = vst [vmem:[%s2265_s6 + $0x9c] sm:$0xff] %v1129_v39 }
 0x1fe   : >> { %s3224_s7 = smov (%p1132_p9, %s1131_s7), 0  ;;  %1119 = sbr.rel (!%p1116_p11) target bundleno = 507 (0x1fb), region = 295 }
 0x1ff   : >> { %s1652_s23 = sshll.u32 %s3224_s7, 3  ;;  %s3198_s17 = smov %s3224_s7 }
 0x200   : >> { %s1136_s11 = scalar_lea.vmem %s2910_s5, %s1652_s23 [#allocation5]   ;;  %s1137_s6 = scalar_lea.vmem %s2913_s14, %s1652_s23  }
 0x205 PF: > { %1140 = sbr.rel (%p951_p10) target bundleno = 590 (0x24e), region = 147  ;;  %s1142_s15 = ssub.s32 (!%p951_p10), %s2740_s26, %s2744_s21 }
 0x206   : > { %s1146_s25 = sshrl.u32 (!%p951_p10), %s2740_s26, 3  ;;  %s2943_s30 = scalar_lea.vmem (!%p951_p10), %s2721_s4, %s1142_s15 [#allocation5] }
 0x207   : > { %s2946_s29 = scalar_lea.vmem (!%p951_p10), %s2738_s10, %s1142_s15  ;;  %s2950_s8 = sshrl.u32 (!%p951_p10), %s1146_s25, 4 }
 0x208   : > { %p1654_p13 = scmp.le.s32.totalorder (!%p951_p10), %s2950_s8, 0 }
 0x20c   : > { %1527 = sbr.rel (%p1654_p13) target bundleno = 564 (0x234), region = 300  ;;  %s3199_s22 = smov (!%p1654_p13), %s2738_s10 }
 0x20d   : > { %s3200_s12 = smov (!%p1654_p13), %s2721_s4  ;;  %s2959_s24 = smov (!%p1654_p13), 0  }
 0x20e   : > { %s2961_s20 = smov (!%p1654_p13), 0  }
 0x213 LB: >> { %v1183_v40 = vld [vmem:[%s2285_s12 + $0x60] sm:$0xff]  ;;  %v2977_v41 = vld [vmem:[%s2285_s12 + $0x68] sm:$0xff]  ;;  %v2980_v42 = vld [vmem:[%s2285_s12 + $0x70] sm:$0xff]  ;;  %s1287_s9 = sadd.s32 1, %s2289_s24  ;;  %s1153_s20 = sadd.s32 1, %s2293_s20   ;;  %s2293_s20 = sphi %s2961_s20, %s1153_s20   ;;  %s2289_s24 = sphi %s2959_s24, %s3202_s24   ;;  %s2285_s12 = sphi %s3200_s12, %s1292_s12   ;;  %s2281_s22 = sphi %s3199_s22, %s1293_s22  }
 0x214   : >> { %1184 = vst [vmem:[%s2281_s22 + $0x60] sm:$0xff] %v1183_v40  ;;  %1186 = vst [vmem:[%s2281_s22 + $0x68] sm:$0xff] %v2977_v41  ;;  %v2988_v43 = vld [vmem:[%s2285_s12 + $0x78] sm:$0xff]  ;;  %v1219_v44 = vld [vmem:[%s2285_s12 + $0x80] sm:$0xff]  ;;  %p3030_p1 = scmp.ge.s32.totalorder %s1287_s9, %s2950_s8  ;;  %p1152_p2 = scmp.ge.s32.totalorder %s1153_s20, %s2950_s8 }
 0x215   : >> { %1188 = vst [vmem:[%s2281_s22 + $0x70] sm:$0xff] %v2980_v42  ;;  %1216 = vst [vmem:[%s2281_s22 + $0x94] sm:$0xff] %v2980_v42  ;;  %v1221_v45 = vld [vmem:[%s2285_s12 + $0x88] sm:$0xff]  ;;  %v1171_v46 = vld [vmem:[%s2285_s12 + $0x30] sm:$0xff] }
 0x216   : >> { %1212 = vst [vmem:[%s2281_s22 + $0x84] sm:$0xff] %v1183_v40  ;;  %1214 = vst [vmem:[%s2281_s22 + $0x8c] sm:$0xff] %v2977_v41  ;;  %v1173_v47 = vld [vmem:[%s2285_s12 + $0x38] sm:$0xff]  ;;  %v1175_v48 = vld [vmem:[%s2285_s12 + $0x40] sm:$0xff]  ;;  %s3226_s9 = smov (%p3030_p1, %s1287_s9), 0 }
 0x217   : >> { %1244 = vst [vmem:[%s2281_s22 + $0xb8] sm:$0xff] %v2980_v42  ;;  %1190 = vst [vmem:[%s2281_s22 + $0x78] sm:$0xff] %v2988_v43  ;;  %v1177_v49 = vld [vmem:[%s2285_s12 + $0x48] sm:$0xff]  ;;  %v1179_v50 = vld [vmem:[%s2285_s12 + $0x50] sm:$0xff]  ;;  %s1655_s28 = sshll.u32 %s3226_s9, 7  ;;  %s3202_s24 = smov %s3226_s9 }
 0x218   : >> { %1218 = vst [vmem:[%s2281_s22 + $0x9c] sm:$0xff] %v2988_v43  ;;  %1220 = vst [vmem:[%s2281_s22 + $0xa4] sm:$0xff] %v1219_v44  ;;  %v1181_v51 = vld [vmem:[%s2285_s12 + $0x58] sm:$0xff]  ;;  %v1251_v52 = vld [vmem:[%s2285_s12 + $0x90] sm:$0xff] }
 0x219   : >> { %1222 = vst [vmem:[%s2281_s22 + $0xac] sm:$0xff] %v1221_v45  ;;  %1246 = vst [vmem:[%s2281_s22 + $0xc0] sm:$0xff] %v2988_v43  ;;  %v1253_v53 = vld [vmem:[%s2285_s12 + $0x98] sm:$0xff]  ;;  %v1159_v54 = vld [vmem:[%s2285_s12] sm:$0xff] }
 0x21a   : >> { %1248 = vst [vmem:[%s2281_s22 + $0xc8] sm:$0xff] %v1219_v44  ;;  %1250 = vst [vmem:[%s2281_s22 + $0xd0] sm:$0xff] %v1221_v45  ;;  %v1161_v55 = vld [vmem:[%s2285_s12 + $0x8] sm:$0xff]  ;;  %v1163_v56 = vld [vmem:[%s2285_s12 + $0x10] sm:$0xff] }
 0x21b   : >> { %1276 = vst [vmem:[%s2281_s22 + $0xec] sm:$0xff] %v1219_v44  ;;  %1278 = vst [vmem:[%s2281_s22 + $0xf4] sm:$0xff] %v1221_v45  ;;  %v1165_v57 = vld [vmem:[%s2285_s12 + $0x18] sm:$0xff]  ;;  %v1167_v58 = vld [vmem:[%s2285_s12 + $0x20] sm:$0xff] }
 0x21c   : >> { %1172 = vst [vmem:[%s2281_s22 + $0x30] sm:$0xff] %v1171_v46  ;;  %1174 = vst [vmem:[%s2281_s22 + $0x38] sm:$0xff] %v1173_v47  ;;  %v1169_v59 = vld [vmem:[%s2285_s12 + $0x28] sm:$0xff]  ;;  %v1283_v60 = vld [vmem:[%s2285_s12 + $0xa0] sm:$0xff] }
 0x21d   : >> { %1176 = vst [vmem:[%s2281_s22 + $0x40] sm:$0xff] %v1175_v48  ;;  %1204 = vst [vmem:[%s2281_s22 + $0x64] sm:$0xff] %v1175_v48  ;;  %v1285_v61 = vld [vmem:[%s2285_s12 + $0xa8] sm:$0xff]  ;;  %s1292_s12 = scalar_lea.vmem %s2721_s4, %s1655_s28 [#allocation5]  }
 0x21e   : >> { %1240 = vst [vmem:[%s2281_s22 + $0xa8] sm:$0xff] %v1183_v40  ;;  %1242 = vst [vmem:[%s2281_s22 + $0xb0] sm:$0xff] %v2977_v41 }
 0x21f   : >> { %1232 = vst [vmem:[%s2281_s22 + $0x88] sm:$0xff] %v1175_v48  ;;  %1268 = vst [vmem:[%s2281_s22 + $0xcc] sm:$0xff] %v1183_v40 }
 0x220   : >> { %1178 = vst [vmem:[%s2281_s22 + $0x48] sm:$0xff] %v1177_v49  ;;  %1180 = vst [vmem:[%s2281_s22 + $0x50] sm:$0xff] %v1179_v50 }
 0x221   : >> { %1182 = vst [vmem:[%s2281_s22 + $0x58] sm:$0xff] %v1181_v51  ;;  %1206 = vst [vmem:[%s2281_s22 + $0x6c] sm:$0xff] %v1177_v49 }
 0x222   : >> { %1208 = vst [vmem:[%s2281_s22 + $0x74] sm:$0xff] %v1179_v50  ;;  %1210 = vst [vmem:[%s2281_s22 + $0x7c] sm:$0xff] %v1181_v51 }
 0x223   : >> { %1236 = vst [vmem:[%s2281_s22 + $0x98] sm:$0xff] %v1179_v50  ;;  %1238 = vst [vmem:[%s2281_s22 + $0xa0] sm:$0xff] %v1181_v51 }
 0x224   : >> { %1234 = vst [vmem:[%s2281_s22 + $0x90] sm:$0xff] %v1177_v49  ;;  %1260 = vst [vmem:[%s2281_s22 + $0xac] sm:$0xff] %v1175_v48 }
 0x225   : >> { %1262 = vst [vmem:[%s2281_s22 + $0xb4] sm:$0xff] %v1177_v49  ;;  %1264 = vst [vmem:[%s2281_s22 + $0xbc] sm:$0xff] %v1179_v50 }
 0x226   : >> { %1266 = vst [vmem:[%s2281_s22 + $0xc4] sm:$0xff] %v1181_v51  ;;  %1252 = vst [vmem:[%s2281_s22 + $0xd8] sm:$0xff] %v1251_v52 }
 0x227   : >> { %1254 = vst [vmem:[%s2281_s22 + $0xe0] sm:$0xff] %v1253_v53  ;;  %1160 = vst [vmem:[%s2281_s22] sm:$0xff] %v1159_v54 }
 0x228   : >> { %1200 = vst [vmem:[%s2281_s22 + $0x54] sm:$0xff] %v1171_v46  ;;  %1202 = vst [vmem:[%s2281_s22 + $0x5c] sm:$0xff] %v1173_v47 }
 0x229   : >> { %1228 = vst [vmem:[%s2281_s22 + $0x78] sm:$0xff] %v1171_v46  ;;  %1230 = vst [vmem:[%s2281_s22 + $0x80] sm:$0xff] %v1173_v47 }
 0x22a   : >> { %1256 = vst [vmem:[%s2281_s22 + $0x9c] sm:$0xff] %v1171_v46  ;;  %1258 = vst [vmem:[%s2281_s22 + $0xa4] sm:$0xff] %v1173_v47 }
 0x22b   : >> { %1280 = vst [vmem:[%s2281_s22 + $0xfc] sm:$0xff] %v1251_v52  ;;  %1282 = vst [vmem:[%s2281_s22 + $0x104] sm:$0xff] %v1253_v53 }
 0x22c   : >> { %1162 = vst [vmem:[%s2281_s22 + $0x8] sm:$0xff] %v1161_v55  ;;  %1164 = vst [vmem:[%s2281_s22 + $0x10] sm:$0xff] %v1163_v56 }
 0x22d   : >> { %1166 = vst [vmem:[%s2281_s22 + $0x18] sm:$0xff] %v1165_v57  ;;  %1192 = vst [vmem:[%s2281_s22 + $0x34] sm:$0xff] %v1163_v56  ;;  %1155 = sbr.rel (!%p1152_p2) target bundleno = 531 (0x213), region = 306 }
 0x22e   : >> { %1194 = vst [vmem:[%s2281_s22 + $0x3c] sm:$0xff] %v1165_v57  ;;  %1270 = vst [vmem:[%s2281_s22 + $0xd4] sm:$0xff] %v2977_v41 }
 0x22f   : >> { %1272 = vst [vmem:[%s2281_s22 + $0xdc] sm:$0xff] %v2980_v42  ;;  %1274 = vst [vmem:[%s2281_s22 + $0xe4] sm:$0xff] %v2988_v43 }
 0x230   : >> { %1168 = vst [vmem:[%s2281_s22 + $0x20] sm:$0xff] %v1167_v58  ;;  %1170 = vst [vmem:[%s2281_s22 + $0x28] sm:$0xff] %v1169_v59 }
 0x231   : >> { %1196 = vst [vmem:[%s2281_s22 + $0x44] sm:$0xff] %v1167_v58  ;;  %1198 = vst [vmem:[%s2281_s22 + $0x4c] sm:$0xff] %v1169_v59 }
 0x232   : >> { %1224 = vst [vmem:[%s2281_s22 + $0x68] sm:$0xff] %v1167_v58  ;;  %1226 = vst [vmem:[%s2281_s22 + $0x70] sm:$0xff] %v1169_v59 }
 0x233   : >> { %1284 = vst [vmem:[%s2281_s22 + $0x10c] sm:$0xff] %v1283_v60  ;;  %1286 = vst [vmem:[%s2281_s22 + $0x114] sm:$0xff] %v1285_v61  ;;  %s1293_s22 = scalar_lea.vmem %s2738_s10, %s1655_s28  }
 0x234 PF: > { %s3105_s5 = sand.u32 15, %s1146_s25   ;;  %s1682_s14 = sshll.u32 %s2950_s8, 11 }
 0x235   : > { %s1298_s6 = sshra.s32 %s1682_s14, 4  ;;  %p1660_p3 = scmp.le.s32.totalorder %s3105_s5, 0 }
 0x236   : > { %s3109_s11 = scalar_lea.vmem %s2721_s4, %s1298_s6 [#allocation5]   ;;  %s3112_s17 = scalar_lea.vmem %s2738_s10, %s1298_s6  }
 0x237   : > { %1541 = sbr.rel (%p1660_p3) target bundleno = 584 (0x248), region = 311  ;;  %s3203_s18 = smov (!%p1660_p3), %s3112_s17 }
 0x238   : > { %s3204_s7 = smov (!%p1660_p3), %s3109_s11  ;;  %s3121_s23 = smov (!%p1660_p3), 0  }
 0x239   : > { %s2307_s15 = smov (!%p1660_p3), 0  }
 0x23e LB: >> { %v1314_v62 = vld [vmem:[%s2301_s7] sm:$0xff]  ;;  %v1316_v63 = vld [vmem:[%s2301_s7 + $0x10] sm:$0xff]  ;;  %s1322_s25 = sadd.s32 1, %s2305_s23  ;;  %s1308_s15 = sadd.s32 1, %s2309_s15   ;;  %s2309_s15 = sphi %s2307_s15, %s1308_s15   ;;  %s2305_s23 = sphi %s3121_s23, %s3205_s23   ;;  %s2301_s7 = sphi %s3204_s7, %s1327_s7   ;;  %s2297_s18 = sphi %s3203_s18, %s1328_s18  }
 0x23f   : >> { %v1318_v0 = vld [vmem:[%s2301_s7 + $0x20] sm:$0xff]  ;;  %1315 = vst [vmem:[%s2297_s18] sm:$0xff] %v1314_v62  ;;  %1317 = vst [vmem:[%s2297_s18 + $0x34] sm:$0xff] %v1316_v63  ;;  %v1320_v1 = vld [vmem:[%s2301_s7 + $0x30] sm:$0xff]  ;;  %p1323_p6 = scmp.ge.s32.totalorder %s1322_s25, %s3105_s5  ;;  %p1307_p7 = scmp.ge.s32.totalorder %s1308_s15, %s3105_s5 }
 0x240   : >> { %1319 = vst [vmem:[%s2297_s18 + $0x68] sm:$0xff] %v1318_v0  ;;  %1321 = vst [vmem:[%s2297_s18 + $0x9c] sm:$0xff] %v1320_v1 }
 0x241   : >> { %s3228_s25 = smov (%p1323_p6, %s1322_s25), 0  ;;  %1310 = sbr.rel (!%p1307_p7) target bundleno = 574 (0x23e), region = 317 }
 0x242   : >> { %s1661_s8 = sshll.u32 %s3228_s25, 3  ;;  %s3205_s23 = smov %s3228_s25 }
 0x243   : >> { %s1327_s7 = scalar_lea.vmem %s3109_s11, %s1661_s8 [#allocation5]   ;;  %s1328_s18 = scalar_lea.vmem %s3112_s17, %s1661_s8  }
 0x248 PF: > { %s2318_s22 = smov 0  }
 0x249   : > { %s1329_s12 = sshllo.u32 %s2318_s22, %s2744_s21 }
 0x24a   : > { %v1338_v2 = vld [vmem:[%s2943_s30] sm:%s1329_s12]  ;;  %v1340_v3 = vld [vmem:[%s2943_s30 + $0x10] sm:%s1329_s12] }
 0x24b   : > { %1339 = vst [vmem:[%s2946_s29] sm:%s1329_s12] %v1338_v2  ;;  %1341 = vst [vmem:[%s2946_s29 + $0x34] sm:%s1329_s12] %v1340_v3 }
 0x24c   : > { %v1342_v4 = vld [vmem:[%s2943_s30 + $0x20] sm:%s1329_s12]  ;;  %v1344_v5 = vld [vmem:[%s2943_s30 + $0x30] sm:%s1329_s12] }
 0x24d   : > { %1343 = vst [vmem:[%s2946_s29 + $0x68] sm:%s1329_s12] %v1342_v4  ;;  %1345 = vst [vmem:[%s2946_s29 + $0x9c] sm:%s1329_s12] %v1344_v5 }
 0x24e PF: > { %p1663_p10 = scmp.ge.u32.totalorder %s2740_s26, 8 }
 0x24f   : > { %s2319_s24 = smov (!%p1663_p10), 0  }
 0x250   : > { %932 = sbr.rel (%p1663_p10) target bundleno = 599 (0x257), region = 118  ;;  %s933_s21 = sshllo.u32 (!%p1663_p10), %s2319_s24, %s2740_s26 }
 0x251   : > { %v942_v6 = vld [vmem:[%s2721_s4] sm:%s933_s21] (!%p1663_p10)  ;;  %v944_v7 = vld [vmem:[%s2721_s4 + $0x10] sm:%s933_s21] (!%p1663_p10) }
 0x252   : > { %943 = vst [vmem:[%s2738_s10] sm:%s933_s21] (!%p1663_p10), %v942_v6  ;;  %945 = vst [vmem:[%s2738_s10 + $0x34] sm:%s933_s21] (!%p1663_p10), %v944_v7 }
 0x253   : > { %v946_v8 = vld [vmem:[%s2721_s4 + $0x20] sm:%s933_s21] (!%p1663_p10)  ;;  %v948_v9 = vld [vmem:[%s2721_s4 + $0x30] sm:%s933_s21] (!%p1663_p10) }
 0x254   : > { %947 = vst [vmem:[%s2738_s10 + $0x68] sm:%s933_s21] (!%p1663_p10), %v946_v8  ;;  %949 = vst [vmem:[%s2738_s10 + $0x9c] sm:%s933_s21] (!%p1663_p10), %v948_v9 }
 0x257 PF: > { %p11_p12 = scmp.ge.s32.totalorder %s2359_s16, 6   ;;  %s3206_s12 = smov %s2177_s13 }
 0x258   : > { %s3207_s13 = smov %s2369_s19  ;;  %s3208_s14 = smov %s2359_s16 }
 0x259   :  { %13 = sbr.rel (!%p11_p12) target bundleno = 2 (0x2), region = 328 }
 0x260   :  { %1359 = vsyncpa [#allocation3], 1 }
 0x261   :  { %1361 = vsyncpa [#allocation3 + $0x1], 1 }

// kernel: cnn_deep_forward.7
= control target key start
LH: loop header
LB: loop body
LE: loop exit
PB: predicated region body
PF: predicated region fallthrough
CT: control target
= control target key end

     0   :  { %vm74_vm0 = vcmask 1043456   ;;  %vm75_vm1 = vcmask 64516   ;;  %s245_s0 = inlined_call_operand.vmem [shape: bf16[32,392], index: 0, kind: input, shape index: {}]   ;;  %s246_s1 = inlined_call_operand.vmem [shape: bf16[32,392], index: 1, kind: input, shape index: {}]   ;;  %s247_s2 = inlined_call_operand.vmem [shape: bf16[32,392], index: 2, kind: input, shape index: {}]   ;;  %s248_s3 = inlined_call_operand.vmem [shape: bf16[32,392], index: 3, kind: input, shape index: {}]   ;;  %s249_s4 = inlined_call_operand.vmem [shape: bf16[32,392], index: 4, kind: output, shape index: {}]  }
   0x1   :  { %v17_v0 = vld [vmem:[%s245_s0] sm:$0xff]  ;;  %v18_v5 = vld [vmem:[%s245_s0 + $0x8] sm:$0xff]  ;;  %vm137_vm2 = vmor %vm75_vm1, %vm74_vm0 }
   0x2   :  { %v25_v1 = vld [vmem:[%s246_s1] sm:$0xff]  ;;  %v26_v6 = vld [vmem:[%s246_s1 + $0x8] sm:$0xff]  ;;  %v19_v13 = vld [vmem:[%s245_s0 + $0x10] sm:$0xff] }
   0x3   :  { %v41_v2 = vld [vmem:[%s247_s2] sm:$0xff]  ;;  %v33_v3 = vmax.bf16 %v25_v1, %v17_v0  ;;  %v34_v8 = vmax.bf16 %v26_v6, %v18_v5  ;;  %v42_v9 = vld [vmem:[%s247_s2 + $0x8] sm:$0xff]  ;;  %v27_v14 = vld [vmem:[%s246_s1 + $0x10] sm:$0xff] }
   0x4   :  { %v49_v4 = vld [vmem:[%s248_s3] sm:$0xff]  ;;  %v50_v10 = vld [vmem:[%s248_s3 + $0x8] sm:$0xff]  ;;  %v43_v15 = vld [vmem:[%s247_s2 + $0x10] sm:$0xff]  ;;  %v35_v17 = vmax.bf16 %v27_v14, %v19_v13 }
   0x5   :  { %v57_v7 = vmax.bf16 %v49_v4, %v41_v2  ;;  %v58_v12 = vmax.bf16 %v50_v10, %v42_v9  ;;  %v51_v18 = vld [vmem:[%s248_s3 + $0x10] sm:$0xff]  ;;  %v20_v19 = vld [vmem:[%s245_s0 + $0x18] sm:$0xff]  ;;  %v21_v26 = vld [vmem:[%s245_s0 + $0x20] sm:$0xff] }
   0x6   :  { %v28_v20 = vld [vmem:[%s246_s1 + $0x18] sm:$0xff]  ;;  %v59_v22 = vmax.bf16 %v51_v18, %v43_v15  ;;  %v29_v28 = vld [vmem:[%s246_s1 + $0x20] sm:$0xff]  ;;  %v22_v34 = vld [vmem:[%s245_s0 + $0x28] sm:$0xff] }
   0x7   :  { %v65_v16 = vmax.bf16 %v57_v7, %v33_v3  ;;  %v66_v21 = vmax.bf16 %v58_v12, %v34_v8  ;;  %v36_v23 = vmax.bf16 %v28_v20, %v20_v19  ;;  %v44_v24 = vld [vmem:[%s247_s2 + $0x18] sm:$0xff]  ;;  %v45_v29 = vld [vmem:[%s247_s2 + $0x20] sm:$0xff]  ;;  %v37_v32 = vmax.bf16 %v29_v28, %v21_v26  ;;  %v30_v35 = vld [vmem:[%s246_s1 + $0x28] sm:$0xff] }
   0x8   :  { %v52_v25 = vld [vmem:[%s248_s3 + $0x18] sm:$0xff]  ;;  %v53_v30 = vld [vmem:[%s248_s3 + $0x20] sm:$0xff]  ;;  %v67_v31 = vmax.bf16 %v59_v22, %v35_v17  ;;  %v46_v36 = vld [vmem:[%s247_s2 + $0x28] sm:$0xff]  ;;  %v38_v38 = vmax.bf16 %v30_v35, %v22_v34 }
   0x9   :  { %73 = vst [vmem:[%s249_s4] sm:$0xff] %v65_v16  ;;  %v60_v27 = vmax.bf16 %v52_v25, %v44_v24  ;;  %77 = vst.msk [vmem:[%s249_s4 + $0x8] sm:$0xff] %vm137_vm2, %v66_v21  ;;  %v61_v33 = vmax.bf16 %v53_v30, %v45_v29  ;;  %v54_v39 = vld [vmem:[%s248_s3 + $0x28] sm:$0xff]  ;;  %v23_v40 = vld [vmem:[%s245_s0 + $0x30] sm:$0xff] }
   0xa   :  { %v31_v41 = vld [vmem:[%s246_s1 + $0x30] sm:$0xff]  ;;  %78 = vst [vmem:[%s249_s4 + $0x10] sm:$0xff] %v67_v31  ;;  %v62_v43 = vmax.bf16 %v54_v39, %v46_v36  ;;  %v24_v47 = vld [vmem:[%s245_s0 + $0x38] sm:$0xff] }
   0xb   :  { %v68_v37 = vmax.bf16 %v60_v27, %v36_v23  ;;  %v69_v42 = vmax.bf16 %v61_v33, %v37_v32  ;;  %v39_v44 = vmax.bf16 %v31_v41, %v23_v40  ;;  %v47_v45 = vld [vmem:[%s247_s2 + $0x30] sm:$0xff]  ;;  %v32_v49 = vld [vmem:[%s246_s1 + $0x38] sm:$0xff] }
   0xc   :  { %v55_v46 = vld [vmem:[%s248_s3 + $0x30] sm:$0xff]  ;;  %v48_v50 = vld [vmem:[%s247_s2 + $0x38] sm:$0xff]  ;;  %v70_v52 = vmax.bf16 %v62_v43, %v38_v38  ;;  %v40_v53 = vmax.bf16 %v32_v49, %v24_v47 }
   0xd   :  { %79 = vst.msk [vmem:[%s249_s4 + $0x18] sm:$0xff] %vm137_vm2, %v68_v37  ;;  %v63_v48 = vmax.bf16 %v55_v46, %v47_v45  ;;  %v56_v51 = vld [vmem:[%s248_s3 + $0x38] sm:$0xff]  ;;  %80 = vst [vmem:[%s249_s4 + $0x20] sm:$0xff] %v69_v42 }
   0xe   :  { %v64_v54 = vmax.bf16 %v56_v51, %v48_v50  ;;  %81 = vst.msk [vmem:[%s249_s4 + $0x28] sm:$0xff] %vm137_vm2, %v70_v52 }
   0xf   :  { %v71_v55 = vmax.bf16 %v63_v48, %v39_v44 }
  0x10   :  { %v72_v56 = vmax.bf16 %v64_v54, %v40_v53 }
  0x11   :  { %82 = vst [vmem:[%s249_s4 + $0x30] sm:$0xff] %v71_v55 }
  0x12   :  { %83 = vst.msk [vmem:[%s249_s4 + $0x38] sm:$0xff] %vm137_vm2, %v72_v56 }

// kernel: cnn_deep_forward.8
= control target key start
LH: loop header
LB: loop body
LE: loop exit
PB: predicated region body
PF: predicated region fallthrough
CT: control target
= control target key end

     0   :  { %vm1380_vm0 = vcmask 261120   ;;  %vm1991_vm1 = vcmask 1043456   ;;  %vm1992_vm2 = vcmask 64516   ;;  %s3452_s2 = inlined_call_operand.vmem [shape: bf16[800,392], index: 2, kind: input, shape index: {}]   ;;  %s3453_s0 = inlined_call_operand.vmem [shape: bf16[48,800], index: 0, kind: input, shape index: {}]   ;;  %s3454_s1 = inlined_call_operand.vmem [shape: f32[48,1], index: 1, kind: input, shape index: {}]   ;;  %s3455_s3 = inlined_call_operand.vmem [shape: bf16[48,392], index: 3, kind: output, shape index: {}]  }
   0x1   :  { %v2359_v0 = vld [vmem:[%s3452_s2 + $0x4] ss:$16 sps:$4 sm:$0xff]   ;;  %v2361_v1 = vld [vmem:[%s3452_s2 + $0xc] ss:$16 sps:$4 sm:$0xff]   ;;  %v2363_v2 = vld [vmem:[%s3452_s2] ss:$16 sps:$4 sm:$0xff]  }
   0x2   :  { %1390 = vmatprep.subr.bf16.mxu0 %v2359_v0  ;;  %v2364_v3 = vld [vmem:[%s3452_s2 + $0x8] ss:$16 sps:$4 sm:$0xff]   ;;  %1642 = vmatprep.subr.bf16.mxu1 %v2361_v1  ;;  %v2365_v4 = vld [vmem:[%s3452_s2 + $0x24] ss:$16 sps:$4 sm:$0xff]   ;;  %v2367_v5 = vld [vmem:[%s3452_s2 + $0x2c] ss:$16 sps:$4 sm:$0xff]  }
   0x3   :  { %1391 = vmatpush1.bf16.msra.mxu0 %v2363_v2  ;;  %1643 = vmatpush1.bf16.msra.mxu1 %v2364_v3  ;;  %v2369_v6 = vld [vmem:[%s3452_s2 + $0x20] ss:$16 sps:$4 sm:$0xff]   ;;  %v2370_v7 = vld [vmem:[%s3452_s2 + $0x28] ss:$16 sps:$4 sm:$0xff]   ;;  %v2371_v8 = vld [vmem:[%s3452_s2 + $0x44] ss:$16 sps:$4 sm:$0xff]  }
   0x4   :  { %1392 = vmatprep.subr.bf16.mxu0 %v2365_v4  ;;  %1644 = vmatprep.subr.bf16.mxu1 %v2367_v5  ;;  %v2373_v9 = vld [vmem:[%s3452_s2 + $0x4c] ss:$16 sps:$4 sm:$0xff]   ;;  %v2375_v10 = vld [vmem:[%s3452_s2 + $0x40] ss:$16 sps:$4 sm:$0xff]   ;;  %v2376_v11 = vld [vmem:[%s3452_s2 + $0x48] ss:$16 sps:$4 sm:$0xff]  }
   0x5   :  { %v2377_v12 = vld [vmem:[%s3452_s2 + $0x64] ss:$16 sps:$4 sm:$0xff]   ;;  %v2379_v13 = vld [vmem:[%s3452_s2 + $0x6c] ss:$16 sps:$4 sm:$0xff]   ;;  %v2381_v14 = vld [vmem:[%s3452_s2 + $0x60] ss:$16 sps:$4 sm:$0xff]  }
   0x6   :  { %v2382_v15 = vld [vmem:[%s3452_s2 + $0x68] ss:$16 sps:$4 sm:$0xff]   ;;  %v2383_v16 = vld [vmem:[%s3452_s2 + $0x84] ss:$16 sps:$4 sm:$0xff]   ;;  %v2385_v17 = vld [vmem:[%s3452_s2 + $0x8c] ss:$16 sps:$4 sm:$0xff]  }
   0x7   :  { %1393 = vmatpush1.bf16.msra.mxu0 %v2369_v6  ;;  %1645 = vmatpush1.bf16.msra.mxu1 %v2370_v7  ;;  %v2387_v18 = vld [vmem:[%s3452_s2 + $0x80] ss:$16 sps:$4 sm:$0xff]   ;;  %v2388_v19 = vld [vmem:[%s3452_s2 + $0x88] ss:$16 sps:$4 sm:$0xff]   ;;  %v2389_v20 = vld [vmem:[%s3452_s2 + $0xa4] ss:$16 sps:$4 sm:$0xff]  }
   0x8   :  { %1394 = vmatprep.subr.bf16.mxu0 %v2371_v8  ;;  %1646 = vmatprep.subr.bf16.mxu1 %v2373_v9  ;;  %v2391_v21 = vld [vmem:[%s3452_s2 + $0xac] ss:$16 sps:$4 sm:$0xff]   ;;  %v2393_v22 = vld [vmem:[%s3452_s2 + $0xa0] ss:$16 sps:$4 sm:$0xff]   ;;  %v2394_v23 = vld [vmem:[%s3452_s2 + $0xa8] ss:$16 sps:$4 sm:$0xff]  }
   0x9   :  { %v2395_v24 = vld [vmem:[%s3452_s2 + $0xc4] ss:$16 sps:$4 sm:$0xff]   ;;  %v2397_v25 = vld [vmem:[%s3452_s2 + $0xcc] ss:$16 sps:$4 sm:$0xff]   ;;  %v2399_v26 = vld [vmem:[%s3452_s2 + $0xc0] ss:$16 sps:$4 sm:$0xff]  }
   0xa   :  { %v2400_v27 = vld [vmem:[%s3452_s2 + $0xc8] ss:$16 sps:$4 sm:$0xff]   ;;  %v2401_v28 = vld [vmem:[%s3452_s2 + $0xe4] ss:$16 sps:$4 sm:$0xff]   ;;  %v2403_v29 = vld [vmem:[%s3452_s2 + $0xec] ss:$16 sps:$4 sm:$0xff]  }
   0xb   :  { %1395 = vmatpush1.bf16.msra.mxu0 %v2375_v10  ;;  %1647 = vmatpush1.bf16.msra.mxu1 %v2376_v11  ;;  %v2405_v30 = vld [vmem:[%s3452_s2 + $0xe0] ss:$16 sps:$4 sm:$0xff]   ;;  %v2406_v31 = vld [vmem:[%s3452_s2 + $0xe8] ss:$16 sps:$4 sm:$0xff]   ;;  %v2407_v32 = vld [vmem:[%s3452_s2 + $0x104] ss:$16 sps:$4 sm:$0xff]  }
   0xc   :  { %1396 = vmatprep.subr.bf16.mxu0 %v2377_v12  ;;  %1648 = vmatprep.subr.bf16.mxu1 %v2379_v13  ;;  %v2409_v33 = vld [vmem:[%s3452_s2 + $0x10c] ss:$16 sps:$4 sm:$0xff]   ;;  %v2411_v34 = vld [vmem:[%s3452_s2 + $0x100] ss:$16 sps:$4 sm:$0xff]   ;;  %v2412_v35 = vld [vmem:[%s3452_s2 + $0x108] ss:$16 sps:$4 sm:$0xff]  }
   0xd   :  { %v2413_v36 = vld [vmem:[%s3452_s2 + $0x124] ss:$16 sps:$4 sm:$0xff]   ;;  %v2415_v37 = vld [vmem:[%s3452_s2 + $0x12c] ss:$16 sps:$4 sm:$0xff]   ;;  %v2417_v38 = vld [vmem:[%s3452_s2 + $0x120] ss:$16 sps:$4 sm:$0xff]  }
   0xe   :  { %v2418_v39 = vld [vmem:[%s3452_s2 + $0x128] ss:$16 sps:$4 sm:$0xff]   ;;  %v2419_v40 = vld [vmem:[%s3452_s2 + $0x144] ss:$16 sps:$4 sm:$0xff]   ;;  %v2421_v41 = vld [vmem:[%s3452_s2 + $0x14c] ss:$16 sps:$4 sm:$0xff]  }
   0xf   :  { %1397 = vmatpush1.bf16.msra.mxu0 %v2381_v14  ;;  %1649 = vmatpush1.bf16.msra.mxu1 %v2382_v15  ;;  %v2423_v42 = vld [vmem:[%s3452_s2 + $0x140] ss:$16 sps:$4 sm:$0xff]   ;;  %v2424_v43 = vld [vmem:[%s3452_s2 + $0x148] ss:$16 sps:$4 sm:$0xff]   ;;  %v2425_v44 = vld [vmem:[%s3452_s2 + $0x164] ss:$16 sps:$4 sm:$0xff]  }
  0x10   :  { %1398 = vmatprep.subr.bf16.mxu0 %v2383_v16  ;;  %1650 = vmatprep.subr.bf16.mxu1 %v2385_v17  ;;  %v2427_v45 = vld [vmem:[%s3452_s2 + $0x16c] ss:$16 sps:$4 sm:$0xff]   ;;  %v2429_v46 = vld [vmem:[%s3452_s2 + $0x160] ss:$16 sps:$4 sm:$0xff]   ;;  %v2430_v47 = vld [vmem:[%s3452_s2 + $0x168] ss:$16 sps:$4 sm:$0xff]  }
  0x11   :  { %v2457_v48 = vld [vmem:[%s3453_s0 + $0x4] ss:$28 sps:$4 sm:$0xff]   ;;  %v2433_v50 = vld [vmem:[%s3452_s2 + $0x18c] ss:$16 sps:$4 sm:$0xff]   ;;  %v2436_v52 = vld [vmem:[%s3452_s2 + $0x188] ss:$16 sps:$4 sm:$0xff]  }
  0x12   :  { %v2431_v49 = vld [vmem:[%s3452_s2 + $0x184] ss:$16 sps:$4 sm:$0xff]   ;;  %1422 = vmatprep.mubr.bf16.mxu0 %v2457_v48  ;;  %1674 = vmatprep.mubr.bf16.mxu1 %v2457_v48  ;;  %v2435_v51 = vld [vmem:[%s3452_s2 + $0x180] ss:$16 sps:$4 sm:$0xff]   ;;  %v2439_v54 = vld [vmem:[%s3452_s2 + $0x1ac] ss:$16 sps:$4 sm:$0xff]  }
  0x13   :  { %1399 = vmatpush1.bf16.msra.mxu0 %v2387_v18  ;;  %1651 = vmatpush1.bf16.msra.mxu1 %v2388_v19  ;;  %v2437_v53 = vld [vmem:[%s3452_s2 + $0x1a4] ss:$16 sps:$4 sm:$0xff]   ;;  %v2441_v55 = vld [vmem:[%s3452_s2 + $0x1a0] ss:$16 sps:$4 sm:$0xff]   ;;  %v2442_v56 = vld [vmem:[%s3452_s2 + $0x1a8] ss:$16 sps:$4 sm:$0xff]  }
  0x14   :  { %1400 = vmatprep.subr.bf16.mxu0 %v2389_v20  ;;  %1652 = vmatprep.subr.bf16.mxu1 %v2391_v21  ;;  %v2443_v57 = vld [vmem:[%s3452_s2 + $0x1c4] ss:$16 sps:$4 sm:$0xff]   ;;  %v2445_v58 = vld [vmem:[%s3452_s2 + $0x1cc] ss:$16 sps:$4 sm:$0xff]   ;;  %v2447_v59 = vld [vmem:[%s3452_s2 + $0x1c0] ss:$16 sps:$4 sm:$0xff]  }
  0x15   :  { %v2448_v60 = vld [vmem:[%s3452_s2 + $0x1c8] ss:$16 sps:$4 sm:$0xff]   ;;  %v2449_v61 = vld [vmem:[%s3452_s2 + $0x1e4] ss:$16 sps:$4 sm:$0xff]   ;;  %v2451_v62 = vld [vmem:[%s3452_s2 + $0x1ec] ss:$16 sps:$4 sm:$0xff]  }
  0x16   :  { %v2453_v63 = vld [vmem:[%s3452_s2 + $0x1e0] ss:$16 sps:$4 sm:$0xff]   ;;  %v2454_v0 = vld [vmem:[%s3452_s2 + $0x1e8] ss:$16 sps:$4 sm:$0xff]   ;;  %v2460_v1 = vld [vmem:[%s3452_s2 + $0x204] ss:$16 sps:$4 sm:$0xff]  }
  0x17   :  { %1401 = vmatpush1.bf16.msra.mxu0 %v2393_v22  ;;  %1653 = vmatpush1.bf16.msra.mxu1 %v2394_v23  ;;  %v2463_v2 = vld [vmem:[%s3452_s2 + $0x20c] ss:$16 sps:$4 sm:$0xff]   ;;  %v2458_v4 = vld [vmem:[%s3452_s2 + $0x200] ss:$16 sps:$4 sm:$0xff]   ;;  %v2461_v5 = vld [vmem:[%s3452_s2 + $0x208] ss:$16 sps:$4 sm:$0xff]  }
  0x18   :  { %1402 = vmatprep.subr.bf16.mxu0 %v2395_v24  ;;  %1654 = vmatprep.subr.bf16.mxu1 %v2397_v25  ;;  %v2455_v3 = vld [vmem:[%s3453_s0] ss:$28 sps:$4 sm:$0xff]   ;;  %v2466_v6 = vld [vmem:[%s3452_s2 + $0x224] ss:$16 sps:$4 sm:$0xff]   ;;  %v2467_v9 = vld [vmem:[%s3452_s2 + $0x228] ss:$16 sps:$4 sm:$0xff]  }
  0x19   :  { %v2469_v7 = vld [vmem:[%s3452_s2 + $0x22c] ss:$16 sps:$4 sm:$0xff]   ;;  %v2464_v8 = vld [vmem:[%s3452_s2 + $0x220] ss:$16 sps:$4 sm:$0xff]   ;;  %v2472_v10 = vld [vmem:[%s3452_s2 + $0x244] ss:$16 sps:$4 sm:$0xff]  }
  0x1a   :  { %v2475_v11 = vld [vmem:[%s3452_s2 + $0x24c] ss:$16 sps:$4 sm:$0xff]   ;;  %v2470_v12 = vld [vmem:[%s3452_s2 + $0x240] ss:$16 sps:$4 sm:$0xff]   ;;  %v2473_v13 = vld [vmem:[%s3452_s2 + $0x248] ss:$16 sps:$4 sm:$0xff]  }
  0x1b   :  { %1403 = vmatpush1.bf16.msra.mxu0 %v2399_v26  ;;  %1655 = vmatpush1.bf16.msra.mxu1 %v2400_v27  ;;  %v2478_v14 = vld [vmem:[%s3452_s2 + $0x264] ss:$16 sps:$4 sm:$0xff]   ;;  %v2481_v15 = vld [vmem:[%s3452_s2 + $0x26c] ss:$16 sps:$4 sm:$0xff]   ;;  %v2476_v16 = vld [vmem:[%s3452_s2 + $0x260] ss:$16 sps:$4 sm:$0xff]  }
  0x1c   :  { %1404 = vmatprep.subr.bf16.mxu0 %v2401_v28  ;;  %1656 = vmatprep.subr.bf16.mxu1 %v2403_v29  ;;  %v2479_v17 = vld [vmem:[%s3452_s2 + $0x268] ss:$16 sps:$4 sm:$0xff]   ;;  %v2484_v18 = vld [vmem:[%s3452_s2 + $0x284] ss:$16 sps:$4 sm:$0xff]   ;;  %v2487_v20 = vld [vmem:[%s3452_s2 + $0x28c] ss:$16 sps:$4 sm:$0xff]  }
  0x1d   :  { %v2530_v19 = vld [vmem:[%s3453_s0 + $0x3c] ss:$28 sps:$4 sm:$0xff]   ;;  %v2482_v21 = vld [vmem:[%s3452_s2 + $0x280] ss:$16 sps:$4 sm:$0xff]   ;;  %v2490_v24 = vld [vmem:[%s3452_s2 + $0x2a4] ss:$16 sps:$4 sm:$0xff]  }
  0x1e   :  { %v2485_v22 = vld [vmem:[%s3452_s2 + $0x288] ss:$16 sps:$4 sm:$0xff]   ;;  %v2493_v25 = vld [vmem:[%s3452_s2 + $0x2ac] ss:$16 sps:$4 sm:$0xff]   ;;  %v2488_v26 = vld [vmem:[%s3452_s2 + $0x2a0] ss:$16 sps:$4 sm:$0xff]  }
  0x1f   :  { %1405 = vmatpush1.bf16.msra.mxu0 %v2405_v30  ;;  %1657 = vmatpush1.bf16.msra.mxu1 %v2406_v31  ;;  %v2538_v23 = vld [vmem:[%s3453_s0 + $0x38] ss:$28 sps:$4 sm:$0xff]   ;;  %v2499_v30 = vld [vmem:[%s3452_s2 + $0x2cc] ss:$16 sps:$4 sm:$0xff]   ;;  %vm3400_vm3 = vmor %vm1992_vm2, %vm1991_vm1 }
  0x20   :  { %1406 = vmatprep.subr.bf16.mxu0 %v2407_v32  ;;  %1658 = vmatprep.subr.bf16.mxu1 %v2409_v33  ;;  %v2545_v27 = vld [vmem:[%s3453_s0 + $0x74] ss:$28 sps:$4 sm:$0xff]   ;;  %v2491_v28 = vld [vmem:[%s3452_s2 + $0x2a8] ss:$16 sps:$4 sm:$0xff]  }
  0x21   :  { %v2496_v29 = vld [vmem:[%s3452_s2 + $0x2c4] ss:$16 sps:$4 sm:$0xff]   ;;  %v2553_v31 = vld [vmem:[%s3453_s0 + $0x70] ss:$28 sps:$4 sm:$0xff]   ;;  %v2497_v33 = vld [vmem:[%s3452_s2 + $0x2c8] ss:$16 sps:$4 sm:$0xff]  }
  0x22   :  { %v2494_v32 = vld [vmem:[%s3452_s2 + $0x2c0] ss:$16 sps:$4 sm:$0xff]   ;;  %v2520_v48 = vld [vmem:[%s3452_s2 + $0x344] ss:$16 sps:$4 sm:$0xff]  }
  0x23   :  { %1407 = vmatpush1.bf16.msra.mxu0 %v2411_v34  ;;  %1659 = vmatpush1.bf16.msra.mxu1 %v2412_v35  ;;  %v2689_v34 = vmov 0   ;;  %v2502_v35 = vld [vmem:[%s3452_s2 + $0x2e4] ss:$16 sps:$4 sm:$0xff]  }
  0x24   :  { %1408 = vmatprep.subr.bf16.mxu0 %v2413_v36  ;;  %1660 = vmatprep.subr.bf16.mxu1 %v2415_v37  ;;  %v2505_v36 = vld [vmem:[%s3452_s2 + $0x2ec] ss:$16 sps:$4 sm:$0xff]  }
  0x25   :  { %2357 = vset.pattern.permute.xlu0 %v2689_v34  ;;  %2358 = vset.pattern.permute.xlu1 %v2689_v34  ;;  %v2562_v37 = vld [vmem:[%s3453_s0 + $0xc] ss:$28 sps:$4 sm:$0xff]  }
  0x27   :  { %1409 = vmatpush1.bf16.msra.mxu0 %v2417_v38  ;;  %1661 = vmatpush1.bf16.msra.mxu1 %v2418_v39  ;;  %v2500_v38 = vld [vmem:[%s3452_s2 + $0x2e0] ss:$16 sps:$4 sm:$0xff]   ;;  %v2503_v39 = vld [vmem:[%s3452_s2 + $0x2e8] ss:$16 sps:$4 sm:$0xff]  }
  0x28   :  { %1410 = vmatprep.subr.bf16.mxu0 %v2419_v40  ;;  %1662 = vmatprep.subr.bf16.mxu1 %v2421_v41  ;;  %v2508_v40 = vld [vmem:[%s3452_s2 + $0x304] ss:$16 sps:$4 sm:$0xff]   ;;  %v2511_v41 = vld [vmem:[%s3452_s2 + $0x30c] ss:$16 sps:$4 sm:$0xff]  }
  0x2b   :  { %1411 = vmatpush1.bf16.msra.mxu0 %v2423_v42  ;;  %1663 = vmatpush1.bf16.msra.mxu1 %v2424_v43  ;;  %v2506_v42 = vld [vmem:[%s3452_s2 + $0x300] ss:$16 sps:$4 sm:$0xff]   ;;  %v2509_v43 = vld [vmem:[%s3452_s2 + $0x308] ss:$16 sps:$4 sm:$0xff]  }
  0x2c   :  { %1412 = vmatprep.subr.bf16.mxu0 %v2425_v44  ;;  %1664 = vmatprep.subr.bf16.mxu1 %v2427_v45  ;;  %v2514_v44 = vld [vmem:[%s3452_s2 + $0x324] ss:$16 sps:$4 sm:$0xff]   ;;  %v2517_v45 = vld [vmem:[%s3452_s2 + $0x32c] ss:$16 sps:$4 sm:$0xff]  }
  0x2f   :  { %1413 = vmatpush1.bf16.msra.mxu0 %v2429_v46  ;;  %1665 = vmatpush1.bf16.msra.mxu1 %v2430_v47  ;;  %v2512_v46 = vld [vmem:[%s3452_s2 + $0x320] ss:$16 sps:$4 sm:$0xff]   ;;  %v2515_v47 = vld [vmem:[%s3452_s2 + $0x328] ss:$16 sps:$4 sm:$0xff]  }
  0x30   :  { %1414 = vmatprep.subr.bf16.mxu0 %v2431_v49  ;;  %1666 = vmatprep.subr.bf16.mxu1 %v2433_v50  ;;  %v2523_v49 = vld [vmem:[%s3452_s2 + $0x34c] ss:$16 sps:$4 sm:$0xff]   ;;  %v2518_v50 = vld [vmem:[%s3452_s2 + $0x340] ss:$16 sps:$4 sm:$0xff]  }
  0x33   :  { %1415 = vmatpush1.bf16.msra.mxu0 %v2435_v51  ;;  %1667 = vmatpush1.bf16.msra.mxu1 %v2436_v52  ;;  %v2521_v51 = vld [vmem:[%s3452_s2 + $0x348] ss:$16 sps:$4 sm:$0xff]   ;;  %v2526_v52 = vld [vmem:[%s3452_s2 + $0x364] ss:$16 sps:$4 sm:$0xff]  }
  0x34   :  { %1416 = vmatprep.subr.bf16.mxu0 %v2437_v53  ;;  %1668 = vmatprep.subr.bf16.mxu1 %v2439_v54  ;;  %v2529_v53 = vld [vmem:[%s3452_s2 + $0x36c] ss:$16 sps:$4 sm:$0xff]   ;;  %v2524_v54 = vld [vmem:[%s3452_s2 + $0x360] ss:$16 sps:$4 sm:$0xff]  }
  0x37   :  { %1417 = vmatpush1.bf16.msra.mxu0 %v2441_v55  ;;  %1669 = vmatpush1.bf16.msra.mxu1 %v2442_v56  ;;  %v2527_v55 = vld [vmem:[%s3452_s2 + $0x368] ss:$16 sps:$4 sm:$0xff]   ;;  %v2534_v56 = vld [vmem:[%s3452_s2 + $0x384] ss:$16 sps:$4 sm:$0xff]  }
  0x38   :  { %1418 = vmatprep.subr.bf16.mxu0 %v2443_v57  ;;  %1670 = vmatprep.subr.bf16.mxu1 %v2445_v58  ;;  %v2537_v57 = vld [vmem:[%s3452_s2 + $0x38c] ss:$16 sps:$4 sm:$0xff]   ;;  %v2532_v58 = vld [vmem:[%s3452_s2 + $0x380] ss:$16 sps:$4 sm:$0xff]  }
  0x3b   :  { %1419 = vmatpush1.bf16.msra.mxu0 %v2447_v59  ;;  %1671 = vmatpush1.bf16.msra.mxu1 %v2448_v60  ;;  %v2535_v59 = vld [vmem:[%s3452_s2 + $0x388] ss:$16 sps:$4 sm:$0xff]   ;;  %v2541_v60 = vld [vmem:[%s3452_s2 + $0x3a4] ss:$16 sps:$4 sm:$0xff]  }
  0x3c   :  { %1420 = vmatprep.subr.bf16.mxu0 %v2449_v61  ;;  %1672 = vmatprep.subr.bf16.mxu1 %v2451_v62  ;;  %v2544_v61 = vld [vmem:[%s3452_s2 + $0x3ac] ss:$16 sps:$4 sm:$0xff]   ;;  %v2539_v62 = vld [vmem:[%s3452_s2 + $0x3a0] ss:$16 sps:$4 sm:$0xff]  }
  0x3f   :  { %1421 = vmatpush1.bf16.msra.mxu0 %v2453_v63  ;;  %1673 = vmatpush1.bf16.msra.mxu1 %v2454_v0  ;;  %v2542_v63 = vld [vmem:[%s3452_s2 + $0x3a8] ss:$16 sps:$4 sm:$0xff]   ;;  %v2549_v0 = vld [vmem:[%s3452_s2 + $0x3c4] ss:$16 sps:$4 sm:$0xff]  }
  0x40   :  { %1453 = vmatprep.subr.bf16.mxu0 %v2460_v1  ;;  %1705 = vmatprep.subr.bf16.mxu1 %v2463_v2  ;;  %v2552_v1 = vld [vmem:[%s3452_s2 + $0x3cc] ss:$16 sps:$4 sm:$0xff]   ;;  %v2547_v2 = vld [vmem:[%s3452_s2 + $0x3c0] ss:$16 sps:$4 sm:$0xff]  }
  0x42   :  { %1423 = vmatmul.mubr.bf16.vlgmr.msra.gmra.mrb[0].mxu0 %v2455_v3  ;;  %1675 = vmatmul.mubr.bf16.vlgmr.msra.gmra.mrb[0].mxu1 %v2455_v3  ;;  %v2550_v3 = vld [vmem:[%s3452_s2 + $0x3c8] ss:$16 sps:$4 sm:$0xff]  }
  0x43   :  { %1454 = vmatpush1.bf16.msra.mxu0 %v2458_v4  ;;  %1706 = vmatpush1.bf16.msra.mxu1 %v2461_v5  ;;  %v2556_v4 = vld [vmem:[%s3452_s2 + $0x3e4] ss:$16 sps:$4 sm:$0xff]   ;;  %v2559_v5 = vld [vmem:[%s3452_s2 + $0x3ec] ss:$16 sps:$4 sm:$0xff]  }
  0x44   :  { %1455 = vmatprep.subr.bf16.mxu0 %v2466_v6  ;;  %1707 = vmatprep.subr.bf16.mxu1 %v2469_v7  ;;  %v2554_v6 = vld [vmem:[%s3452_s2 + $0x3e0] ss:$16 sps:$4 sm:$0xff]   ;;  %v2557_v7 = vld [vmem:[%s3452_s2 + $0x3e8] ss:$16 sps:$4 sm:$0xff]  }
  0x45   :  { %1432 = vmatprep.mubr.bf16.mxu0 %v2530_v19  ;;  %1684 = vmatprep.mubr.bf16.mxu1 %v2530_v19  ;;  %v2580_v19 = vld [vmem:[%s3452_s2 + $0x44c] ss:$16 sps:$4 sm:$0xff]  }
  0x47   :  { %1456 = vmatpush1.bf16.msra.mxu0 %v2464_v8  ;;  %1708 = vmatpush1.bf16.msra.mxu1 %v2467_v9  ;;  %v2565_v8 = vld [vmem:[%s3452_s2 + $0x404] ss:$16 sps:$4 sm:$0xff]   ;;  %v2568_v9 = vld [vmem:[%s3452_s2 + $0x40c] ss:$16 sps:$4 sm:$0xff]  }
  0x48   :  { %1457 = vmatprep.subr.bf16.mxu0 %v2472_v10  ;;  %1709 = vmatprep.subr.bf16.mxu1 %v2475_v11  ;;  %v2560_v10 = vld [vmem:[%s3453_s0 + $0x8] ss:$28 sps:$4 sm:$0xff]   ;;  %v2563_v11 = vld [vmem:[%s3452_s2 + $0x400] ss:$16 sps:$4 sm:$0xff]  }
  0x4a   :  { %1433 = vmatmul.mubr.bf16.gmra.mrb[4].mxu0 %v2538_v23  ;;  %1685 = vmatmul.mubr.bf16.gmra.mrb[4].mxu1 %v2538_v23  ;;  %v2583_v23 = vld [vmem:[%s3452_s2 + $0x464] ss:$16 sps:$4 sm:$0xff]  }
  0x4b   :  { %1458 = vmatpush1.bf16.msra.mxu0 %v2470_v12  ;;  %1710 = vmatpush1.bf16.msra.mxu1 %v2473_v13  ;;  %v2566_v12 = vld [vmem:[%s3452_s2 + $0x408] ss:$16 sps:$4 sm:$0xff]   ;;  %v2571_v13 = vld [vmem:[%s3452_s2 + $0x424] ss:$16 sps:$4 sm:$0xff]  }
  0x4c   :  { %1459 = vmatprep.subr.bf16.mxu0 %v2478_v14  ;;  %1711 = vmatprep.subr.bf16.mxu1 %v2481_v15  ;;  %v2574_v14 = vld [vmem:[%s3452_s2 + $0x42c] ss:$16 sps:$4 sm:$0xff]   ;;  %v2635_v15 = vld [vmem:[%s3453_s0 + $0x44] ss:$28 sps:$4 sm:$0xff]  }
  0x4d   :  { %1442 = vmatprep.mubr.bf16.mxu0 %v2545_v27  ;;  %1694 = vmatprep.mubr.bf16.mxu1 %v2545_v27  ;;  %v2584_v27 = vld [vmem:[%s3452_s2 + $0x468] ss:$16 sps:$4 sm:$0xff]  }
  0x4f   :  { %1460 = vmatpush1.bf16.msra.mxu0 %v2476_v16  ;;  %1712 = vmatpush1.bf16.msra.mxu1 %v2479_v17  ;;  %v2569_v16 = vld [vmem:[%s3452_s2 + $0x420] ss:$16 sps:$4 sm:$0xff]   ;;  %v2572_v17 = vld [vmem:[%s3452_s2 + $0x428] ss:$16 sps:$4 sm:$0xff]  }
  0x50   :  { %1461 = vmatprep.subr.bf16.mxu0 %v2484_v18  ;;  %1713 = vmatprep.subr.bf16.mxu1 %v2487_v20  ;;  %v2577_v18 = vld [vmem:[%s3452_s2 + $0x444] ss:$16 sps:$4 sm:$0xff]   ;;  %v2575_v20 = vld [vmem:[%s3452_s2 + $0x440] ss:$16 sps:$4 sm:$0xff]  }
  0x52   :  { %1443 = vmatmul.mubr.bf16.gmra.mrb[8].mxu0 %v2553_v31  ;;  %1695 = vmatmul.mubr.bf16.gmra.mrb[8].mxu1 %v2553_v31  ;;  %v2590_v31 = vld [vmem:[%s3452_s2 + $0x488] ss:$16 sps:$4 sm:$0xff]  }
  0x53   :  { %1462 = vmatpush1.bf16.msra.mxu0 %v2482_v21  ;;  %1714 = vmatpush1.bf16.msra.mxu1 %v2485_v22  ;;  %v2578_v21 = vld [vmem:[%s3452_s2 + $0x448] ss:$16 sps:$4 sm:$0xff]   ;;  %v2637_v22 = vld [vmem:[%s3453_s0 + $0x40] ss:$28 sps:$4 sm:$0xff]  }
  0x54   :  { %1463 = vmatprep.subr.bf16.mxu0 %v2490_v24  ;;  %1715 = vmatprep.subr.bf16.mxu1 %v2493_v25  ;;  %v2586_v24 = vld [vmem:[%s3452_s2 + $0x46c] ss:$16 sps:$4 sm:$0xff]  }
  0x55   :  { %1485 = vmatprep.mubr.bf16.mxu0 %v2562_v37  ;;  %1737 = vmatprep.mubr.bf16.mxu1 %v2562_v37  ;;  %v2650_v25 = vld [vmem:[%s3453_s0 + $0x7c] ss:$28 sps:$4 sm:$0xff]   ;;  %v2593_v37 = vld [vmem:[%s3452_s2 + $0x4a0] ss:$16 sps:$4 sm:$0xff]  }
  0x57   :  { %1464 = vmatpush1.bf16.msra.mxu0 %v2488_v26  ;;  %1716 = vmatpush1.bf16.msra.mxu1 %v2491_v28  ;;  %v2581_v26 = vld [vmem:[%s3452_s2 + $0x460] ss:$16 sps:$4 sm:$0xff]   ;;  %v2589_v28 = vld [vmem:[%s3452_s2 + $0x484] ss:$16 sps:$4 sm:$0xff]  }
  0x58   :  { %1465 = vmatprep.subr.bf16.mxu0 %v2496_v29  ;;  %1717 = vmatprep.subr.bf16.mxu1 %v2499_v30  ;;  %v2592_v29 = vld [vmem:[%s3452_s2 + $0x48c] ss:$16 sps:$4 sm:$0xff]   ;;  %v2587_v30 = vld [vmem:[%s3452_s2 + $0x480] ss:$16 sps:$4 sm:$0xff]  }
  0x5b   :  { %1466 = vmatpush1.bf16.msra.mxu0 %v2494_v32  ;;  %1718 = vmatpush1.bf16.msra.mxu1 %v2497_v33  ;;  %v2652_v32 = vld [vmem:[%s3453_s0 + $0x78] ss:$28 sps:$4 sm:$0xff]  }
  0x5c   :  { %1467 = vmatprep.subr.bf16.mxu0 %v2502_v35  ;;  %1719 = vmatprep.subr.bf16.mxu1 %v2505_v36  ;;  %v2595_v33 = vld [vmem:[%s3452_s2 + $0x4a4] ss:$16 sps:$4 sm:$0xff]   ;;  %v2598_v35 = vld [vmem:[%s3452_s2 + $0x4ac] ss:$16 sps:$4 sm:$0xff]  }
  0x5d   :  { %v2667_v36 = vld [vmem:[%s3453_s0 + $0x14] ss:$28 sps:$4 sm:$0xff]  }
  0x5f   :  { %1468 = vmatpush1.bf16.msra.mxu0 %v2500_v38  ;;  %1720 = vmatpush1.bf16.msra.mxu1 %v2503_v39  ;;  %v2596_v38 = vld [vmem:[%s3452_s2 + $0x4a8] ss:$16 sps:$4 sm:$0xff]   ;;  %v239_v39 = vld [vmem:[%s3454_s1] sm:$0xff] }
  0x60   :  { %1469 = vmatprep.subr.bf16.mxu0 %v2508_v40  ;;  %1721 = vmatprep.subr.bf16.mxu1 %v2511_v41  ;;  %v2601_v40 = vld [vmem:[%s3452_s2 + $0x4c4] ss:$16 sps:$4 sm:$0xff]   ;;  %v2604_v41 = vld [vmem:[%s3452_s2 + $0x4cc] ss:$16 sps:$4 sm:$0xff]  }
  0x61   :  { %247 = vperm.xlu0 %2357, %v239_v39  }
  0x63   :  { %1470 = vmatpush1.bf16.msra.mxu0 %v2506_v42  ;;  %1722 = vmatpush1.bf16.msra.mxu1 %v2509_v43  ;;  %v241_v42 = vld [vmem:[%s3454_s1 + $0x10] sm:$0xff] }
  0x64   :  { %1471 = vmatprep.subr.bf16.mxu0 %v2514_v44  ;;  %1723 = vmatprep.subr.bf16.mxu1 %v2517_v45  ;;  %v2599_v43 = vld [vmem:[%s3452_s2 + $0x4c0] ss:$16 sps:$4 sm:$0xff]   ;;  %v2602_v44 = vld [vmem:[%s3452_s2 + $0x4c8] ss:$16 sps:$4 sm:$0xff]  }
  0x65   :  { %257 = vperm.xlu1 %2358, %v241_v42   ;;  %v240_v45 = vld [vmem:[%s3454_s1 + $0x8] sm:$0xff] }
  0x66   :  { %252 = vperm.xlu0 %2357, %v240_v45  }
  0x67   :  { %1472 = vmatpush1.bf16.msra.mxu0 %v2512_v46  ;;  %1724 = vmatpush1.bf16.msra.mxu1 %v2515_v47  ;;  %v242_v46 = vld [vmem:[%s3454_s1 + $0x18] sm:$0xff]  ;;  %v2607_v47 = vld [vmem:[%s3452_s2 + $0x4e4] ss:$16 sps:$4 sm:$0xff]  }
  0x68   :  { %1473 = vmatprep.subr.bf16.mxu0 %v2520_v48  ;;  %1725 = vmatprep.subr.bf16.mxu1 %v2523_v49  ;;  %v2610_v48 = vld [vmem:[%s3452_s2 + $0x4ec] ss:$16 sps:$4 sm:$0xff]   ;;  %v2605_v49 = vld [vmem:[%s3452_s2 + $0x4e0] ss:$16 sps:$4 sm:$0xff]  }
  0x69   :  { %262 = vperm.xlu1 %2358, %v242_v46  }
  0x6b   :  { %1474 = vmatpush1.bf16.msra.mxu0 %v2518_v50  ;;  %1726 = vmatpush1.bf16.msra.mxu1 %v2521_v51  ;;  %v2608_v50 = vld [vmem:[%s3452_s2 + $0x4e8] ss:$16 sps:$4 sm:$0xff]  }
  0x6c   :  { %1475 = vmatprep.subr.bf16.mxu0 %v2526_v52  ;;  %1727 = vmatprep.subr.bf16.mxu1 %v2529_v53  ;;  %v244_v51 = vld [vmem:[%s3454_s1 + $0x28] sm:$0xff]  ;;  %v243_v52 = vld [vmem:[%s3454_s1 + $0x20] sm:$0xff] }
  0x6d   :  { %v2613_v53 = vld [vmem:[%s3452_s2 + $0x504] ss:$16 sps:$4 sm:$0xff]   ;;  %272 = vperm.xlu1 %2358, %v244_v51   ;;  %267 = vperm.xlu0 %2357, %v243_v52  }
  0x6f   :  { %1476 = vmatpush1.bf16.msra.mxu0 %v2524_v54  ;;  %1728 = vmatpush1.bf16.msra.mxu1 %v2527_v55  ;;  %v2616_v54 = vld [vmem:[%s3452_s2 + $0x50c] ss:$16 sps:$4 sm:$0xff]   ;;  %v2611_v55 = vld [vmem:[%s3452_s2 + $0x500] ss:$16 sps:$4 sm:$0xff]  }
  0x70   :  { %1477 = vmatprep.subr.bf16.mxu0 %v2534_v56  ;;  %1729 = vmatprep.subr.bf16.mxu1 %v2537_v57  ;;  %v2614_v56 = vld [vmem:[%s3452_s2 + $0x508] ss:$16 sps:$4 sm:$0xff]   ;;  %v2619_v57 = vld [vmem:[%s3452_s2 + $0x524] ss:$16 sps:$4 sm:$0xff]  }
  0x73   :  { %1478 = vmatpush1.bf16.msra.mxu0 %v2532_v58  ;;  %1730 = vmatpush1.bf16.msra.mxu1 %v2535_v59  ;;  %v2622_v58 = vld [vmem:[%s3452_s2 + $0x52c] ss:$16 sps:$4 sm:$0xff]   ;;  %v2617_v59 = vld [vmem:[%s3452_s2 + $0x520] ss:$16 sps:$4 sm:$0xff]  }
  0x74   :  { %1479 = vmatprep.subr.bf16.mxu0 %v2541_v60  ;;  %1731 = vmatprep.subr.bf16.mxu1 %v2544_v61  ;;  %v2620_v60 = vld [vmem:[%s3452_s2 + $0x528] ss:$16 sps:$4 sm:$0xff]   ;;  %v2625_v61 = vld [vmem:[%s3452_s2 + $0x544] ss:$16 sps:$4 sm:$0xff]  }
  0x77   :  { %1480 = vmatpush1.bf16.msra.mxu0 %v2539_v62  ;;  %1732 = vmatpush1.bf16.msra.mxu1 %v2542_v63  ;;  %v2628_v62 = vld [vmem:[%s3452_s2 + $0x54c] ss:$16 sps:$4 sm:$0xff]   ;;  %v2623_v63 = vld [vmem:[%s3452_s2 + $0x540] ss:$16 sps:$4 sm:$0xff]  }
  0x78   :  { %1481 = vmatprep.subr.bf16.mxu0 %v2549_v0  ;;  %1733 = vmatprep.subr.bf16.mxu1 %v2552_v1  ;;  %v2626_v0 = vld [vmem:[%s3452_s2 + $0x548] ss:$16 sps:$4 sm:$0xff]   ;;  %v2631_v1 = vld [vmem:[%s3452_s2 + $0x564] ss:$16 sps:$4 sm:$0xff]  }
  0x7b   :  { %1482 = vmatpush1.bf16.msra.mxu0 %v2547_v2  ;;  %1734 = vmatpush1.bf16.msra.mxu1 %v2550_v3  ;;  %v2634_v2 = vld [vmem:[%s3452_s2 + $0x56c] ss:$16 sps:$4 sm:$0xff]   ;;  %v2629_v3 = vld [vmem:[%s3452_s2 + $0x560] ss:$16 sps:$4 sm:$0xff]  }
  0x7c   :  { %1483 = vmatprep.subr.bf16.mxu0 %v2556_v4  ;;  %1735 = vmatprep.subr.bf16.mxu1 %v2559_v5  ;;  %v2632_v4 = vld [vmem:[%s3452_s2 + $0x568] ss:$16 sps:$4 sm:$0xff]   ;;  %v2640_v5 = vld [vmem:[%s3452_s2 + $0x584] ss:$16 sps:$4 sm:$0xff]  }
  0x7f   :  { %1484 = vmatpush1.bf16.msra.mxu0 %v2554_v6  ;;  %1736 = vmatpush1.bf16.msra.mxu1 %v2557_v7  ;;  %v2643_v6 = vld [vmem:[%s3452_s2 + $0x58c] ss:$16 sps:$4 sm:$0xff]   ;;  %v2638_v7 = vld [vmem:[%s3452_s2 + $0x580] ss:$16 sps:$4 sm:$0xff]  }
  0x80   :  { %1516 = vmatprep.subr.bf16.mxu0 %v2565_v8  ;;  %1768 = vmatprep.subr.bf16.mxu1 %v2568_v9  ;;  %v2641_v8 = vld [vmem:[%s3452_s2 + $0x588] ss:$16 sps:$4 sm:$0xff]   ;;  %v2646_v9 = vld [vmem:[%s3452_s2 + $0x5a4] ss:$16 sps:$4 sm:$0xff]  }
  0x82   :  { %1486 = vmatmul.mubr.bf16.vlgmr.msra.gmra.mrb[0].mxu0 %v2560_v10  ;;  %1738 = vmatmul.mubr.bf16.vlgmr.msra.gmra.mrb[0].mxu1 %v2560_v10  ;;  %v2649_v10 = vld [vmem:[%s3452_s2 + $0x5ac] ss:$16 sps:$4 sm:$0xff]  }
  0x83   :  { %1517 = vmatpush1.bf16.msra.mxu0 %v2563_v11  ;;  %1769 = vmatpush1.bf16.msra.mxu1 %v2566_v12  ;;  %v2644_v11 = vld [vmem:[%s3452_s2 + $0x5a0] ss:$16 sps:$4 sm:$0xff]   ;;  %v2647_v12 = vld [vmem:[%s3452_s2 + $0x5a8] ss:$16 sps:$4 sm:$0xff]  }
  0x84   :  { %1518 = vmatprep.subr.bf16.mxu0 %v2571_v13  ;;  %1770 = vmatprep.subr.bf16.mxu1 %v2574_v14  ;;  %v2655_v13 = vld [vmem:[%s3452_s2 + $0x5c4] ss:$16 sps:$4 sm:$0xff]   ;;  %v2658_v14 = vld [vmem:[%s3452_s2 + $0x5cc] ss:$16 sps:$4 sm:$0xff]  }
  0x85   :  { %1495 = vmatprep.mubr.bf16.mxu0 %v2635_v15  ;;  %1747 = vmatprep.mubr.bf16.mxu1 %v2635_v15  ;;  %v2653_v15 = vld [vmem:[%s3452_s2 + $0x5c0] ss:$16 sps:$4 sm:$0xff]  }
  0x87   :  { %1519 = vmatpush1.bf16.msra.mxu0 %v2569_v16  ;;  %1771 = vmatpush1.bf16.msra.mxu1 %v2572_v17  ;;  %v2656_v16 = vld [vmem:[%s3452_s2 + $0x5c8] ss:$16 sps:$4 sm:$0xff]   ;;  %v2661_v17 = vld [vmem:[%s3452_s2 + $0x5e4] ss:$16 sps:$4 sm:$0xff]  }
  0x88   :  { %1520 = vmatprep.subr.bf16.mxu0 %v2577_v18  ;;  %1772 = vmatprep.subr.bf16.mxu1 %v2580_v19  ;;  %v2664_v18 = vld [vmem:[%s3452_s2 + $0x5ec] ss:$16 sps:$4 sm:$0xff]   ;;  %v2659_v19 = vld [vmem:[%s3452_s2 + $0x5e0] ss:$16 sps:$4 sm:$0xff]  }
  0x8a   :  { %1496 = vmatmul.mubr.bf16.gmra.mrb[4].mxu0 %v2637_v22  ;;  %1748 = vmatmul.mubr.bf16.gmra.mrb[4].mxu1 %v2637_v22  ;;  %v2673_v22 = vld [vmem:[%s3452_s2 + $0x60c] ss:$16 sps:$4 sm:$0xff]  }
  0x8b   :  { %1521 = vmatpush1.bf16.msra.mxu0 %v2575_v20  ;;  %1773 = vmatpush1.bf16.msra.mxu1 %v2578_v21  ;;  %v2662_v20 = vld [vmem:[%s3452_s2 + $0x5e8] ss:$16 sps:$4 sm:$0xff]   ;;  %v2670_v21 = vld [vmem:[%s3452_s2 + $0x604] ss:$16 sps:$4 sm:$0xff]  }
  0x8c   :  { %1522 = vmatprep.subr.bf16.mxu0 %v2583_v23  ;;  %1774 = vmatprep.subr.bf16.mxu1 %v2586_v24  ;;  %v2665_v23 = vld [vmem:[%s3453_s0 + $0x10] ss:$28 sps:$4 sm:$0xff]  }
  0x8d   :  { %1505 = vmatprep.mubr.bf16.mxu0 %v2650_v25  ;;  %1757 = vmatprep.mubr.bf16.mxu1 %v2650_v25  ;;  %v2668_v24 = vld [vmem:[%s3452_s2 + $0x600] ss:$16 sps:$4 sm:$0xff]   ;;  %v2671_v25 = vld [vmem:[%s3452_s2 + $0x608] ss:$16 sps:$4 sm:$0xff]  }
  0x8f   :  { %1523 = vmatpush1.bf16.msra.mxu0 %v2581_v26  ;;  %1775 = vmatpush1.bf16.msra.mxu1 %v2584_v27  ;;  %v2674_v26 = vld [vmem:[%s3453_s0 + $0x4c] ss:$28 sps:$4 sm:$0xff]   ;;  %v2679_v27 = vld [vmem:[%s3452_s2 + $0x624] ss:$16 sps:$4 sm:$0xff]  }
  0x90   :  { %1524 = vmatprep.subr.bf16.mxu0 %v2589_v28  ;;  %1776 = vmatprep.subr.bf16.mxu1 %v2592_v29  ;;  %v2682_v28 = vld [vmem:[%s3452_s2 + $0x62c] ss:$16 sps:$4 sm:$0xff]   ;;  %v2677_v29 = vld [vmem:[%s3452_s2 + $0x620] ss:$16 sps:$4 sm:$0xff]  }
  0x92   :  { %1506 = vmatmul.mubr.bf16.gmra.mrb[8].mxu0 %v2652_v32  ;;  %1758 = vmatmul.mubr.bf16.gmra.mrb[8].mxu1 %v2652_v32  ;;  %v2683_v32 = vld [vmem:[%s3453_s0 + $0x84] ss:$28 sps:$4 sm:$0xff]  }
  0x93   :  { %1525 = vmatpush1.bf16.msra.mxu0 %v2587_v30  ;;  %1777 = vmatpush1.bf16.msra.mxu1 %v2590_v31  ;;  %v2680_v30 = vld [vmem:[%s3452_s2 + $0x628] ss:$16 sps:$4 sm:$0xff]  }
  0x94   :  { %1526 = vmatprep.subr.bf16.mxu0 %v2595_v33  ;;  %1778 = vmatprep.subr.bf16.mxu1 %v2598_v35  ;;  %v2676_v31 = vld [vmem:[%s3453_s0 + $0x48] ss:$28 sps:$4 sm:$0xff]   ;;  %v2685_v33 = vld [vmem:[%s3453_s0 + $0x80] ss:$28 sps:$4 sm:$0xff]   ;;  %v2686_v35 = vld [vmem:[%s3453_s0 + $0x18] ss:$28 sps:$4 sm:$0xff]  }
  0x95   :  { %1548 = vmatprep.mubr.bf16.mxu0 %v2667_v36  ;;  %1800 = vmatprep.mubr.bf16.mxu1 %v2667_v36  ;;  %v2687_v36 = vld [vmem:[%s3453_s0 + $0x50] ss:$28 sps:$4 sm:$0xff]  }
  0x97   :  { %1527 = vmatpush1.bf16.msra.mxu0 %v2593_v37  ;;  %1779 = vmatpush1.bf16.msra.mxu1 %v2596_v38  ;;  %v2688_v37 = vld [vmem:[%s3453_s0 + $0x88] ss:$28 sps:$4 sm:$0xff]  }
  0x98   :  { %1528 = vmatprep.subr.bf16.mxu0 %v2601_v40  ;;  %1780 = vmatprep.subr.bf16.mxu1 %v2604_v41 }
  0x9b   :  { %1529 = vmatpush1.bf16.msra.mxu0 %v2599_v43  ;;  %1781 = vmatpush1.bf16.msra.mxu1 %v2602_v44 }
  0x9c   :  { %1530 = vmatprep.subr.bf16.mxu0 %v2607_v47  ;;  %1782 = vmatprep.subr.bf16.mxu1 %v2610_v48 }
  0x9f   :  { %1531 = vmatpush1.bf16.msra.mxu0 %v2605_v49  ;;  %1783 = vmatpush1.bf16.msra.mxu1 %v2608_v50 }
  0xa0   :  { %1532 = vmatprep.subr.bf16.mxu0 %v2613_v53  ;;  %1784 = vmatprep.subr.bf16.mxu1 %v2616_v54 }
  0xa3   :  { %1533 = vmatpush1.bf16.msra.mxu0 %v2611_v55  ;;  %1785 = vmatpush1.bf16.msra.mxu1 %v2614_v56 }
  0xa4   :  { %1534 = vmatprep.subr.bf16.mxu0 %v2619_v57  ;;  %1786 = vmatprep.subr.bf16.mxu1 %v2622_v58 }
  0xa7   :  { %1535 = vmatpush1.bf16.msra.mxu0 %v2617_v59  ;;  %1787 = vmatpush1.bf16.msra.mxu1 %v2620_v60 }
  0xa8   :  { %1536 = vmatprep.subr.bf16.mxu0 %v2625_v61  ;;  %1788 = vmatprep.subr.bf16.mxu1 %v2628_v62 }
  0xab   :  { %1537 = vmatpush1.bf16.msra.mxu0 %v2623_v63  ;;  %1789 = vmatpush1.bf16.msra.mxu1 %v2626_v0 }
  0xac   :  { %1538 = vmatprep.subr.bf16.mxu0 %v2631_v1  ;;  %1790 = vmatprep.subr.bf16.mxu1 %v2634_v2 }
  0xaf   :  { %1539 = vmatpush1.bf16.msra.mxu0 %v2629_v3  ;;  %1791 = vmatpush1.bf16.msra.mxu1 %v2632_v4 }
  0xb0   :  { %1540 = vmatprep.subr.bf16.mxu0 %v2640_v5  ;;  %1792 = vmatprep.subr.bf16.mxu1 %v2643_v6 }
  0xb3   :  { %1541 = vmatpush1.bf16.msra.mxu0 %v2638_v7  ;;  %1793 = vmatpush1.bf16.msra.mxu1 %v2641_v8 }
  0xb4   :  { %1542 = vmatprep.subr.bf16.mxu0 %v2646_v9  ;;  %1794 = vmatprep.subr.bf16.mxu1 %v2649_v10 }
  0xb7   :  { %1543 = vmatpush1.bf16.msra.mxu0 %v2644_v11  ;;  %1795 = vmatpush1.bf16.msra.mxu1 %v2647_v12 }
  0xb8   :  { %1544 = vmatprep.subr.bf16.mxu0 %v2655_v13  ;;  %1796 = vmatprep.subr.bf16.mxu1 %v2658_v14 }
  0xbb   :  { %1545 = vmatpush1.bf16.msra.mxu0 %v2653_v15  ;;  %1797 = vmatpush1.bf16.msra.mxu1 %v2656_v16 }
  0xbc   :  { %1546 = vmatprep.subr.bf16.mxu0 %v2661_v17  ;;  %1798 = vmatprep.subr.bf16.mxu1 %v2664_v18 }
  0xbf   :  { %1547 = vmatpush1.bf16.msra.mxu0 %v2659_v19  ;;  %1799 = vmatpush1.bf16.msra.mxu1 %v2662_v20 }
  0xc0   :  { %1579 = vmatprep.subr.bf16.mxu0 %v2670_v21  ;;  %1831 = vmatprep.subr.bf16.mxu1 %v2673_v22 }
  0xc2   :  { %1549 = vmatmul.mubr.bf16.vlgmr.msra.gmra.mrb[0].mxu0 %v2665_v23  ;;  %1801 = vmatmul.mubr.bf16.vlgmr.msra.gmra.mrb[0].mxu1 %v2665_v23 }
  0xc3   :  { %1580 = vmatpush1.bf16.msra.mxu0 %v2668_v24  ;;  %1832 = vmatpush1.bf16.msra.mxu1 %v2671_v25 }
  0xc4   :  { %1558 = vmatprep.mubr.bf16.mxu0 %v2674_v26  ;;  %1810 = vmatprep.mubr.bf16.mxu1 %v2674_v26 }
  0xc5   :  { %1581 = vmatprep.subr.bf16.mxu0 %v2679_v27  ;;  %1833 = vmatprep.subr.bf16.mxu1 %v2682_v28 }
  0xc7   :  { %1582 = vmatpush1.bf16.msra.mxu0 %v2677_v29  ;;  %1834 = vmatpush1.bf16.msra.mxu1 %v2680_v30 }
  0xca   :  { %1559 = vmatmul.mubr.bf16.gmra.mrb[4].mxu0 %v2676_v31  ;;  %1811 = vmatmul.mubr.bf16.gmra.mrb[4].mxu1 %v2676_v31 }
  0xcb   :  { %1568 = vmatprep.mubr.bf16.mxu0 %v2683_v32  ;;  %1820 = vmatprep.mubr.bf16.mxu1 %v2683_v32 }
  0xd2   :  { %1569 = vmatmul.mubr.bf16.gmra.mrb[8].mxu0 %v2685_v33  ;;  %1821 = vmatmul.mubr.bf16.gmra.mrb[8].mxu1 %v2685_v33 }
  0xd3   :  { %1611 = vmatprep.mubr.bf16.mxu0 %v2689_v34  ;;  %1863 = vmatprep.mubr.bf16.mxu1 %v2689_v34 }
  0xda   :  { %2230 = vmatmul.mubr.msk.bf16.vlgmr.msra.gmra.mrb[0].mxu0 %vm1380_vm0, %v2686_v35  ;;  %2233 = vmatmul.mubr.msk.bf16.vlgmr.msra.gmra.mrb[0].mxu1 %vm1380_vm0, %v2686_v35 }
  0xdb   :  { %1621 = vmatprep.mubr.bf16.mxu0 %v2689_v34  ;;  %1873 = vmatprep.mubr.bf16.mxu1 %v2689_v34 }
  0xe0   :  { %v248_v38 = vpop.permute.xlu0 %247 }
  0xe2   :  { %2231 = vmatmul.mubr.msk.bf16.gmra.mrb[4].mxu0 %vm1380_vm0, %v2687_v36  ;;  %2234 = vmatmul.mubr.msk.bf16.gmra.mrb[4].mxu1 %vm1380_vm0, %v2687_v36 }
  0xe3   :  { %1631 = vmatprep.mubr.bf16.mxu0 %v2689_v34  ;;  %1883 = vmatprep.mubr.bf16.mxu1 %v2689_v34 }
  0xe4   :  { %v258_v40 = vpop.permute.xlu1 %257 }
  0xe5   :  { %v253_v39 = vpop.permute.xlu0 %252 }
  0xe8   :  { %v263_v3 = vpop.permute.xlu1 %262 }
  0xea   :  { %2232 = vmatmul.mubr.msk.bf16.gmra.mrb[8].mxu0 %vm1380_vm0, %v2688_v37  ;;  %2235 = vmatmul.mubr.msk.bf16.gmra.mrb[8].mxu1 %vm1380_vm0, %v2688_v37 }
  0xec   :  { %v273_v32 = vpop.permute.xlu1 %272  ;;  %v268_v33 = vpop.permute.xlu0 %267 }
 0x1ad   :  { %v1613_v41 = vpop.f32.mrb[0].mxu0  ;;  %v1865_v42 = vpop.f32.mrb[0].mxu1 }
 0x1ae   :  { %v2260_v43 = vadd.f32 %v1613_v41, %v248_v38  ;;  %v2272_v44 = vadd.f32 %v1865_v42, %v248_v38  ;;  %v1615_v45 = vpop.f32.mrb[1].mxu0  ;;  %v1867_v46 = vpop.f32.mrb[1].mxu1 }
 0x1af   :  { %v2261_v47 = vadd.f32 %v1615_v45, %v248_v38  ;;  %v2273_v48 = vadd.f32 %v1867_v46, %v248_v38  ;;  %v1617_v34 = vpop.f32.mrb[2].mxu0  ;;  %v1869_v49 = vpop.f32.mrb[2].mxu1 }
 0x1b0   :  { %v1894_v50 = vmax.f32 %v2260_v43, 0.0  ;;  %v1896_v51 = vmax.f32 %v2272_v44, 0.0  ;;  %v2262_v52 = vadd.f32 %v1617_v34, %v253_v39  ;;  %v2274_v53 = vadd.f32 %v1869_v49, %v253_v39  ;;  %v1619_v54 = vpop.f32.mrb[3].mxu0  ;;  %v1871_v55 = vpop.f32.mrb[3].mxu1 }
 0x1b1   :  { %v1895_v56 = vmax.f32 %v2261_v47, 0.0  ;;  %v1897_v57 = vmax.f32 %v2273_v48, 0.0  ;;  %v2263_v58 = vadd.f32 %v1619_v54, %v253_v39  ;;  %v2275_v59 = vadd.f32 %v1871_v55, %v253_v39 }
 0x1b2   :  { %v1898_v61 = vmax.f32 %v2262_v52, 0.0  ;;  %v1900_v62 = vmax.f32 %v2274_v53, 0.0 }
 0x1b3   :  { %v2248_v63 = vpack.c.bf16 %v1895_v56, %v1894_v50  ;;  %v2249_v0 = vpack.c.bf16 %v1897_v57, %v1896_v51  ;;  %v1899_v1 = vmax.f32 %v2263_v58, 0.0  ;;  %v1901_v2 = vmax.f32 %v2275_v59, 0.0 }
 0x1b5   :  { %1990 = vst [vmem:[%s3455_s3] sm:$0xff] %v2248_v63  ;;  %1994 = vst.msk [vmem:[%s3455_s3 + $0x8] sm:$0xff] %vm3400_vm3, %v2249_v0  ;;  %v2250_v4 = vpack.c.bf16 %v1899_v1, %v1898_v61  ;;  %v2251_v5 = vpack.c.bf16 %v1901_v2, %v1900_v62  ;;  %v1623_v6 = vpop.f32.mrb[4].mxu0  ;;  %v1875_v7 = vpop.f32.mrb[4].mxu1 }
 0x1b6   :  { %v2264_v8 = vadd.f32 %v1623_v6, %v258_v40  ;;  %v2276_v9 = vadd.f32 %v1875_v7, %v258_v40  ;;  %v1625_v10 = vpop.f32.mrb[5].mxu0  ;;  %v1877_v11 = vpop.f32.mrb[5].mxu1 }
 0x1b7   :  { %1995 = vst [vmem:[%s3455_s3 + $0x10] sm:$0xff] %v2250_v4  ;;  %1996 = vst.msk [vmem:[%s3455_s3 + $0x18] sm:$0xff] %vm3400_vm3, %v2251_v5  ;;  %v2265_v12 = vadd.f32 %v1625_v10, %v258_v40  ;;  %v2277_v13 = vadd.f32 %v1877_v11, %v258_v40  ;;  %v1627_v14 = vpop.f32.mrb[6].mxu0  ;;  %v1879_v15 = vpop.f32.mrb[6].mxu1 }
 0x1b8   :  { %v1902_v16 = vmax.f32 %v2264_v8, 0.0  ;;  %v1904_v17 = vmax.f32 %v2276_v9, 0.0  ;;  %v2266_v18 = vadd.f32 %v1627_v14, %v263_v3  ;;  %v2278_v19 = vadd.f32 %v1879_v15, %v263_v3  ;;  %v1629_v20 = vpop.f32.mrb[7].mxu0  ;;  %v1881_v21 = vpop.f32.mrb[7].mxu1 }
 0x1b9   :  { %v1903_v22 = vmax.f32 %v2265_v12, 0.0  ;;  %v1905_v23 = vmax.f32 %v2277_v13, 0.0  ;;  %v2267_v24 = vadd.f32 %v1629_v20, %v263_v3  ;;  %v2279_v25 = vadd.f32 %v1881_v21, %v263_v3 }
 0x1ba   :  { %v1906_v26 = vmax.f32 %v2266_v18, 0.0  ;;  %v1908_v27 = vmax.f32 %v2278_v19, 0.0 }
 0x1bb   :  { %v2252_v28 = vpack.c.bf16 %v1903_v22, %v1902_v16  ;;  %v2253_v29 = vpack.c.bf16 %v1905_v23, %v1904_v17  ;;  %v1907_v30 = vmax.f32 %v2267_v24, 0.0  ;;  %v1909_v31 = vmax.f32 %v2279_v25, 0.0 }
 0x1bd   :  { %1997 = vst [vmem:[%s3455_s3 + $0x20] sm:$0xff] %v2252_v28  ;;  %1998 = vst.msk [vmem:[%s3455_s3 + $0x28] sm:$0xff] %vm3400_vm3, %v2253_v29  ;;  %v2254_v35 = vpack.c.bf16 %v1907_v30, %v1906_v26  ;;  %v2255_v36 = vpack.c.bf16 %v1909_v31, %v1908_v27  ;;  %v1633_v37 = vpop.f32.mrb[8].mxu0  ;;  %v1885_v38 = vpop.f32.mrb[8].mxu1 }
 0x1be   :  { %v2268_v39 = vadd.f32 %v1633_v37, %v268_v33  ;;  %v2280_v40 = vadd.f32 %v1885_v38, %v268_v33  ;;  %v1635_v41 = vpop.f32.mrb[9].mxu0  ;;  %v1887_v42 = vpop.f32.mrb[9].mxu1 }
 0x1bf   :  { %1999 = vst [vmem:[%s3455_s3 + $0x30] sm:$0xff] %v2254_v35  ;;  %2000 = vst.msk [vmem:[%s3455_s3 + $0x38] sm:$0xff] %vm3400_vm3, %v2255_v36  ;;  %v2269_v43 = vadd.f32 %v1635_v41, %v268_v33  ;;  %v2281_v44 = vadd.f32 %v1887_v42, %v268_v33  ;;  %v1637_v45 = vpop.f32.mrb[10].mxu0  ;;  %v1889_v46 = vpop.f32.mrb[10].mxu1 }
 0x1c0   :  { %v1910_v47 = vmax.f32 %v2268_v39, 0.0  ;;  %v1912_v48 = vmax.f32 %v2280_v40, 0.0  ;;  %v2270_v34 = vadd.f32 %v1637_v45, %v273_v32  ;;  %v2282_v49 = vadd.f32 %v1889_v46, %v273_v32  ;;  %v1639_v50 = vpop.f32.mrb[11].mxu0  ;;  %v1891_v51 = vpop.f32.mrb[11].mxu1 }
 0x1c1   :  { %v1911_v52 = vmax.f32 %v2269_v43, 0.0  ;;  %v1913_v53 = vmax.f32 %v2281_v44, 0.0  ;;  %v2271_v54 = vadd.f32 %v1639_v50, %v273_v32  ;;  %v2283_v55 = vadd.f32 %v1891_v51, %v273_v32 }
 0x1c2   :  { %v1914_v56 = vmax.f32 %v2270_v34, 0.0  ;;  %v1916_v57 = vmax.f32 %v2282_v49, 0.0 }
 0x1c3   :  { %v2256_v58 = vpack.c.bf16 %v1911_v52, %v1910_v47  ;;  %v2257_v59 = vpack.c.bf16 %v1913_v53, %v1912_v48  ;;  %v1915_v61 = vmax.f32 %v2271_v54, 0.0  ;;  %v1917_v62 = vmax.f32 %v2283_v55, 0.0 }
 0x1c5   :  { %2001 = vst [vmem:[%s3455_s3 + $0x40] sm:$0xff] %v2256_v58  ;;  %2002 = vst.msk [vmem:[%s3455_s3 + $0x48] sm:$0xff] %vm3400_vm3, %v2257_v59  ;;  %v2258_v63 = vpack.c.bf16 %v1915_v61, %v1914_v56  ;;  %v2259_v0 = vpack.c.bf16 %v1917_v62, %v1916_v57 }
 0x1c7   :  { %2003 = vst [vmem:[%s3455_s3 + $0x50] sm:$0xff] %v2258_v63  ;;  %2004 = vst.msk [vmem:[%s3455_s3 + $0x58] sm:$0xff] %vm3400_vm3, %v2259_v0 }

// kernel: cnn_deep_forward.9
= control target key start
LH: loop header
LB: loop body
LE: loop exit
PB: predicated region body
PF: predicated region fallthrough
CT: control target
= control target key end

     0   :  { %vm59_vm0 = vcmask 797696   ;;  %s191_s0 = inlined_call_operand.vmem [shape: bf16[48,98], index: 0, kind: input, shape index: {}]   ;;  %s192_s1 = inlined_call_operand.vmem [shape: bf16[48,98], index: 1, kind: input, shape index: {}]   ;;  %s193_s2 = inlined_call_operand.vmem [shape: bf16[48,98], index: 2, kind: input, shape index: {}]   ;;  %s194_s3 = inlined_call_operand.vmem [shape: bf16[48,98], index: 3, kind: input, shape index: {}]   ;;  %s195_s4 = inlined_call_operand.vmem [shape: bf16[48,98], index: 4, kind: output, shape index: {}]  }
   0x1   :  { %v17_v0 = vld [vmem:[%s191_s0] sm:$0xf]  ;;  %v18_v5 = vld [vmem:[%s191_s0 + $0x4] sm:$0xf]  ;;  %v19_v11 = vld [vmem:[%s191_s0 + $0x8] sm:$0xf] }
   0x2   :  { %v23_v1 = vld [vmem:[%s192_s1] sm:$0xf]  ;;  %v24_v6 = vld [vmem:[%s192_s1 + $0x4] sm:$0xf]  ;;  %v25_v13 = vld [vmem:[%s192_s1 + $0x8] sm:$0xf] }
   0x3   :  { %v35_v2 = vld [vmem:[%s193_s2] sm:$0xf]  ;;  %v29_v3 = vmax.bf16 %v23_v1, %v17_v0  ;;  %v30_v8 = vmax.bf16 %v24_v6, %v18_v5  ;;  %v36_v9 = vld [vmem:[%s193_s2 + $0x4] sm:$0xf]  ;;  %v37_v14 = vld [vmem:[%s193_s2 + $0x8] sm:$0xf]  ;;  %v31_v17 = vmax.bf16 %v25_v13, %v19_v11 }
   0x4   :  { %v41_v4 = vld [vmem:[%s194_s3] sm:$0xf]  ;;  %v42_v10 = vld [vmem:[%s194_s3 + $0x4] sm:$0xf]  ;;  %v43_v15 = vld [vmem:[%s194_s3 + $0x8] sm:$0xf] }
   0x5   :  { %v47_v7 = vmax.bf16 %v41_v4, %v35_v2  ;;  %v48_v12 = vmax.bf16 %v42_v10, %v36_v9  ;;  %v49_v18 = vmax.bf16 %v43_v15, %v37_v14  ;;  %v20_v19 = vld [vmem:[%s191_s0 + $0xc] sm:$0xf]  ;;  %v21_v25 = vld [vmem:[%s191_s0 + $0x10] sm:$0xf]  ;;  %v22_v32 = vld [vmem:[%s191_s0 + $0x14] sm:$0xf] }
   0x6   :  { %v26_v20 = vld [vmem:[%s192_s1 + $0xc] sm:$0xf]  ;;  %v27_v26 = vld [vmem:[%s192_s1 + $0x10] sm:$0xf]  ;;  %v28_v34 = vld [vmem:[%s192_s1 + $0x14] sm:$0xf] }
   0x7   :  { %v53_v16 = vmax.bf16 %v47_v7, %v29_v3  ;;  %v38_v21 = vld [vmem:[%s193_s2 + $0xc] sm:$0xf]  ;;  %v54_v22 = vmax.bf16 %v48_v12, %v30_v8  ;;  %v32_v23 = vmax.bf16 %v26_v20, %v20_v19  ;;  %v55_v27 = vmax.bf16 %v49_v18, %v31_v17  ;;  %v39_v30 = vld [vmem:[%s193_s2 + $0x10] sm:$0xf]  ;;  %v40_v35 = vld [vmem:[%s193_s2 + $0x14] sm:$0xf] }
   0x8   :  { %v44_v24 = vld [vmem:[%s194_s3 + $0xc] sm:$0xf]  ;;  %v33_v29 = vmax.bf16 %v27_v26, %v21_v25  ;;  %v45_v31 = vld [vmem:[%s194_s3 + $0x10] sm:$0xf]  ;;  %v46_v36 = vld [vmem:[%s194_s3 + $0x14] sm:$0xf]  ;;  %v34_v38 = vmax.bf16 %v28_v34, %v22_v32 }
   0x9   :  { %60 = vst.msk [vmem:[%s195_s4] sm:$0xf] %vm59_vm0, %v53_v16  ;;  %v50_v28 = vmax.bf16 %v44_v24, %v38_v21  ;;  %61 = vst.msk [vmem:[%s195_s4 + $0x4] sm:$0xf] %vm59_vm0, %v54_v22  ;;  %v51_v33 = vmax.bf16 %v45_v31, %v39_v30  ;;  %v52_v39 = vmax.bf16 %v46_v36, %v40_v35 }
   0xa   :  { %62 = vst.msk [vmem:[%s195_s4 + $0x8] sm:$0xf] %vm59_vm0, %v55_v27 }
   0xb   :  { %v56_v37 = vmax.bf16 %v50_v28, %v32_v23  ;;  %v57_v40 = vmax.bf16 %v51_v33, %v33_v29  ;;  %v58_v41 = vmax.bf16 %v52_v39, %v34_v38 }
   0xd   :  { %63 = vst.msk [vmem:[%s195_s4 + $0xc] sm:$0xf] %vm59_vm0, %v56_v37  ;;  %64 = vst.msk [vmem:[%s195_s4 + $0x10] sm:$0xf] %vm59_vm0, %v57_v40 }
   0xe   :  { %65 = vst.msk [vmem:[%s195_s4 + $0x14] sm:$0xf] %vm59_vm0, %v58_v41 }

// kernel: cnn_deep_forward.11
= control target key start
LH: loop header
LB: loop body
LE: loop exit
PB: predicated region body
PF: predicated region fallthrough
CT: control target
= control target key end

     0   :  { %v669_v1 = vmov 0   ;;  %vm386_vm0 = vcmask 64512   ;;  %vm390_vm1 = vcmask 1043456   ;;  %vm517_vm2 = vcmask 15360   ;;  %s853_s2 = inlined_call_operand.vmem [shape: bf16[648,2], index: 2, kind: input, shape index: {}]   ;;  %s854_s0 = inlined_call_operand.vmem [shape: bf16[10,648], index: 0, kind: input, shape index: {}]   ;;  %s855_s1 = inlined_call_operand.vmem [shape: f32[10,1], index: 1, kind: input, shape index: {}]   ;;  %s856_s3 = inlined_call_operand.vmem [shape: f32[10,2], index: 3, kind: output, shape index: {}]  }
   0x1   :  { %v619_v0 = vld [vmem:[%s853_s2 + $0x40] sm:$0xff]   ;;  %476 = vmatprep.subr.bf16.mxu0 %v669_v1  ;;  %618 = vset.pattern.permute.xlu0 %v669_v1  ;;  %v621_v3 = vld [vmem:[%s853_s2 + $0x48] sm:$0xff]   ;;  %v623_v5 = vld [vmem:[%s853_s2 + $0x50] sm:$0xff]   ;;  %vm519_vm3 = vcmask 9216  }
   0x2   :  { %v620_v2 = vld [vmem:[%s853_s2] sm:$0xff]   ;;  %573 = vmatprep.subr.bf16.mxu1 %v619_v0  ;;  %v622_v4 = vld [vmem:[%s853_s2 + $0x8] sm:$0xff]   ;;  %v624_v6 = vld [vmem:[%s853_s2 + $0x10] sm:$0xff]  }
   0x3   :  { %574 = vmatpush3.bf16.msra.mxu1 %v620_v2  ;;  %v625_v7 = vld [vmem:[%s853_s2 + $0x58] sm:$0xff]   ;;  %v627_v9 = vld [vmem:[%s853_s2 + $0x60] sm:$0xff]   ;;  %v629_v11 = vld [vmem:[%s853_s2 + $0x68] sm:$0xff]  }
   0x4   :  { %575 = vmatprep.subr.bf16.mxu1 %v621_v3  ;;  %v626_v8 = vld [vmem:[%s853_s2 + $0x18] sm:$0xff]   ;;  %v628_v10 = vld [vmem:[%s853_s2 + $0x20] sm:$0xff]   ;;  %v630_v14 = vld [vmem:[%s853_s2 + $0x28] sm:$0xff]  }
   0x5   :  { %v637_v12 = vld [vmem:[%s854_s0 + $0x4] ss:$24 sps:$4 sm:$0x1f]   ;;  %v631_v15 = vld [vmem:[%s853_s2 + $0x70] sm:$0xff]   ;;  %v641_v16 = vld [vmem:[%s853_s2 + $0x108] sm:$0xff]  }
   0x6   :  { %v638_v13 = vld [vmem:[%s853_s2 + $0x100] sm:$0xff]   ;;  %426 = vmatprep.mubr.bf16.mxu1 %v637_v12  ;;  %v632_v17 = vld [vmem:[%s853_s2 + $0x30] sm:$0xff]   ;;  %v633_v18 = vld [vmem:[%s853_s2 + $0x78] sm:$0xff]  }
   0x7   :  { %576 = vmatpush3.bf16.msra.mxu1 %v622_v4  ;;  %477 = vmatpush1.bf16.msra.mxu0 %v638_v13  ;;  %v644_v19 = vld [vmem:[%s853_s2 + $0x110] sm:$0xff]   ;;  %v634_v20 = vld [vmem:[%s853_s2 + $0x38] sm:$0xff]   ;;  %v639_v21 = vld [vmem:[%s853_s2 + $0xc0] sm:$0xff]  }
   0x8   :  { %577 = vmatprep.subr.bf16.mxu1 %v623_v5  ;;  %478 = vmatprep.subr.bf16.mxu0 %v669_v1  ;;  %v635_v22 = vld [vmem:[%s854_s0] ss:$24 sps:$4 sm:$0x1f]   ;;  %v642_v25 = vld [vmem:[%s853_s2 + $0xc8] sm:$0xff]   ;;  %v645_v28 = vld [vmem:[%s853_s2 + $0xd0] sm:$0xff]  }
   0x9   :  { %v647_v23 = vld [vmem:[%s853_s2 + $0x118] sm:$0xff]   ;;  %v640_v24 = vld [vmem:[%s853_s2 + $0x80] sm:$0xff]   ;;  %v643_v27 = vld [vmem:[%s853_s2 + $0x88] sm:$0xff]  }
   0xa   :  { %v650_v26 = vld [vmem:[%s853_s2 + $0x120] sm:$0xff]   ;;  %v653_v29 = vld [vmem:[%s853_s2 + $0x128] sm:$0xff]   ;;  %v646_v30 = vld [vmem:[%s853_s2 + $0x90] sm:$0xff]  }
   0xb   :  { %578 = vmatpush3.bf16.msra.mxu1 %v624_v6  ;;  %479 = vmatpush1.bf16.msra.mxu0 %v641_v16  ;;  %v648_v31 = vld [vmem:[%s853_s2 + $0xd8] sm:$0xff]   ;;  %v656_v32 = vld [vmem:[%s853_s2 + $0x130] sm:$0xff]   ;;  %v664_v34 = vld [vmem:[%s854_s0 + $0xc] ss:$24 sps:$4 sm:$0x1f]  }
   0xc   :  { %579 = vmatprep.subr.bf16.mxu1 %v625_v7  ;;  %480 = vmatprep.subr.bf16.mxu0 %v669_v1  ;;  %v649_v33 = vld [vmem:[%s853_s2 + $0x98] sm:$0xff]   ;;  %v651_v35 = vld [vmem:[%s853_s2 + $0xe0] sm:$0xff]   ;;  %v668_v39 = vld [vmem:[%s854_s0 + $0x14] ss:$24 sps:$4 sm:$0x1f]  }
   0xd   :  { %v659_v36 = vld [vmem:[%s853_s2 + $0x138] sm:$0xff]   ;;  %v102_v37 = vld [vmem:[%s855_s1] sm:$0xff]  ;;  %572 = vmatprep.mubr.msk.bf16.mxu0 %vm386_vm0, %v668_v39  ;;  %v103_v41 = vld [vmem:[%s855_s1 + $0x8] sm:$0x3] }
   0xe   :  { %v665_v38 = vld [vmem:[%s853_s2 + $0x140] ss:$0 sps:$4 sm:$0xff]   ;;  %106 = vperm.xlu0 %618, %v102_v37   ;;  %v654_v42 = vld [vmem:[%s853_s2 + $0xe8] sm:$0xff]   ;;  %v657_v46 = vld [vmem:[%s853_s2 + $0xf0] sm:$0xff]  }
   0xf   :  { %580 = vmatpush3.bf16.msra.mxu1 %v626_v8  ;;  %481 = vmatpush1.bf16.msra.mxu0 %v644_v19  ;;  %v652_v40 = vld [vmem:[%s853_s2 + $0xa0] sm:$0xff]   ;;  %v392_v43 = vsel %vm390_vm1, %v665_v38, 0  ;;  %v655_v44 = vld [vmem:[%s853_s2 + $0xa8] sm:$0xff]   ;;  %v658_v47 = vld [vmem:[%s853_s2 + $0xb0] sm:$0xff]  }
  0x10   :  { %581 = vmatprep.subr.bf16.mxu1 %v627_v9  ;;  %482 = vmatprep.subr.bf16.mxu0 %v669_v1  ;;  %v666_v45 = vld [vmem:[%s854_s0 + $0x10] ss:$24 sps:$4 sm:$0x1f]   ;;  %v660_v48 = vld [vmem:[%s853_s2 + $0xf8] sm:$0xff]  }
  0x11   :  { %v661_v49 = vld [vmem:[%s853_s2 + $0xb8] sm:$0xff]   ;;  %v662_v50 = vld [vmem:[%s854_s0 + $0x8] ss:$24 sps:$4 sm:$0x1f]  }
  0x12   :  { %111 = vperm.xlu0 %618, %v103_v41  }
  0x13   :  { %582 = vmatpush3.bf16.msra.mxu1 %v628_v10  ;;  %483 = vmatpush1.bf16.msra.mxu0 %v647_v23 }
  0x14   :  { %583 = vmatprep.subr.bf16.mxu1 %v629_v11  ;;  %484 = vmatprep.subr.bf16.mxu0 %v669_v1 }
  0x17   :  { %584 = vmatpush3.bf16.msra.mxu1 %v630_v14  ;;  %485 = vmatpush1.bf16.msra.mxu0 %v650_v26 }
  0x18   :  { %585 = vmatprep.subr.bf16.mxu1 %v631_v15  ;;  %486 = vmatprep.subr.bf16.mxu0 %v669_v1 }
  0x1b   :  { %586 = vmatpush3.bf16.msra.mxu1 %v632_v17  ;;  %487 = vmatpush1.bf16.msra.mxu0 %v653_v29 }
  0x1c   :  { %587 = vmatprep.subr.bf16.mxu1 %v633_v18  ;;  %488 = vmatprep.subr.bf16.mxu0 %v669_v1 }
  0x1f   :  { %588 = vmatpush3.bf16.msra.mxu1 %v634_v20  ;;  %489 = vmatpush1.bf16.msra.mxu0 %v656_v32 }
  0x20   :  { %595 = vmatprep.subr.bf16.mxu1 %v639_v21  ;;  %490 = vmatprep.subr.bf16.mxu0 %v669_v1 }
  0x22   :  { %427 = vmatmul.mubr.bf16.vlgmr.msra.gmra.mrb[0].mxu1 %v635_v22 }
  0x23   :  { %596 = vmatpush3.bf16.msra.mxu1 %v640_v24  ;;  %467 = vmatprep.mubr.bf16.mxu1 %v664_v34 }
  0x24   :  { %597 = vmatprep.subr.bf16.mxu1 %v642_v25  ;;  %491 = vmatpush1.bf16.msra.mxu0 %v659_v36 }
  0x25   :  { %492 = vmatprep.subr.bf16.mxu0 %v669_v1 }
  0x27   :  { %598 = vmatpush3.bf16.msra.mxu1 %v643_v27 }
  0x28   :  { %599 = vmatprep.subr.bf16.mxu1 %v645_v28  ;;  %493 = vmatpush1.bf16.msra.mxu0 %v392_v43 }
  0x2b   :  { %600 = vmatpush3.bf16.msra.mxu1 %v646_v30  ;;  %509 = vmatmul.mubr.bf16.vlgmr.msra.gmra.mrb[0].mxu0 %v666_v45 }
  0x2c   :  { %601 = vmatprep.subr.bf16.mxu1 %v648_v31 }
  0x2f   :  { %602 = vmatpush3.bf16.msra.mxu1 %v649_v33 }
  0x30   :  { %603 = vmatprep.subr.bf16.mxu1 %v651_v35 }
  0x33   :  { %604 = vmatpush3.bf16.msra.mxu1 %v652_v40 }
  0x34   :  { %605 = vmatprep.subr.bf16.mxu1 %v654_v42 }
  0x37   :  { %606 = vmatpush3.bf16.msra.mxu1 %v655_v44 }
  0x38   :  { %607 = vmatprep.subr.bf16.mxu1 %v657_v46 }
  0x3b   :  { %608 = vmatpush3.bf16.msra.mxu1 %v658_v47 }
  0x3c   :  { %609 = vmatprep.subr.bf16.mxu1 %v660_v48 }
  0x3f   :  { %610 = vmatpush3.bf16.msra.mxu1 %v661_v49 }
  0x42   :  { %468 = vmatmul.mubr.bf16.vlgmr.msra.gmra.mrb[4].mxu1 %v662_v50 }
  0x8d   :  { %v107_v61 = vpop.permute.xlu0 %106 }
  0x91   :  { %v112_v63 = vpop.permute.xlu0 %111 }
  0xf5   :  { %v589_v51 = vpop.f32.mrb[0].mxu1 }
  0xf6   :  { %v590_v52 = vpop.f32.mrb[1].mxu1 }
  0xf7   :  { %v591_v53 = vadd.f32 %v590_v52, %v589_v51  ;;  %v592_v54 = vpop.f32.mrb[2].mxu1 }
  0xf8   :  { %v593_v55 = vpop.f32.mrb[3].mxu1 }
  0xf9   :  { %v594_v56 = vadd.f32 %v593_v55, %v592_v54  ;;  %v429_v1 = vadd.f32 %v591_v53, %v107_v61 }
  0xfb   :  { %v432_v5 = vadd.f32 %v594_v56, %v112_v63 }
  0xfe   :  { %v510_v57 = vpop.f32.mrb[0].mxu0 }
  0xff   :  { %v512_v58 = vpop.f32.mrb[1].mxu0 }
 0x100   :  { %v513_v59 = vpop.f32.mrb[2].mxu0 }
 0x101   :  { %v515_v60 = vpop.f32.mrb[3].mxu0 }
 0x115   :  { %v611_v62 = vpop.f32.mrb[4].mxu1 }
 0x116   :  { %v612_v0 = vpop.f32.mrb[5].mxu1 }
 0x117   :  { %v613_v2 = vadd.f32 %v612_v0, %v611_v62  ;;  %v614_v3 = vpop.f32.mrb[6].mxu1 }
 0x118   :  { %v615_v4 = vpop.f32.mrb[7].mxu1 }
 0x119   :  { %v470_v6 = vadd.f32 %v613_v2, %v429_v1  ;;  %v616_v7 = vadd.f32 %v615_v4, %v614_v3 }
 0x11b   :  { %v511_v8 = vadd.f32 %v510_v57, %v470_v6  ;;  %v473_v9 = vadd.f32 %v616_v7, %v432_v5 }
 0x11d   :  { %518 = vst.msk [vmem:[%s856_s3] sm:$0xff] %vm517_vm2, %v511_v8  ;;  %v514_v10 = vadd.f32 %v513_v59, %v473_v9 }
 0x11f   :  { %520 = vst.msk [vmem:[%s856_s3 + $0x8] sm:$0x3] %vm519_vm3, %v514_v10 }

// kernel: cnn_deep_forward.10
= control target key start
LH: loop header
LB: loop body
LE: loop exit
PB: predicated region body
PF: predicated region fallthrough
CT: control target
= control target key end

     0   :  { %v1882_v1 = vmov 0   ;;  %vm944_vm0 = vcmask 392192   ;;  %vm1366_vm1 = vcmask 142336   ;;  %s2400_s2 = inlined_call_operand.vmem [shape: bf16[1200,18], index: 2, kind: input, shape index: {}]   ;;  %s2401_s0 = inlined_call_operand.vmem [shape: bf16[72,1200], index: 0, kind: input, shape index: {}]   ;;  %s2402_s1 = inlined_call_operand.vmem [shape: f32[72,1], index: 1, kind: input, shape index: {}]   ;;  %s2403_s3 = inlined_call_operand.vmem [shape: bf16[72,18], index: 3, kind: output, shape index: {}]  }
   0x1   :  { %v1737_v0 = vld [vmem:[%s2400_s2 + $0x40] sm:$0xff]   ;;  %1735 = vset.pattern.permute.xlu0 %v1882_v1  ;;  %1736 = vset.pattern.permute.xlu1 %v1882_v1  ;;  %v1741_v5 = vld [vmem:[%s2400_s2 + $0x48] sm:$0xff]   ;;  %v1745_v9 = vld [vmem:[%s2400_s2 + $0x50] sm:$0xff]  }
   0x2   :  { %v1738_v2 = vld [vmem:[%s2400_s2 + $0xc0] sm:$0xff]   ;;  %1528 = vmatprep.subr.bf16.mxu0 %v1737_v0  ;;  %v1742_v6 = vld [vmem:[%s2400_s2 + $0xc8] sm:$0xff]   ;;  %v1746_v10 = vld [vmem:[%s2400_s2 + $0xd0] sm:$0xff]  }
   0x3   :  { %v1739_v3 = vld [vmem:[%s2400_s2] sm:$0xff]   ;;  %1574 = vmatprep.subr.bf16.mxu1 %v1738_v2  ;;  %v1743_v7 = vld [vmem:[%s2400_s2 + $0x8] sm:$0xff]   ;;  %v1747_v11 = vld [vmem:[%s2400_s2 + $0x10] sm:$0xff]  }
   0x4   :  { %v1740_v4 = vld [vmem:[%s2400_s2 + $0x80] sm:$0xff]   ;;  %1529 = vmatpush3.bf16.msra.mxu0 %v1739_v3  ;;  %v1744_v8 = vld [vmem:[%s2400_s2 + $0x88] sm:$0xff]   ;;  %v1748_v12 = vld [vmem:[%s2400_s2 + $0x90] sm:$0xff]  }
   0x5   :  { %1575 = vmatpush3.bf16.msra.mxu1 %v1740_v4  ;;  %1530 = vmatprep.subr.bf16.mxu0 %v1741_v5  ;;  %v1749_v13 = vld [vmem:[%s2400_s2 + $0x58] sm:$0xff]   ;;  %v1753_v17 = vld [vmem:[%s2400_s2 + $0x60] sm:$0xff]   ;;  %v1757_v21 = vld [vmem:[%s2400_s2 + $0x68] sm:$0xff]  }
   0x6   :  { %1576 = vmatprep.subr.bf16.mxu1 %v1742_v6  ;;  %v1750_v14 = vld [vmem:[%s2400_s2 + $0xd8] sm:$0xff]   ;;  %v1754_v18 = vld [vmem:[%s2400_s2 + $0xe0] sm:$0xff]   ;;  %v1758_v22 = vld [vmem:[%s2400_s2 + $0xe8] sm:$0xff]  }
   0x7   :  { %v1751_v15 = vld [vmem:[%s2400_s2 + $0x18] sm:$0xff]   ;;  %v1755_v19 = vld [vmem:[%s2400_s2 + $0x20] sm:$0xff]   ;;  %v1759_v23 = vld [vmem:[%s2400_s2 + $0x28] sm:$0xff]  }
   0x8   :  { %1531 = vmatpush3.bf16.msra.mxu0 %v1743_v7  ;;  %v1752_v16 = vld [vmem:[%s2400_s2 + $0x98] sm:$0xff]   ;;  %v1756_v20 = vld [vmem:[%s2400_s2 + $0xa0] sm:$0xff]   ;;  %v1760_v24 = vld [vmem:[%s2400_s2 + $0xa8] sm:$0xff]  }
   0x9   :  { %1577 = vmatpush3.bf16.msra.mxu1 %v1744_v8  ;;  %1532 = vmatprep.subr.bf16.mxu0 %v1745_v9  ;;  %v1761_v25 = vld [vmem:[%s2400_s2 + $0x70] sm:$0xff]   ;;  %v1765_v29 = vld [vmem:[%s2400_s2 + $0x78] sm:$0xff]   ;;  %v1769_v33 = vld [vmem:[%s2401_s0] ss:$40 sps:$4 sm:$0xff]  }
   0xa   :  { %1578 = vmatprep.subr.bf16.mxu1 %v1746_v10  ;;  %v1762_v26 = vld [vmem:[%s2400_s2 + $0xf0] sm:$0xff]   ;;  %v1766_v30 = vld [vmem:[%s2400_s2 + $0xf8] sm:$0xff]   ;;  %v1771_v34 = vld [vmem:[%s2401_s0 + $0x4] ss:$40 sps:$4 sm:$0xff]  }
   0xb   :  { %v1763_v27 = vld [vmem:[%s2400_s2 + $0x30] sm:$0xff]   ;;  %v1767_v31 = vld [vmem:[%s2400_s2 + $0x38] sm:$0xff]   ;;  %992 = vmatprep.mubr.bf16.mxu0 %v1771_v34  ;;  %v1775_v37 = vld [vmem:[%s2400_s2 + $0x140] sm:$0xff]  }
   0xc   :  { %1533 = vmatpush3.bf16.msra.mxu0 %v1747_v11  ;;  %v1764_v28 = vld [vmem:[%s2400_s2 + $0xb0] sm:$0xff]   ;;  %v1768_v32 = vld [vmem:[%s2400_s2 + $0xb8] sm:$0xff]   ;;  %v1776_v38 = vld [vmem:[%s2400_s2 + $0x100] sm:$0xff]  }
   0xd   :  { %1579 = vmatpush3.bf16.msra.mxu1 %v1748_v12  ;;  %1534 = vmatprep.subr.bf16.mxu0 %v1749_v13  ;;  %v1772_v35 = vld [vmem:[%s2401_s0 + $0x8] ss:$40 sps:$4 sm:$0xff]   ;;  %v1774_v36 = vld [vmem:[%s2401_s0 + $0xc] ss:$40 sps:$4 sm:$0xff]   ;;  %v1781_v42 = vld [vmem:[%s2401_s0 + $0x5c] ss:$40 sps:$4 sm:$0xff]  }
   0xe   :  { %1580 = vmatprep.subr.bf16.mxu1 %v1750_v14  ;;  %1064 = vmatprep.mubr.bf16.mxu1 %v1774_v36  ;;  %v1777_v39 = vld [vmem:[%s2400_s2 + $0x148] sm:$0xff]   ;;  %v1779_v41 = vld [vmem:[%s2401_s0 + $0x54] ss:$40 sps:$4 sm:$0xff]   ;;  %v1783_v43 = vld [vmem:[%s2400_s2 + $0x1c0] sm:$0xff]  }
   0xf   :  { %v1778_v40 = vld [vmem:[%s2400_s2 + $0x108] sm:$0xff]   ;;  %v1784_v44 = vld [vmem:[%s2401_s0 + $0x50] ss:$40 sps:$4 sm:$0xff]   ;;  %v1786_v46 = vld [vmem:[%s2400_s2 + $0x180] sm:$0xff]  }
  0x10   :  { %1535 = vmatpush3.bf16.msra.mxu0 %v1751_v15  ;;  %v1785_v45 = vld [vmem:[%s2401_s0 + $0x58] ss:$40 sps:$4 sm:$0xff]   ;;  %v1787_v47 = vld [vmem:[%s2400_s2 + $0x150] sm:$0xff]   ;;  %v1789_v49 = vld [vmem:[%s2400_s2 + $0x1c8] sm:$0xff]  }
  0x11   :  { %1581 = vmatpush3.bf16.msra.mxu1 %v1752_v16  ;;  %1536 = vmatprep.subr.bf16.mxu0 %v1753_v17  ;;  %v1788_v48 = vld [vmem:[%s2400_s2 + $0x110] sm:$0xff]   ;;  %v1790_v50 = vld [vmem:[%s2400_s2 + $0x188] sm:$0xff]   ;;  %v1795_v53 = vld [vmem:[%s2400_s2 + $0x158] sm:$0xff]  }
  0x12   :  { %1582 = vmatprep.subr.bf16.mxu1 %v1754_v18  ;;  %v1791_v51 = vld [vmem:[%s2401_s0 + $0xa4] ss:$40 sps:$4 sm:$0xff]   ;;  %v1796_v54 = vld [vmem:[%s2400_s2 + $0x1d0] sm:$0xff]   ;;  %v1797_v55 = vld [vmem:[%s2401_s0 + $0xa0] ss:$40 sps:$4 sm:$0xff]  }
  0x13   :  { %v1793_v52 = vld [vmem:[%s2401_s0 + $0xac] ss:$40 sps:$4 sm:$0xff]   ;;  %v1798_v56 = vld [vmem:[%s2401_s0 + $0xa8] ss:$40 sps:$4 sm:$0xff]   ;;  %v1799_v57 = vld [vmem:[%s2400_s2 + $0x118] sm:$0xff]  }
  0x14   :  { %1537 = vmatpush3.bf16.msra.mxu0 %v1755_v19  ;;  %v1800_v58 = vld [vmem:[%s2400_s2 + $0x190] sm:$0xff]   ;;  %v1801_v59 = vld [vmem:[%s2400_s2 + $0x1d8] sm:$0xff]   ;;  %v1802_v60 = vld [vmem:[%s2400_s2 + $0x160] sm:$0xff]  }
  0x15   :  { %1583 = vmatpush3.bf16.msra.mxu1 %v1756_v20  ;;  %1538 = vmatprep.subr.bf16.mxu0 %v1757_v21  ;;  %v1803_v61 = vld [vmem:[%s2400_s2 + $0x198] sm:$0xff]   ;;  %v1804_v62 = vld [vmem:[%s2400_s2 + $0x120] sm:$0xff]   ;;  %v1813_v6 = vld [vmem:[%s2400_s2 + $0x168] sm:$0xff]  }
  0x16   :  { %1584 = vmatprep.subr.bf16.mxu1 %v1758_v22  ;;  %v1805_v63 = vld [vmem:[%s2401_s0 + $0xf4] ss:$40 sps:$4 sm:$0xff]   ;;  %v1809_v2 = vld [vmem:[%s2400_s2 + $0x1e0] sm:$0xff]   ;;  %v1810_v3 = vld [vmem:[%s2401_s0 + $0xf0] ss:$40 sps:$4 sm:$0xff]  }
  0x17   :  { %v1807_v0 = vld [vmem:[%s2401_s0 + $0xfc] ss:$40 sps:$4 sm:$0xff]   ;;  %v1811_v4 = vld [vmem:[%s2401_s0 + $0xf8] ss:$40 sps:$4 sm:$0xff]   ;;  %v1814_v7 = vld [vmem:[%s2400_s2 + $0x128] sm:$0xff]  }
  0x18   :  { %1539 = vmatpush3.bf16.msra.mxu0 %v1759_v23  ;;  %v1812_v5 = vld [vmem:[%s2400_s2 + $0x1a0] sm:$0xff]   ;;  %v1815_v8 = vld [vmem:[%s2400_s2 + $0x1e8] sm:$0xff]   ;;  %v1817_v10 = vld [vmem:[%s2400_s2 + $0x170] sm:$0xff]  }
  0x19   :  { %1585 = vmatpush3.bf16.msra.mxu1 %v1760_v24  ;;  %1540 = vmatprep.subr.bf16.mxu0 %v1761_v25  ;;  %v1816_v9 = vld [vmem:[%s2400_s2 + $0x1a8] sm:$0xff]   ;;  %v55_v11 = vld [vmem:[%s2401_s0 + $0x140] sm:$0xff]  ;;  %v1820_v16 = vld [vmem:[%s2400_s2 + $0x130] sm:$0xff]  }
  0x1a   :  { %1586 = vmatprep.subr.bf16.mxu1 %v1762_v26  ;;  %v1421_v12 = vcombine.high %v55_v11, %v55_v11  ;;  %v56_v13 = vld [vmem:[%s2401_s0 + $0x148] sm:$0xff]  ;;  %v1420_v14 = vcombine.low %v55_v11, %v55_v11  ;;  %v1821_v18 = vld [vmem:[%s2400_s2 + $0x1f0] sm:$0xff]   ;;  %v1825_v20 = vld [vmem:[%s2400_s2 + $0x178] sm:$0xff]  }
  0x1b   :  { %v1423_v15 = vcombine.high %v56_v13, %v56_v13  ;;  %v1422_v17 = vcombine.low %v56_v13, %v56_v13  ;;  %v1824_v19 = vld [vmem:[%s2400_s2 + $0x1b0] sm:$0xff]   ;;  %v1826_v21 = vld [vmem:[%s2400_s2 + $0x1f8] sm:$0xff]   ;;  %v1879_v11 = vld [vmem:[%s2401_s0 + $0xc4] ss:$40 sps:$4 sm:$0xff]  }
  0x1c   :  { %1541 = vmatpush3.bf16.msra.mxu0 %v1763_v27  ;;  %v1827_v22 = vld [vmem:[%s2400_s2 + $0x138] sm:$0xff]   ;;  %v1843_v34 = vld [vmem:[%s2401_s0 + $0x68] ss:$40 sps:$4 sm:$0xff]  }
  0x1d   :  { %1587 = vmatpush3.bf16.msra.mxu1 %v1764_v28  ;;  %1542 = vmatprep.subr.bf16.mxu0 %v1765_v29  ;;  %v1828_v23 = vld [vmem:[%s2400_s2 + $0x1b8] sm:$0xff]   ;;  %v1835_v28 = vld [vmem:[%s2400_s2 + $0x200] sm:$0xff]  }
  0x1e   :  { %1588 = vmatprep.subr.bf16.mxu1 %v1766_v30  ;;  %v1829_v24 = vld [vmem:[%s2401_s0 + $0x10] ss:$40 sps:$4 sm:$0xff]   ;;  %v1831_v25 = vld [vmem:[%s2401_s0 + $0x14] ss:$40 sps:$4 sm:$0xff]   ;;  %v1837_v29 = vld [vmem:[%s2401_s0 + $0x64] ss:$40 sps:$4 sm:$0xff]  }
  0x1f   :  { %v1832_v26 = vld [vmem:[%s2401_s0 + $0x18] ss:$40 sps:$4 sm:$0xff]   ;;  %v1834_v27 = vld [vmem:[%s2401_s0 + $0x1c] ss:$40 sps:$4 sm:$0xff]   ;;  %v1836_v30 = vld [vmem:[%s2400_s2 + $0x208] sm:$0xff]  }
  0x20   :  { %1543 = vmatpush3.bf16.msra.mxu0 %v1767_v31  ;;  %v1841_v31 = vld [vmem:[%s2401_s0 + $0x6c] ss:$40 sps:$4 sm:$0xff]   ;;  %v1849_v36 = vld [vmem:[%s2401_s0 + $0xbc] ss:$40 sps:$4 sm:$0xff]  }
  0x21   :  { %1589 = vmatpush3.bf16.msra.mxu1 %v1768_v32  ;;  %1620 = vmatprep.subr.bf16.mxu0 %v1775_v37  ;;  %v1839_v32 = vld [vmem:[%s2401_s0 + $0x60] ss:$40 sps:$4 sm:$0xff]   ;;  %v1844_v37 = vld [vmem:[%s2400_s2 + $0x218] sm:$0xff]  }
  0x22   :  { %1666 = vmatprep.subr.bf16.mxu1 %v1783_v43  ;;  %v1852_v43 = vld [vmem:[%s2400_s2 + $0x228] sm:$0xff]  }
  0x23   :  { %993 = vmatmul.mubr.bf16.vlgmr.msra.gmra.mrb[0].mxu0 %v1769_v33  ;;  %v1840_v33 = vld [vmem:[%s2400_s2 + $0x210] sm:$0xff]  }
  0x24   :  { %1065 = vmatmul.mubr.bf16.vlgmr.msra.gmra.mrb[0].mxu1 %v1772_v35  ;;  %1621 = vmatpush3.bf16.msra.mxu0 %v1776_v38  ;;  %v1845_v35 = vld [vmem:[%s2401_s0 + $0xb4] ss:$40 sps:$4 sm:$0xff]   ;;  %v1847_v38 = vld [vmem:[%s2401_s0 + $0xb0] ss:$40 sps:$4 sm:$0xff]  }
  0x25   :  { %1622 = vmatprep.subr.bf16.mxu0 %v1777_v39  ;;  %1000 = vmatprep.mubr.bf16.mxu0 %v1779_v41  ;;  %v1848_v39 = vld [vmem:[%s2400_s2 + $0x220] sm:$0xff]  }
  0x26   :  { %1072 = vmatprep.mubr.bf16.mxu1 %v1781_v42  ;;  %1667 = vmatpush3.bf16.msra.mxu1 %v1786_v46  ;;  %v1853_v41 = vld [vmem:[%s2401_s0 + $0x104] ss:$40 sps:$4 sm:$0xff]   ;;  %v1859_v46 = vld [vmem:[%s2401_s0 + $0x108] ss:$40 sps:$4 sm:$0xff]  }
  0x27   :  { %1668 = vmatprep.subr.bf16.mxu1 %v1789_v49  ;;  %v1857_v42 = vld [vmem:[%s2401_s0 + $0x10c] ss:$40 sps:$4 sm:$0xff]   ;;  %v58_v49 = vld [vmem:[%s2401_s0 + $0x158] sm:$0xff] }
  0x28   :  { %1623 = vmatpush3.bf16.msra.mxu0 %v1778_v40  ;;  %v1851_v40 = vld [vmem:[%s2401_s0 + $0xb8] ss:$40 sps:$4 sm:$0xff]  }
  0x29   :  { %1624 = vmatprep.subr.bf16.mxu0 %v1787_v47  ;;  %v57_v47 = vld [vmem:[%s2401_s0 + $0x150] sm:$0xff] }
  0x2a   :  { %1669 = vmatpush3.bf16.msra.mxu1 %v1790_v50  ;;  %v212_v50 = vld [vmem:[%s2402_s1 + $0x10] sm:$0xff] }
  0x2b   :  { %1001 = vmatmul.mubr.bf16.gmra.mrb[4].mxu0 %v1784_v44  ;;  %1670 = vmatprep.subr.bf16.mxu1 %v1796_v54  ;;  %v1855_v44 = vld [vmem:[%s2401_s0 + $0x100] ss:$40 sps:$4 sm:$0xff]  }
  0x2c   :  { %1073 = vmatmul.mubr.bf16.gmra.mrb[4].mxu1 %v1785_v45  ;;  %1625 = vmatpush3.bf16.msra.mxu0 %v1788_v48  ;;  %v1856_v45 = vld [vmem:[%s2400_s2 + $0x230] sm:$0xff]   ;;  %v210_v48 = vld [vmem:[%s2402_s1] sm:$0xff]  ;;  %v211_v54 = vld [vmem:[%s2402_s1 + $0x8] sm:$0xff] }
  0x2d   :  { %1008 = vmatprep.mubr.bf16.mxu0 %v1791_v51  ;;  %1080 = vmatprep.mubr.bf16.mxu1 %v1793_v52  ;;  %v1425_v51 = vcombine.high %v57_v47, %v57_v47  ;;  %v1427_v52 = vcombine.high %v58_v49, %v58_v49 }
  0x2e   :  { %1626 = vmatprep.subr.bf16.mxu0 %v1795_v53  ;;  %1671 = vmatpush3.bf16.msra.mxu1 %v1800_v58  ;;  %v1860_v53 = vld [vmem:[%s2400_s2 + $0x238] sm:$0xff]   ;;  %v1426_v58 = vcombine.low %v58_v49, %v58_v49 }
  0x2f   :  { %1672 = vmatprep.subr.bf16.mxu1 %v1801_v59  ;;  %221 = vperm.xlu0 %1735, %v210_v48   ;;  %v214_v59 = vld [vmem:[%s2402_s1 + $0x20] sm:$0xff] }
  0x30   :  { %1627 = vmatpush3.bf16.msra.mxu0 %v1799_v57  ;;  %231 = vperm.xlu1 %1736, %v212_v50   ;;  %v1863_v57 = vld [vmem:[%s2400_s2 + $0x240] sm:$0xff]  }
  0x31   :  { %1628 = vmatprep.subr.bf16.mxu0 %v1802_v60  ;;  %v1870_v60 = vld [vmem:[%s2401_s0 + $0x24] ss:$40 sps:$4 sm:$0xff]  }
  0x32   :  { %1673 = vmatpush3.bf16.msra.mxu1 %v1803_v61  ;;  %v1873_v61 = vld [vmem:[%s2401_s0 + $0x114] ss:$40 sps:$4 sm:$0xff]  }
  0x33   :  { %1009 = vmatmul.mubr.bf16.gmra.mrb[8].mxu0 %v1797_v55  ;;  %1674 = vmatprep.subr.bf16.mxu1 %v1809_v2  ;;  %v213_v55 = vld [vmem:[%s2402_s1 + $0x18] sm:$0xff]  ;;  %v1867_v2 = vld [vmem:[%s2400_s2 + $0x250] sm:$0xff]  }
  0x34   :  { %1081 = vmatmul.mubr.bf16.gmra.mrb[8].mxu1 %v1798_v56  ;;  %1629 = vmatpush3.bf16.msra.mxu0 %v1804_v62  ;;  %v1424_v56 = vcombine.low %v57_v47, %v57_v47  ;;  %v1866_v62 = vld [vmem:[%s2400_s2 + $0x248] sm:$0xff]  }
  0x35   :  { %1016 = vmatprep.mubr.bf16.mxu0 %v1805_v63  ;;  %1088 = vmatprep.mubr.bf16.mxu1 %v1807_v0  ;;  %v215_v63 = vld [vmem:[%s2402_s1 + $0x28] sm:$0xff]  ;;  %v216_v0 = vld [vmem:[%s2402_s1 + $0x30] sm:$0xff] }
  0x36   :  { %1675 = vmatpush3.bf16.msra.mxu1 %v1812_v5  ;;  %1630 = vmatprep.subr.bf16.mxu0 %v1813_v6  ;;  %v59_v5 = vld [vmem:[%s2401_s0 + $0x160] sm:$0xff] }
  0x37   :  { %1676 = vmatprep.subr.bf16.mxu1 %v1815_v8  ;;  %226 = vperm.xlu0 %1735, %v211_v54   ;;  %v1868_v6 = vld [vmem:[%s2401_s0 + $0x20] ss:$40 sps:$4 sm:$0xff]   ;;  %v1874_v8 = vld [vmem:[%s2401_s0 + $0x74] ss:$40 sps:$4 sm:$0xff]  }
  0x38   :  { %1631 = vmatpush3.bf16.msra.mxu0 %v1814_v7  ;;  %236 = vperm.xlu1 %1736, %v213_v55   ;;  %v1871_v7 = vld [vmem:[%s2401_s0 + $0x110] ss:$40 sps:$4 sm:$0xff]  }
  0x39   :  { %1632 = vmatprep.subr.bf16.mxu0 %v1817_v10  ;;  %v1428_v10 = vcombine.low %v59_v5, %v59_v5 }
  0x3a   :  { %1677 = vmatpush3.bf16.msra.mxu1 %v1816_v9  ;;  %v1877_v9 = vld [vmem:[%s2401_s0 + $0x70] ss:$40 sps:$4 sm:$0xff]  }
  0x3b   :  { %1017 = vmatmul.mubr.bf16.gmra.mrb[12].mxu0 %v1810_v3  ;;  %1678 = vmatprep.subr.bf16.mxu1 %v1821_v18  ;;  %v217_v3 = vld [vmem:[%s2402_s1 + $0x38] sm:$0xff] }
  0x3c   :  { %1089 = vmatmul.mubr.bf16.gmra.mrb[12].mxu1 %v1811_v4  ;;  %1024 = vmatprep.mubr.bf16.mxu0 %v1421_v12  ;;  %v218_v4 = vld [vmem:[%s2402_s1 + $0x40] sm:$0xff] }
  0x3d   :  { %1096 = vmatprep.mubr.bf16.mxu1 %v1423_v15  ;;  %1633 = vmatpush3.bf16.msra.mxu0 %v1820_v16  ;;  %v1881_v12 = vld [vmem:[%s2401_s0 + $0xc0] ss:$40 sps:$4 sm:$0xff]  }
  0x3e   :  { %1679 = vmatpush3.bf16.msra.mxu1 %v1824_v19  ;;  %1634 = vmatprep.subr.bf16.mxu0 %v1825_v20 }
  0x3f   :  { %1680 = vmatprep.subr.bf16.mxu1 %v1826_v21  ;;  %241 = vperm.xlu0 %1735, %v214_v59  }
  0x40   :  { %246 = vperm.xlu1 %1736, %v215_v63  }
  0x41   :  { %1635 = vmatpush3.bf16.msra.mxu0 %v1827_v22 }
  0x42   :  { %1248 = vmatprep.subr.bf16.mxu0 %v1882_v1  ;;  %1681 = vmatpush3.bf16.msra.mxu1 %v1828_v23 }
  0x43   :  { %1025 = vmatmul.mubr.bf16.gmra.mrb[16].mxu0 %v1420_v14  ;;  %1712 = vmatprep.subr.bf16.mxu1 %v1882_v1 }
  0x44   :  { %1097 = vmatmul.mubr.bf16.gmra.mrb[16].mxu1 %v1422_v17  ;;  %1136 = vmatprep.mubr.bf16.mxu0 %v1831_v25 }
  0x45   :  { %1208 = vmatprep.mubr.bf16.mxu1 %v1834_v27  ;;  %251 = vperm.xlu0 %1735, %v216_v0  }
  0x46   :  { %256 = vperm.xlu1 %1736, %v217_v3  }
  0x49   :  { %261 = vperm.xlu0 %1735, %v218_v4  }
  0x4b   :  { %1137 = vmatmul.mubr.bf16.vlgmr.msra.gmra.mrb[20].mxu0 %v1829_v24 }
  0x4c   :  { %1209 = vmatmul.mubr.bf16.vlgmr.msra.gmra.mrb[20].mxu1 %v1832_v26  ;;  %1249 = vmatpush1.bf16.msra.mxu0 %v1835_v28 }
  0x4d   :  { %1723 = vmatpush1.bf16.msra.mxu1 %v1835_v28  ;;  %1250 = vmatprep.subr.bf16.mxu0 %v1882_v1 }
  0x4e   :  { %1713 = vmatprep.subr.bf16.mxu1 %v1882_v1  ;;  %1144 = vmatprep.mubr.bf16.mxu0 %v1837_v29 }
  0x4f   :  { %1216 = vmatprep.mubr.bf16.mxu1 %v1841_v31 }
  0x50   :  { %1251 = vmatpush1.bf16.msra.mxu0 %v1836_v30 }
  0x51   :  { %1724 = vmatpush1.bf16.msra.mxu1 %v1836_v30  ;;  %1252 = vmatprep.subr.bf16.mxu0 %v1882_v1 }
  0x52   :  { %1714 = vmatprep.subr.bf16.mxu1 %v1882_v1 }
  0x53   :  { %1145 = vmatmul.mubr.bf16.gmra.mrb[24].mxu0 %v1839_v32 }
  0x54   :  { %1253 = vmatpush1.bf16.msra.mxu0 %v1840_v33  ;;  %1217 = vmatmul.mubr.bf16.gmra.mrb[24].mxu1 %v1843_v34 }
  0x55   :  { %1725 = vmatpush1.bf16.msra.mxu1 %v1840_v33  ;;  %1254 = vmatprep.subr.bf16.mxu0 %v1882_v1 }
  0x56   :  { %1715 = vmatprep.subr.bf16.mxu1 %v1882_v1  ;;  %1152 = vmatprep.mubr.bf16.mxu0 %v1845_v35 }
  0x57   :  { %1224 = vmatprep.mubr.bf16.mxu1 %v1849_v36 }
  0x58   :  { %1255 = vmatpush1.bf16.msra.mxu0 %v1844_v37 }
  0x59   :  { %1726 = vmatpush1.bf16.msra.mxu1 %v1844_v37  ;;  %1256 = vmatprep.subr.bf16.mxu0 %v1882_v1 }
  0x5a   :  { %1716 = vmatprep.subr.bf16.mxu1 %v1882_v1 }
  0x5b   :  { %1153 = vmatmul.mubr.bf16.gmra.mrb[28].mxu0 %v1847_v38 }
  0x5c   :  { %1257 = vmatpush1.bf16.msra.mxu0 %v1848_v39  ;;  %1225 = vmatmul.mubr.bf16.gmra.mrb[28].mxu1 %v1851_v40 }
  0x5d   :  { %1727 = vmatpush1.bf16.msra.mxu1 %v1848_v39  ;;  %1258 = vmatprep.subr.bf16.mxu0 %v1882_v1 }
  0x5e   :  { %1717 = vmatprep.subr.bf16.mxu1 %v1882_v1  ;;  %1160 = vmatprep.mubr.bf16.mxu0 %v1853_v41 }
  0x5f   :  { %1232 = vmatprep.mubr.bf16.mxu1 %v1857_v42 }
  0x60   :  { %1259 = vmatpush1.bf16.msra.mxu0 %v1852_v43 }
  0x61   :  { %1728 = vmatpush1.bf16.msra.mxu1 %v1852_v43  ;;  %1260 = vmatprep.subr.bf16.mxu0 %v1882_v1 }
  0x62   :  { %1718 = vmatprep.subr.bf16.mxu1 %v1882_v1 }
  0x63   :  { %1161 = vmatmul.mubr.bf16.gmra.mrb[32].mxu0 %v1855_v44 }
  0x64   :  { %1261 = vmatpush1.bf16.msra.mxu0 %v1856_v45  ;;  %1233 = vmatmul.mubr.bf16.gmra.mrb[32].mxu1 %v1859_v46 }
  0x65   :  { %1729 = vmatpush1.bf16.msra.mxu1 %v1856_v45  ;;  %1262 = vmatprep.subr.bf16.mxu0 %v1882_v1 }
  0x66   :  { %1719 = vmatprep.subr.bf16.mxu1 %v1882_v1  ;;  %1168 = vmatprep.mubr.bf16.mxu0 %v1425_v51 }
  0x67   :  { %1240 = vmatprep.mubr.bf16.mxu1 %v1427_v52 }
  0x68   :  { %1263 = vmatpush1.bf16.msra.mxu0 %v1860_v53 }
  0x69   :  { %1730 = vmatpush1.bf16.msra.mxu1 %v1860_v53  ;;  %1264 = vmatprep.subr.bf16.mxu0 %v1882_v1 }
  0x6a   :  { %1720 = vmatprep.subr.bf16.mxu1 %v1882_v1 }
  0x6b   :  { %1169 = vmatmul.mubr.bf16.gmra.mrb[36].mxu0 %v1424_v56 }
  0x6c   :  { %1265 = vmatpush1.bf16.msra.mxu0 %v1863_v57  ;;  %1241 = vmatmul.mubr.bf16.gmra.mrb[36].mxu1 %v1426_v58 }
  0x6d   :  { %1731 = vmatpush1.bf16.msra.mxu1 %v1863_v57  ;;  %1266 = vmatprep.subr.bf16.mxu0 %v1882_v1 }
  0x6e   :  { %1721 = vmatprep.subr.bf16.mxu1 %v1882_v1  ;;  %1505 = vmatprep.mubr.msk.bf16.mxu0 %vm944_vm0, %v1870_v60 }
  0x6f   :  { %1508 = vmatprep.mubr.msk.bf16.mxu1 %vm944_vm0, %v1873_v61 }
  0x70   :  { %1267 = vmatpush1.bf16.msra.mxu0 %v1866_v62 }
  0x71   :  { %1732 = vmatpush1.bf16.msra.mxu1 %v1866_v62  ;;  %1268 = vmatprep.subr.bf16.mxu0 %v1882_v1 }
  0x72   :  { %1722 = vmatprep.subr.bf16.mxu1 %v1882_v1  ;;  %v1429_v1 = vcombine.high %v59_v5, %v59_v5 }
  0x74   :  { %1269 = vmatpush1.bf16.msra.mxu0 %v1867_v2 }
  0x75   :  { %1733 = vmatpush1.bf16.msra.mxu1 %v1867_v2 }
  0x77   :  { %1281 = vmatmul.mubr.bf16.vlgmr.msra.gmra.mrb[40].mxu0 %v1868_v6 }
  0x78   :  { %1305 = vmatmul.mubr.bf16.vlgmr.msra.gmra.mrb[40].mxu1 %v1871_v7  ;;  %1506 = vmatprep.mubr.msk.bf16.mxu0 %vm944_vm0, %v1874_v8 }
  0x79   :  { %1509 = vmatprep.mubr.msk.bf16.mxu1 %vm944_vm0, %v1429_v1 }
  0x7f   :  { %1289 = vmatmul.mubr.bf16.gmra.mrb[44].mxu0 %v1877_v9 }
  0x80   :  { %1313 = vmatmul.mubr.bf16.gmra.mrb[44].mxu1 %v1428_v10  ;;  %1507 = vmatprep.mubr.msk.bf16.mxu0 %vm944_vm0, %v1879_v11 }
  0x87   :  { %1297 = vmatmul.mubr.bf16.gmra.mrb[48].mxu0 %v1881_v12 }
  0xae   :  { %v222_v13 = vpop.permute.xlu0 %221 }
  0xaf   :  { %v232_v14 = vpop.permute.xlu1 %231 }
  0xb6   :  { %v227_v16 = vpop.permute.xlu0 %226 }
  0xb7   :  { %v237_v33 = vpop.permute.xlu1 %236 }
  0xbe   :  { %v242_v49 = vpop.permute.xlu0 %241 }
  0xbf   :  { %v247_v51 = vpop.permute.xlu1 %246 }
  0xc4   :  { %v252_v4 = vpop.permute.xlu0 %251 }
  0xc5   :  { %v257_v5 = vpop.permute.xlu1 %256 }
  0xf6   :  { %v1544_v15 = vpop.f32.mrb[0].mxu0 }
  0xf7   :  { %v1545_v17 = vpop.f32.mrb[1].mxu0  ;;  %v1590_v18 = vpop.f32.mrb[0].mxu1 }
  0xf8   :  { %v1546_v19 = vadd.f32 %v1545_v17, %v1544_v15  ;;  %v1547_v20 = vpop.f32.mrb[2].mxu0  ;;  %v1591_v21 = vpop.f32.mrb[1].mxu1 }
  0xf9   :  { %v1548_v22 = vpop.f32.mrb[3].mxu0  ;;  %v1592_v23 = vadd.f32 %v1591_v21, %v1590_v18  ;;  %v1593_v24 = vpop.f32.mrb[2].mxu1 }
  0xfa   :  { %v995_v25 = vadd.f32 %v1546_v19, %v222_v13  ;;  %v1549_v26 = vadd.f32 %v1548_v22, %v1547_v20  ;;  %v1594_v27 = vpop.f32.mrb[3].mxu1  ;;  %v262_v22 = vpop.permute.xlu0 %261 }
  0xfb   :  { %v1595_v28 = vadd.f32 %v1594_v27, %v1593_v24 }
  0xfc   :  { %v2319_v29 = vadd.f32 %v1592_v23, %v995_v25  ;;  %v998_v30 = vadd.f32 %v1549_v26, %v227_v16 }
  0xfe   :  { %v2321_v31 = vadd.f32 %v1595_v28, %v998_v30  ;;  %v1550_v32 = vpop.f32.mrb[4].mxu0 }
  0xff   :  { %v1551_v34 = vpop.f32.mrb[5].mxu0  ;;  %v1596_v35 = vpop.f32.mrb[4].mxu1 }
 0x100   :  { %v1552_v36 = vadd.f32 %v1551_v34, %v1550_v32  ;;  %v1553_v37 = vpop.f32.mrb[6].mxu0  ;;  %v1597_v38 = vpop.f32.mrb[5].mxu1 }
 0x101   :  { %v1554_v39 = vpop.f32.mrb[7].mxu0  ;;  %v1598_v40 = vadd.f32 %v1597_v38, %v1596_v35  ;;  %v1599_v41 = vpop.f32.mrb[6].mxu1 }
 0x102   :  { %v1003_v42 = vadd.f32 %v1552_v36, %v232_v14  ;;  %v1555_v43 = vadd.f32 %v1554_v39, %v1553_v37  ;;  %v1600_v44 = vpop.f32.mrb[7].mxu1 }
 0x103   :  { %v1601_v45 = vadd.f32 %v1600_v44, %v1599_v41 }
 0x104   :  { %v2323_v46 = vadd.f32 %v1598_v40, %v1003_v42  ;;  %v1006_v47 = vadd.f32 %v1555_v43, %v237_v33 }
 0x106   :  { %v2325_v48 = vadd.f32 %v1601_v45, %v1006_v47  ;;  %v1556_v50 = vpop.f32.mrb[8].mxu0 }
 0x107   :  { %v1557_v52 = vpop.f32.mrb[9].mxu0  ;;  %v1602_v53 = vpop.f32.mrb[8].mxu1 }
 0x108   :  { %v1558_v54 = vadd.f32 %v1557_v52, %v1556_v50  ;;  %v1559_v55 = vpop.f32.mrb[10].mxu0  ;;  %v1603_v56 = vpop.f32.mrb[9].mxu1 }
 0x109   :  { %v1560_v57 = vpop.f32.mrb[11].mxu0  ;;  %v1604_v58 = vadd.f32 %v1603_v56, %v1602_v53  ;;  %v1605_v59 = vpop.f32.mrb[10].mxu1 }
 0x10a   :  { %v1011_v60 = vadd.f32 %v1558_v54, %v242_v49  ;;  %v1561_v61 = vadd.f32 %v1560_v57, %v1559_v55  ;;  %v1606_v62 = vpop.f32.mrb[11].mxu1 }
 0x10b   :  { %v1607_v63 = vadd.f32 %v1606_v62, %v1605_v59 }
 0x10c   :  { %v2327_v0 = vadd.f32 %v1604_v58, %v1011_v60  ;;  %v1014_v2 = vadd.f32 %v1561_v61, %v247_v51 }
 0x10e   :  { %v2329_v3 = vadd.f32 %v1607_v63, %v1014_v2  ;;  %v1562_v6 = vpop.f32.mrb[12].mxu0 }
 0x10f   :  { %v1608_v7 = vpop.f32.mrb[12].mxu1  ;;  %v1563_v8 = vpop.f32.mrb[13].mxu0 }
 0x110   :  { %v1609_v1 = vpop.f32.mrb[13].mxu1  ;;  %v1564_v9 = vadd.f32 %v1563_v8, %v1562_v6  ;;  %v1565_v10 = vpop.f32.mrb[14].mxu0 }
 0x111   :  { %v1610_v11 = vadd.f32 %v1609_v1, %v1608_v7  ;;  %v1611_v12 = vpop.f32.mrb[14].mxu1  ;;  %v1566_v13 = vpop.f32.mrb[15].mxu0 }
 0x112   :  { %v1612_v14 = vpop.f32.mrb[15].mxu1  ;;  %v1019_v15 = vadd.f32 %v1564_v9, %v252_v4  ;;  %v1567_v16 = vadd.f32 %v1566_v13, %v1565_v10 }
 0x113   :  { %v1613_v17 = vadd.f32 %v1612_v14, %v1611_v12 }
 0x114   :  { %v2331_v18 = vadd.f32 %v1610_v11, %v1019_v15  ;;  %v1022_v19 = vadd.f32 %v1567_v16, %v257_v5 }
 0x116   :  { %v2333_v20 = vadd.f32 %v1613_v17, %v1022_v19  ;;  %v1568_v21 = vpop.f32.mrb[16].mxu0 }
 0x117   :  { %v1569_v23 = vpop.f32.mrb[17].mxu0  ;;  %v1614_v24 = vpop.f32.mrb[16].mxu1 }
 0x118   :  { %v1570_v25 = vadd.f32 %v1569_v23, %v1568_v21  ;;  %v1571_v26 = vpop.f32.mrb[18].mxu0  ;;  %v1615_v27 = vpop.f32.mrb[17].mxu1 }
 0x119   :  { %v1572_v28 = vpop.f32.mrb[19].mxu0  ;;  %v1616_v30 = vadd.f32 %v1615_v27, %v1614_v24  ;;  %v1617_v32 = vpop.f32.mrb[18].mxu1 }
 0x11a   :  { %v1027_v33 = vadd.f32 %v1570_v25, %v262_v22  ;;  %v1618_v34 = vpop.f32.mrb[19].mxu1 }
 0x11c   :  { %v2335_v35 = vadd.f32 %v1616_v30, %v1027_v33 }
 0x11e   :  { %v1636_v36 = vpop.f32.mrb[20].mxu0 }
 0x11f   :  { %v1637_v37 = vpop.f32.mrb[21].mxu0  ;;  %v1682_v38 = vpop.f32.mrb[20].mxu1 }
 0x120   :  { %v1638_v39 = vadd.f32 %v1637_v37, %v1636_v36  ;;  %v1639_v40 = vpop.f32.mrb[22].mxu0  ;;  %v1683_v41 = vpop.f32.mrb[21].mxu1 }
 0x121   :  { %v1640_v42 = vpop.f32.mrb[23].mxu0  ;;  %v1684_v43 = vadd.f32 %v1683_v41, %v1682_v38  ;;  %v1685_v44 = vpop.f32.mrb[22].mxu1 }
 0x122   :  { %v1139_v45 = vadd.f32 %v1638_v39, %v2319_v29  ;;  %v1641_v47 = vadd.f32 %v1640_v42, %v1639_v40  ;;  %v1686_v49 = vpop.f32.mrb[23].mxu1 }
 0x123   :  { %v1687_v50 = vadd.f32 %v1686_v49, %v1685_v44 }
 0x124   :  { %v1142_v51 = vadd.f32 %v1641_v47, %v2321_v31  ;;  %v2339_v52 = vadd.f32 %v1684_v43, %v1139_v45 }
 0x126   :  { %v1642_v53 = vpop.f32.mrb[24].mxu0  ;;  %v2341_v54 = vadd.f32 %v1687_v50, %v1142_v51 }
 0x127   :  { %v1643_v55 = vpop.f32.mrb[25].mxu0  ;;  %v1688_v56 = vpop.f32.mrb[24].mxu1 }
 0x128   :  { %v1644_v57 = vadd.f32 %v1643_v55, %v1642_v53  ;;  %v1645_v58 = vpop.f32.mrb[26].mxu0  ;;  %v1689_v59 = vpop.f32.mrb[25].mxu1 }
 0x129   :  { %v1646_v60 = vpop.f32.mrb[27].mxu0  ;;  %v1690_v61 = vadd.f32 %v1689_v59, %v1688_v56  ;;  %v1691_v62 = vpop.f32.mrb[26].mxu1 }
 0x12a   :  { %v1147_v29 = vadd.f32 %v1644_v57, %v2323_v46  ;;  %v1647_v63 = vadd.f32 %v1646_v60, %v1645_v58  ;;  %v1692_v2 = vpop.f32.mrb[27].mxu1 }
 0x12b   :  { %v1693_v4 = vadd.f32 %v1692_v2, %v1691_v62 }
 0x12c   :  { %v1150_v31 = vadd.f32 %v1647_v63, %v2325_v48  ;;  %v2345_v5 = vadd.f32 %v1690_v61, %v1147_v29 }
 0x12e   :  { %v1648_v6 = vpop.f32.mrb[28].mxu0  ;;  %v2347_v7 = vadd.f32 %v1693_v4, %v1150_v31 }
 0x12f   :  { %v1649_v8 = vpop.f32.mrb[29].mxu0  ;;  %v1694_v1 = vpop.f32.mrb[28].mxu1 }
 0x130   :  { %v1650_v9 = vadd.f32 %v1649_v8, %v1648_v6  ;;  %v1651_v10 = vpop.f32.mrb[30].mxu0  ;;  %v1695_v11 = vpop.f32.mrb[29].mxu1 }
 0x131   :  { %v1652_v12 = vpop.f32.mrb[31].mxu0  ;;  %v1696_v13 = vadd.f32 %v1695_v11, %v1694_v1  ;;  %v1697_v14 = vpop.f32.mrb[30].mxu1 }
 0x132   :  { %v1155_v46 = vadd.f32 %v1650_v9, %v2327_v0  ;;  %v1653_v15 = vadd.f32 %v1652_v12, %v1651_v10  ;;  %v1698_v16 = vpop.f32.mrb[31].mxu1 }
 0x133   :  { %v1699_v17 = vadd.f32 %v1698_v16, %v1697_v14 }
 0x134   :  { %v1158_v48 = vadd.f32 %v1653_v15, %v2329_v3  ;;  %v2351_v19 = vadd.f32 %v1696_v13, %v1155_v46 }
 0x136   :  { %v1654_v21 = vpop.f32.mrb[32].mxu0  ;;  %v2353_v22 = vadd.f32 %v1699_v17, %v1158_v48 }
 0x137   :  { %v1655_v23 = vpop.f32.mrb[33].mxu0  ;;  %v1700_v24 = vpop.f32.mrb[32].mxu1 }
 0x138   :  { %v1656_v25 = vadd.f32 %v1655_v23, %v1654_v21  ;;  %v1657_v26 = vpop.f32.mrb[34].mxu0  ;;  %v1701_v27 = vpop.f32.mrb[33].mxu1 }
 0x139   :  { %v1658_v28 = vpop.f32.mrb[35].mxu0  ;;  %v1702_v30 = vadd.f32 %v1701_v27, %v1700_v24  ;;  %v1703_v32 = vpop.f32.mrb[34].mxu1 }
 0x13a   :  { %v1163_v0 = vadd.f32 %v1656_v25, %v2331_v18  ;;  %v1659_v33 = vadd.f32 %v1658_v28, %v1657_v26  ;;  %v1704_v34 = vpop.f32.mrb[35].mxu1 }
 0x13b   :  { %v1705_v36 = vadd.f32 %v1704_v34, %v1703_v32 }
 0x13c   :  { %v1166_v3 = vadd.f32 %v1659_v33, %v2333_v20  ;;  %v1235_v37 = vadd.f32 %v1702_v30, %v1163_v0 }
 0x13e   :  { %v1660_v38 = vpop.f32.mrb[36].mxu0  ;;  %v1238_v39 = vadd.f32 %v1705_v36, %v1166_v3 }
 0x13f   :  { %v1661_v40 = vpop.f32.mrb[37].mxu0  ;;  %v1706_v41 = vpop.f32.mrb[36].mxu1 }
 0x140   :  { %v1662_v42 = vadd.f32 %v1661_v40, %v1660_v38  ;;  %v1663_v43 = vpop.f32.mrb[38].mxu0  ;;  %v1707_v44 = vpop.f32.mrb[37].mxu1 }
 0x141   :  { %v1708_v45 = vadd.f32 %v1707_v44, %v1706_v41  ;;  %v1664_v47 = vpop.f32.mrb[39].mxu0  ;;  %v1709_v49 = vpop.f32.mrb[38].mxu1 }
 0x142   :  { %v1171_v50 = vadd.f32 %v1662_v42, %v2335_v35  ;;  %v1710_v51 = vpop.f32.mrb[39].mxu1 }
 0x144   :  { %v1243_v18 = vadd.f32 %v1708_v45, %v1171_v50 }
 0x14a   :  { %v1282_v53 = vpop.f32.mrb[40].mxu0 }
 0x14b   :  { %v1283_v55 = vadd.f32 %v1282_v53, %v2339_v52  ;;  %v1306_v56 = vpop.f32.mrb[40].mxu1  ;;  %v1284_v20 = vpop.f32.mrb[41].mxu0 }
 0x14c   :  { %v1307_v57 = vadd.f32 %v1306_v56, %v1235_v37  ;;  %v1308_v58 = vpop.f32.mrb[41].mxu1  ;;  %v1285_v59 = vpop.f32.mrb[42].mxu0 }
 0x14d   :  { %v1320_v60 = vmax.f32 %v1283_v55, 0.0  ;;  %v1286_v61 = vadd.f32 %v1285_v59, %v2341_v54  ;;  %v1309_v62 = vpop.f32.mrb[42].mxu1  ;;  %v1287_v29 = vpop.f32.mrb[43].mxu0 }
 0x14e   :  { %v1326_v63 = vmax.f32 %v1307_v57, 0.0  ;;  %v1310_v2 = vadd.f32 %v1309_v62, %v1238_v39  ;;  %v1311_v4 = vpop.f32.mrb[43].mxu1 }
 0x14f   :  { %v1519_v35 = vpack.c.bf16 %v1320_v60, %v1320_v60  ;;  %v1321_v31 = vmax.f32 %v1286_v61, 0.0 }
 0x150   :  { %v1525_v6 = vpack.c.bf16 %v1326_v63, %v1326_v63  ;;  %v1327_v8 = vmax.f32 %v1310_v2, 0.0 }
 0x151   :  { %1367 = vst.msk [vmem:[%s2403_s3] sm:$0xf] %vm1366_vm1, %v1519_v35  ;;  %v1520_v52 = vpack.c.bf16 %v1321_v31, %v1321_v31 }
 0x152   :  { %1373 = vst.msk [vmem:[%s2403_s3 + $0x18] sm:$0xf] %vm1366_vm1, %v1525_v6  ;;  %v1526_v54 = vpack.c.bf16 %v1327_v8, %v1327_v8  ;;  %v1290_v1 = vpop.f32.mrb[44].mxu0 }
 0x153   :  { %1368 = vst.msk [vmem:[%s2403_s3 + $0x4] sm:$0xf] %vm1366_vm1, %v1520_v52  ;;  %v1291_v9 = vadd.f32 %v1290_v1, %v2345_v5  ;;  %v1314_v10 = vpop.f32.mrb[44].mxu1  ;;  %v1292_v11 = vpop.f32.mrb[45].mxu0 }
 0x154   :  { %1374 = vst.msk [vmem:[%s2403_s3 + $0x1c] sm:$0xf] %vm1366_vm1, %v1526_v54  ;;  %v1315_v12 = vadd.f32 %v1314_v10, %v1243_v18  ;;  %v1293_v13 = vpop.f32.mrb[46].mxu0  ;;  %v1316_v14 = vpop.f32.mrb[45].mxu1 }
 0x155   :  { %v1322_v46 = vmax.f32 %v1291_v9, 0.0  ;;  %v1294_v15 = vadd.f32 %v1293_v13, %v2347_v7  ;;  %v1295_v16 = vpop.f32.mrb[47].mxu0  ;;  %v1317_v17 = vpop.f32.mrb[46].mxu1 }
 0x156   :  { %v1328_v48 = vmax.f32 %v1315_v12, 0.0  ;;  %v1318_v21 = vpop.f32.mrb[47].mxu1 }
 0x157   :  { %v1521_v23 = vpack.c.bf16 %v1322_v46, %v1322_v46  ;;  %v1323_v24 = vmax.f32 %v1294_v15, 0.0 }
 0x158   :  { %v1527_v5 = vpack.c.bf16 %v1328_v48, %v1328_v48 }
 0x159   :  { %1369 = vst.msk [vmem:[%s2403_s3 + $0x8] sm:$0xf] %vm1366_vm1, %v1521_v23  ;;  %v1522_v25 = vpack.c.bf16 %v1323_v24, %v1323_v24 }
 0x15a   :  { %1375 = vst.msk [vmem:[%s2403_s3 + $0x20] sm:$0xf] %vm1366_vm1, %v1527_v5  ;;  %v1298_v26 = vpop.f32.mrb[48].mxu0 }
 0x15b   :  { %1370 = vst.msk [vmem:[%s2403_s3 + $0xc] sm:$0xf] %vm1366_vm1, %v1522_v25  ;;  %v1299_v7 = vadd.f32 %v1298_v26, %v2351_v19  ;;  %v1300_v27 = vpop.f32.mrb[49].mxu0 }
 0x15c   :  { %v1301_v28 = vpop.f32.mrb[50].mxu0 }
 0x15d   :  { %v1324_v30 = vmax.f32 %v1299_v7, 0.0  ;;  %v1302_v32 = vadd.f32 %v1301_v28, %v2353_v22  ;;  %v1303_v0 = vpop.f32.mrb[51].mxu0 }
 0x15f   :  { %v1523_v33 = vpack.c.bf16 %v1324_v30, %v1324_v30  ;;  %v1325_v34 = vmax.f32 %v1302_v32, 0.0 }
 0x161   :  { %1371 = vst.msk [vmem:[%s2403_s3 + $0x10] sm:$0xf] %vm1366_vm1, %v1523_v33  ;;  %v1524_v36 = vpack.c.bf16 %v1325_v34, %v1325_v34 }
 0x163   :  { %1372 = vst.msk [vmem:[%s2403_s3 + $0x14] sm:$0xf] %vm1366_vm1, %v1524_v36 }

</bundles_post_ra>
